<compile_context>
chip_gen: v6e
topology: v6e:2x2x1
jax: 0.10.0
libtpu: 0.0.40
codegen_flags: <defaults>
</compile_context>

<pallas_src>
import jax
import jax.numpy as jnp
from jax import lax
from jax.experimental import pallas as pl
from jax.experimental.pallas import tpu as pltpu

LN_EPS = 1e-5  # PyTorch nn.LayerNorm default


def _layernorm(x, gamma, beta):
    mu = jnp.mean(x, axis=-1, keepdims=True)
    var = jnp.mean((x - mu) ** 2, axis=-1, keepdims=True)
    return (x - mu) * lax.rsqrt(var + LN_EPS) * gamma + beta


def _bf16(x):
    return x.astype(jnp.bfloat16)


# ----------------------------------------------------------------------------
# Fused kernel: embed (l==0) -> attention + FFN (every l) -> head (l==last)
# ----------------------------------------------------------------------------
def _make_fused_kernel(depth, heads, dim_head, batch_block, seq_len, return_attn):
    inner = heads * dim_head
    BB, N = batch_block, seq_len

    def kernel(series_ref, con_ref, kmask_ref,
               eg_ref, eb_ref, we_ref, be_ref,
               l1g_ref, l1b_ref, wqkv_ref, wout_ref,
               l2g_ref, l2b_ref, w1_ref, b1_ref, w2_ref, b2_ref,
               hg_ref, hb_ref, wh_ref, bh_ref,
               *outs_and_scratch):
        if return_attn:
            logits_ref, attn_ref, x_scr = outs_and_scratch
        else:
            logits_ref, x_scr = outs_and_scratch
            attn_ref = None

        l = pl.program_id(1)

        # ---- to_patch_embedding: LayerNorm(In) -> Linear(In, D); Dropout = id
        @pl.when(l == 0)
        def _():
            for bb in range(BB):
                s = series_ref[bb]                                   # [N, In]
                sn = _layernorm(s, eg_ref[...], eb_ref[...])
                x_scr[bb * N:(bb + 1) * N, :] = (
                    jnp.dot(_bf16(sn), we_ref[...],
                            preferred_element_type=jnp.float32) + be_ref[...])

        x = x_scr[...]                                               # [BB*N, D] f32

        # ---------------- Attention (pre-LN, residual) -----------------------
        xn = _layernorm(x, l1g_ref[0], l1b_ref[0])
        # W_qkv's q-columns are pre-scaled by dim_head**-0.5 host-side.
        qkv = jnp.dot(_bf16(xn), wqkv_ref[0],
                      preferred_element_type=jnp.float32)            # [BB*N, 3*inner]

        slab_rows = []
        for bb in range(BB):
            qkv_b = qkv[bb * N:(bb + 1) * N, :]                      # [N, 3*inner]
            pad_b = kmask_ref[bb] > 0.5                              # [1, N] pad keys
            scale1p_b = 1.0 + con_ref[bb]                            # [N, N]
            head_outs = []
            # TODO(synk): for heads >= 8 convert this static unroll into
            # lax.fori_loop(..., unroll=True) with a VMEM slab to bound vreg
            # live ranges (64 vregs).
            for h in range(heads):
                q = qkv_b[:, h * dim_head:(h + 1) * dim_head]
                k = qkv_b[:, inner + h * dim_head: inner + (h + 1) * dim_head]
                v = qkv_b[:, 2 * inner + h * dim_head: 2 * inner + (h + 1) * dim_head]

                dots = lax.dot_general(_bf16(q), _bf16(k),
                                       (((1,), (1,)), ((), ())),
                                       preferred_element_type=jnp.float32)
                # PyTorch order: masked_fill(-1e9) THEN dots + con*dots
                dots = jnp.where(pad_b, -1e9, dots)
                dots = dots * scale1p_b
                dots = dots - jnp.max(dots, axis=-1, keepdims=True)
                e = jnp.exp(dots)
                attn = e * pl.reciprocal(jnp.sum(e, axis=-1, keepdims=True),
                                         approx=True)
                attn_bf = _bf16(attn)
                if return_attn:
                    attn_ref[bb, 0, h] = attn_bf                     # bf16 writeback
                head_outs.append(jnp.dot(attn_bf, _bf16(v),
                                         preferred_element_type=jnp.float32))
            out_b = head_outs[0] if heads == 1 else jnp.concatenate(head_outs, -1)
            slab_rows.append(out_b)
        slab = slab_rows[0] if BB == 1 else jnp.concatenate(slab_rows, axis=0)

        proj = jnp.dot(_bf16(slab), wout_ref[0],
                       preferred_element_type=jnp.float32)           # [BB*N, D]
        x = x + proj                                                 # Dropout(0.1) = id

        # ---------------- FeedForward (pre-LN, residual) ----------------------
        xn2 = _layernorm(x, l2g_ref[0], l2b_ref[0])
        h1 = (jnp.dot(_bf16(xn2), w1_ref[0], preferred_element_type=jnp.float32)
              + b1_ref[0])
        # tanh GELU -> EUP slot (set approximate=False to match PyTorch exactly)
        h1 = jax.nn.gelu(h1, approximate=True)
        x = x + (jnp.dot(_bf16(h1), w2_ref[0], preferred_element_type=jnp.float32)
                 + b2_ref[0])
        x_scr[...] = x

        # ---- linear_head: LayerNorm(D) -> Linear(D, C), emitted lane-dense [C, N]
        @pl.when(l == depth - 1)
        def _():
            for bb in range(BB):
                xh = _layernorm(x[bb * N:(bb + 1) * N, :], hg_ref[...], hb_ref[...])
                logits = lax.dot_general(wh_ref[...], _bf16(xh),
                                         (((1,), (1,)), ((), ())),
                                         preferred_element_type=jnp.float32)
                logits_ref[bb] = logits + bh_ref[...]

    return kernel


# ----------------------------------------------------------------------------
# BlockSpec helpers (replicated / per-batch-block / per-layer)
# ----------------------------------------------------------------------------
def _rep(shape):
    n = len(shape)
    return pl.BlockSpec(shape, lambda b, l: (0,) * n)


def _per_bblock(shape):
    n = len(shape)
    return pl.BlockSpec(shape, lambda b, l: (b,) + (0,) * (n - 1))


def _per_layer(shape):
    n = len(shape)
    return pl.BlockSpec(shape, lambda b, l: (l,) + (0,) * (n - 1))


def _vmem_limit_bytes():
    # Per-generation VMEM budget: ~75% of physical VMEM, capped at 100 MiB.
    # 64 MiB chips (v7x) -> 48 MiB; 128 MiB chips (v5e/v6e) -> 96 MiB.
    cap = 64 * 1024 * 1024
    try:
        info = pltpu.get_tpu_info()
        cap = getattr(info, "vmem_capacity_bytes", cap) or cap
    except Exception:
        pass
    return int(min(cap * 3 // 4, 100 * 1024 * 1024))


# ----------------------------------------------------------------------------
# Forward wrapper
# ----------------------------------------------------------------------------
def nmrformer_forward(series, con, labels, params, *, heads, dim_head,
                      batch_block=1, return_attn=True):
    """Returns (logits [B, num_classes, N], [attn_layer_i [B, H, N, N] bf16, ...])."""
    B, N, In = series.shape
    emb, head, lp = params["emb"], params["head"], params["layers"]
    depth = lp["w_qkv"].shape[0]
    D = emb["w"].shape[1]
    C = head["w"].shape[0]
    mlp = lp["w1"].shape[2]
    inner = heads * dim_head
    assert B % batch_block == 0, "batch must be divisible by batch_block"
    BB = batch_block

    # get_attn_pad_mask: keys with label == 0 are padding
    if labels is None:
        kmask = jnp.zeros((B, 1, N), jnp.float32)
    else:
        kmask = (labels == 0).astype(jnp.float32).reshape(B, 1, N)

    # Fold the dim_head**-0.5 score scale into the q-columns of W_qkv (one-time;
    # removes heads*N^2 VPU multiplies per layer from the kernel).
    scale = dim_head ** (-0.5)
    col_scale = jnp.concatenate([jnp.full((inner,), scale, jnp.float32),
                                 jnp.ones((2 * inner,), jnp.float32)])
    w_qkv = (lp["w_qkv"].astype(jnp.float32) * col_scale).astype(jnp.bfloat16)

    out_shapes = [jax.ShapeDtypeStruct((B, C, N), jnp.float32)]
    out_specs = [pl.BlockSpec((BB, C, N), lambda b, l: (b, 0, 0))]
    if return_attn:
        # bf16 attention maps: halves HBM writeback and the double-buffered
        # out block in VMEM (fits 64-MiB-VMEM chips at realistic sizes).
        out_shapes.append(jax.ShapeDtypeStruct((B, depth, heads, N, N),
                                               jnp.bfloat16))
        out_specs.append(pl.BlockSpec((BB, 1, heads, N, N),
                                      lambda b, l: (b, l, 0, 0, 0)))

    grid_spec = pltpu.PrefetchScalarGridSpec(
        num_scalar_prefetch=0,
        grid=(B // BB, depth),
        in_specs=[
            _per_bblock((BB, N, In)),                    # series
            _per_bblock((BB, N, N)),                     # con
            _per_bblock((BB, 1, N)),                     # pad-key mask
            _rep((1, In)), _rep((1, In)),                # embed LN gamma/beta
            _rep((In, D)), _rep((1, D)),                 # embed W, bias
            _per_layer((1, 1, D)), _per_layer((1, 1, D)),        # ln1 gamma/beta
            _per_layer((1, D, 3 * inner)),                       # W_qkv (q pre-scaled)
            _per_layer((1, inner, D)),                           # W_out
            _per_layer((1, 1, D)), _per_layer((1, 1, D)),        # ln2 gamma/beta
            _per_layer((1, D, mlp)), _per_layer((1, 1, mlp)),    # W1, b1
            _per_layer((1, mlp, D)), _per_layer((1, 1, D)),      # W2, b2
            _rep((1, D)), _rep((1, D)),                  # head LN gamma/beta
            _rep((C, D)), _rep((C, 1)),                  # head W [C,D], bias [C,1]
        ],
        out_specs=tuple(out_specs),
        scratch_shapes=[
            pltpu.VMEM((BB * N, D), jnp.float32),        # resident activation x
        ],
    )

    kernel = _make_fused_kernel(depth, heads, dim_head, BB, N, return_attn)
    result = pl.pallas_call(
        kernel,
        grid_spec=grid_spec,
        out_shape=tuple(out_shapes),
        compiler_params=pltpu.CompilerParams(
            dimension_semantics=("parallel", "arbitrary"),
            vmem_limit_bytes=_vmem_limit_bytes()),
    )(series, con, kmask,
      emb["g"], emb["b"], emb["w"], emb["bias"],
      lp["ln1_g"], lp["ln1_b"], w_qkv, lp["w_out"],
      lp["ln2_g"], lp["ln2_b"], lp["w1"], lp["b1"], lp["w2"], lp["b2"],
      head["g"], head["b"], head["w"], head["bias"])

    if return_attn:
        logits, attn_all = result
        attns = [attn_all[:, i] for i in range(depth)]
        return logits, attns
    return result[0], []


# ----------------------------------------------------------------------------
# Pure-JAX reference (same numeric choices: bf16 matmul operands, f32 accum,
# tanh GELU; exact softmax reciprocal) for tolerance-asserted comparison.
# ----------------------------------------------------------------------------
def _ref_forward(series, con, labels, params, *, heads, dim_head):
    emb, head, lp = params["emb"], params["head"], params["layers"]
    depth = lp["w_qkv"].shape[0]
    inner = heads * dim_head
    scale = dim_head ** (-0.5)
    B, N, _ = series.shape

    def ln(x, g, b):
        mu = jnp.mean(x, -1, keepdims=True)
        var = jnp.mean((x - mu) ** 2, -1, keepdims=True)
        return (x - mu) * lax.rsqrt(var + LN_EPS) * g + b

    def mm(a, w):
        return jnp.einsum("...i,io->...o", a.astype(jnp.bfloat16), w,
                          preferred_element_type=jnp.float32)

    x = mm(ln(series, emb["g"], emb["b"]), emb["w"]) + emb["bias"]
    if labels is None:
        pad = jnp.zeros((B, 1, 1, N), bool)
    else:
        pad = (labels == 0)[:, None, None, :]
    attns = []
    for li in range(depth):
        xn = ln(x, lp["ln1_g"][li], lp["ln1_b"][li])
        qkv = mm(xn, lp["w_qkv"][li])
        q, k, v = jnp.split(qkv, 3, axis=-1)
        sh = lambda t: t.reshape(B, N, heads, dim_head).transpose(0, 2, 1, 3)
        q, k, v = sh(q), sh(k), sh(v)
        dots = jnp.einsum("bhqd,bhkd->bhqk", q.astype(jnp.bfloat16),
                          k.astype(jnp.bfloat16),
                          preferred_element_type=jnp.float32) * scale
        dots = jnp.where(pad, -1e9, dots)             # masked_fill
        dots = dots * (1.0 + con[:, None])            # dots + con*dots
        attn = jax.nn.softmax(dots, axis=-1)
        attns.append(attn)
        out = jnp.einsum("bhqk,bhkd->bhqd", attn.astype(jnp.bfloat16),
                         v.astype(jnp.bfloat16),
                         preferred_element_type=jnp.float32)
        out = out.transpose(0, 2, 1, 3).reshape(B, N, inner)
        x = x + mm(out, lp["w_out"][li])
        xn2 = ln(x, lp["ln2_g"][li], lp["ln2_b"][li])
        h1 = jax.nn.gelu(mm(xn2, lp["w1"][li]) + lp["b1"][li], approximate=True)
        x = x + mm(h1, lp["w2"][li]) + lp["b2"][li]
    xh = ln(x, head["g"], head["b"])
    logits = jnp.einsum("cd,bnd->bcn", head["w"], xh.astype(jnp.bfloat16),
                        preferred_element_type=jnp.float32) + head["bias"][None]
    return logits, attns


# ----------------------------------------------------------------------------
# Deterministic parameter init (shapes from NMRformer.__init__)
# Matmul weights stored in bf16; LN params / biases in f32.
# ----------------------------------------------------------------------------
def init_params(key, input_dim, num_classes, dim, mlp_dim, depth, dim_head, heads):
    inner = dim_head * heads

    def lin(k, *shape):
        return (jax.random.normal(k, shape, jnp.float32) * 0.05).astype(jnp.bfloat16)

    keys = jax.random.split(key, 6)
    params = {
        "emb": dict(g=jnp.ones((1, input_dim), jnp.float32),
                    b=jnp.zeros((1, input_dim), jnp.float32),
                    w=lin(keys[0], input_dim, dim),
                    bias=jnp.zeros((1, dim), jnp.float32)),
        "head": dict(g=jnp.ones((1, dim), jnp.float32),
                     b=jnp.zeros((1, dim), jnp.float32),
                     w=lin(keys[1], num_classes, dim),        # [C, D] (PyTorch layout)
                     bias=jnp.zeros((num_classes, 1), jnp.float32)),
        "layers": dict(
            ln1_g=jnp.ones((depth, 1, dim), jnp.float32),
            ln1_b=jnp.zeros((depth, 1, dim), jnp.float32),
            w_qkv=lin(keys[2], depth, dim, 3 * inner),        # to_qkv (bias=False)
            w_out=lin(keys[3], depth, inner, dim),            # to_out (bias=False)
            ln2_g=jnp.ones((depth, 1, dim), jnp.float32),
            ln2_b=jnp.zeros((depth, 1, dim), jnp.float32),
            w1=lin(keys[4], depth, dim, mlp_dim),
            b1=jnp.zeros((depth, 1, mlp_dim), jnp.float32),
            w2=lin(keys[5], depth, mlp_dim, dim),
            b2=jnp.zeros((depth, 1, dim), jnp.float32)),
    }
    return params


# ----------------------------------------------------------------------------
if __name__ == "__main__":
    B, N, input_dim = 4, 8, 16
    dim, mlp_dim, depth, dim_head, heads, num_classes = 32, 64, 2, 8, 4, 5

    key = jax.random.PRNGKey(0)
    k1, k2, k3 = jax.random.split(key, 3)
    series = jax.random.normal(k1, (B, N, input_dim), jnp.float32)
    con = jax.random.uniform(k2, (B, N, N), jnp.float32, minval=0.0, maxval=0.5)
    labels = jnp.array([[1, 2, 3, 4, 5, 6, 0, 0],
                        [1, 1, 2, 3, 4, 0, 0, 0],
                        [2, 2, 2, 2, 0, 0, 0, 0],
                        [5, 4, 3, 2, 1, 1, 1, 0]], dtype=jnp.int32)

    params = init_params(k3, input_dim, num_classes, dim, mlp_dim,
                         depth, dim_head, heads)

    logits, attns = nmrformer_forward(series, con, labels, params,
                                      heads=heads, dim_head=dim_head,
                                      batch_block=2, return_attn=True)
    jax.block_until_ready(logits)
    for a in attns:
        jax.block_until_ready(a)

    assert logits.shape == (B, num_classes, N)
    assert all(a.shape == (B, heads, N, N) for a in attns)

    # Tolerance-asserted pure-JAX reference comparison.
    ref_logits, ref_attns = _ref_forward(series, con, labels, params,
                                         heads=heads, dim_head=dim_head)
    err_logits = float(jnp.max(jnp.abs(logits - ref_logits)))
    err_attn = max(float(jnp.max(jnp.abs(a.astype(jnp.float32) - ra)))
                   for a, ra in zip(attns, ref_attns))
    assert err_logits < 5e-2, f"logits mismatch vs reference: {err_logits}"
    assert err_attn < 2e-2, f"attention-map mismatch vs reference: {err_attn}"

    # Attention-map output is optional (removes the writeback bottleneck).
    logits2, _ = nmrformer_forward(series, con, labels, params,
                                   heads=heads, dim_head=dim_head,
                                   batch_block=2, return_attn=False)
    jax.block_until_ready(logits2)
    assert float(jnp.max(jnp.abs(logits2 - logits))) < 1e-3

    print("KERNEL_OK")
</pallas_src>

<mosaic_0001>
module attributes {stable_mosaic.version = 11 : i64} {
  func.func @kernel(%arg0: i32, %arg1: i32, %arg2: memref<2x8x16xf32, #tpu.memory_space<vmem>>, %arg3: memref<2x8x8xf32, #tpu.memory_space<vmem>>, %arg4: memref<2x1x8xf32, #tpu.memory_space<vmem>>, %arg5: memref<1x16xf32, #tpu.memory_space<vmem>>, %arg6: memref<1x16xf32, #tpu.memory_space<vmem>>, %arg7: memref<16x32xbf16, #tpu.memory_space<vmem>>, %arg8: memref<1x32xf32, #tpu.memory_space<vmem>>, %arg9: memref<1x1x32xf32, #tpu.memory_space<vmem>>, %arg10: memref<1x1x32xf32, #tpu.memory_space<vmem>>, %arg11: memref<1x32x96xbf16, #tpu.memory_space<vmem>>, %arg12: memref<1x32x32xbf16, #tpu.memory_space<vmem>>, %arg13: memref<1x1x32xf32, #tpu.memory_space<vmem>>, %arg14: memref<1x1x32xf32, #tpu.memory_space<vmem>>, %arg15: memref<1x32x64xbf16, #tpu.memory_space<vmem>>, %arg16: memref<1x1x64xf32, #tpu.memory_space<vmem>>, %arg17: memref<1x64x32xbf16, #tpu.memory_space<vmem>>, %arg18: memref<1x1x32xf32, #tpu.memory_space<vmem>>, %arg19: memref<1x32xf32, #tpu.memory_space<vmem>>, %arg20: memref<1x32xf32, #tpu.memory_space<vmem>>, %arg21: memref<5x32xbf16, #tpu.memory_space<vmem>>, %arg22: memref<5x1xf32, #tpu.memory_space<vmem>>, %arg23: memref<2x5x8xf32, #tpu.memory_space<vmem>>, %arg24: memref<2x1x4x8x8xbf16, #tpu.memory_space<vmem>>, %arg25: memref<16x32xf32, #tpu.memory_space<vmem>>) attributes {dimension_semantics = [#tpu.dimension_semantics<parallel>, #tpu.dimension_semantics<arbitrary>], iteration_bounds = array<i64: 2, 2>, scalar_prefetch = 0 : i64, scratch_operands = 1 : i64, tpu.core_type = #tpu.core_type<tc>, window_params = [{transform_indices = @transform_0, window_bounds = array<i64: 2, 8, 16>}, {transform_indices = @transform_1, window_bounds = array<i64: 2, 8, 8>}, {transform_indices = @transform_2, window_bounds = array<i64: 2, 1, 8>}, {pipeline_mode = #tpu.pipeline_mode<synchronous>, transform_indices = @transform_3, window_bounds = array<i64: 1, 16>}, {pipeline_mode = #tpu.pipeline_mode<synchronous>, transform_indices = @transform_4, window_bounds = array<i64: 1, 16>}, {pipeline_mode = #tpu.pipeline_mode<synchronous>, transform_indices = @transform_5, window_bounds = array<i64: 16, 32>}, {pipeline_mode = #tpu.pipeline_mode<synchronous>, transform_indices = @transform_6, window_bounds = array<i64: 1, 32>}, {transform_indices = @transform_7, window_bounds = array<i64: 1, 1, 32>}, {transform_indices = @transform_8, window_bounds = array<i64: 1, 1, 32>}, {transform_indices = @transform_9, window_bounds = array<i64: 1, 32, 96>}, {transform_indices = @transform_10, window_bounds = array<i64: 1, 32, 32>}, {transform_indices = @transform_11, window_bounds = array<i64: 1, 1, 32>}, {transform_indices = @transform_12, window_bounds = array<i64: 1, 1, 32>}, {transform_indices = @transform_13, window_bounds = array<i64: 1, 32, 64>}, {transform_indices = @transform_14, window_bounds = array<i64: 1, 1, 64>}, {transform_indices = @transform_15, window_bounds = array<i64: 1, 64, 32>}, {transform_indices = @transform_16, window_bounds = array<i64: 1, 1, 32>}, {pipeline_mode = #tpu.pipeline_mode<synchronous>, transform_indices = @transform_17, window_bounds = array<i64: 1, 32>}, {pipeline_mode = #tpu.pipeline_mode<synchronous>, transform_indices = @transform_18, window_bounds = array<i64: 1, 32>}, {pipeline_mode = #tpu.pipeline_mode<synchronous>, transform_indices = @transform_19, window_bounds = array<i64: 5, 32>}, {pipeline_mode = #tpu.pipeline_mode<synchronous>, transform_indices = @transform_20, window_bounds = array<i64: 5, 1>}, {transform_indices = @transform_21, window_bounds = array<i64: 2, 5, 8>}, {transform_indices = @transform_22, window_bounds = array<i64: 2, 1, 4, 8, 8>}]} {
    %c0_i32 = arith.constant 0 : i32
    %0 = arith.cmpi eq, %arg1, %c0_i32 : i32
    %1 = arith.extui %0 : i1 to i32
    %c0_i32_0 = arith.constant 0 : i32
    %2 = arith.cmpi ne, %1, %c0_i32_0 : i32
    scf.if %2 {
      %c0_145 = arith.constant 0 : index
      %c0_146 = arith.constant 0 : index
      %c0_147 = arith.constant 0 : index
      %336 = vector.load %arg2[%c0_145, %c0_146, %c0_147] : memref<2x8x16xf32, #tpu.memory_space<vmem>>, vector<1x8x16xf32>
      %337 = vector.shape_cast %336 : vector<1x8x16xf32> to vector<8x16xf32>
      %c0_148 = arith.constant 0 : index
      %c0_149 = arith.constant 0 : index
      %338 = vector.load %arg5[%c0_148, %c0_149] : memref<1x16xf32, #tpu.memory_space<vmem>>, vector<1x16xf32>
      %c0_150 = arith.constant 0 : index
      %c0_151 = arith.constant 0 : index
      %339 = vector.load %arg6[%c0_150, %c0_151] : memref<1x16xf32, #tpu.memory_space<vmem>>, vector<1x16xf32>
      %cst_152 = arith.constant dense<0.000000e+00> : vector<8xf32>
      %340 = vector.multi_reduction <add>, %337, %cst_152 [1] : vector<8x16xf32> to vector<8xf32>
      %341 = vector.shape_cast %340 : vector<8xf32> to vector<8x1xf32>
      %cst_153 = arith.constant 1.600000e+01 : f32
      %342 = vector.broadcast %cst_153 : f32 to vector<8x1xf32>
      %343 = arith.divf %341, %342 : vector<8x1xf32>
      %344 = vector.broadcast %343 : vector<8x1xf32> to vector<8x16xf32>
      %345 = arith.subf %337, %344 : vector<8x16xf32>
      %346 = arith.mulf %345, %345 : vector<8x16xf32>
      %cst_154 = arith.constant dense<0.000000e+00> : vector<8xf32>
      %347 = vector.multi_reduction <add>, %346, %cst_154 [1] : vector<8x16xf32> to vector<8xf32>
      %348 = vector.shape_cast %347 : vector<8xf32> to vector<8x1xf32>
      %cst_155 = arith.constant 1.600000e+01 : f32
      %349 = vector.broadcast %cst_155 : f32 to vector<8x1xf32>
      %350 = arith.divf %348, %349 : vector<8x1xf32>
      %351 = vector.broadcast %343 : vector<8x1xf32> to vector<8x16xf32>
      %352 = arith.subf %337, %351 : vector<8x16xf32>
      %cst_156 = arith.constant 9.99999974E-6 : f32
      %353 = vector.broadcast %cst_156 : f32 to vector<8x1xf32>
      %354 = arith.addf %350, %353 : vector<8x1xf32>
      %355 = math.rsqrt %354 : vector<8x1xf32>
      %356 = vector.broadcast %355 : vector<8x1xf32> to vector<8x16xf32>
      %357 = arith.mulf %352, %356 : vector<8x16xf32>
      %358 = vector.broadcast %338 : vector<1x16xf32> to vector<8x16xf32>
      %359 = arith.mulf %357, %358 : vector<8x16xf32>
      %360 = vector.broadcast %339 : vector<1x16xf32> to vector<8x16xf32>
      %361 = arith.addf %359, %360 : vector<8x16xf32>
      %362 = arith.truncf %361 : vector<8x16xf32> to vector<8x16xbf16>
      %c0_157 = arith.constant 0 : index
      %c0_158 = arith.constant 0 : index
      %363 = vector.load %arg7[%c0_157, %c0_158] : memref<16x32xbf16, #tpu.memory_space<vmem>>, vector<16x32xbf16>
      %cst_159 = arith.constant dense<0.000000e+00> : vector<8x32xf32>
      %364 = tpu.matmul %362, %363, %cst_159 {dimension_numbers = #tpu.dot_dimension_numbers<[1], [0], [0], [1], [0, 0, 1, 1], [], []>} : vector<8x16xbf16>, vector<16x32xbf16>, vector<8x32xf32> -> vector<8x32xf32>
      %c0_160 = arith.constant 0 : index
      %c0_161 = arith.constant 0 : index
      %365 = vector.load %arg8[%c0_160, %c0_161] : memref<1x32xf32, #tpu.memory_space<vmem>>, vector<1x32xf32>
      %366 = vector.broadcast %365 : vector<1x32xf32> to vector<8x32xf32>
      %367 = arith.addf %364, %366 : vector<8x32xf32>
      %c0_162 = arith.constant 0 : index
      %c0_163 = arith.constant 0 : index
      %368 = vector.load %arg25[%c0_162, %c0_163] : memref<16x32xf32, #tpu.memory_space<vmem>>, vector<8x32xf32>
      tpu.vector_store %arg25[%c0_162, %c0_163], %367 {strides = array<i32>} : memref<16x32xf32, #tpu.memory_space<vmem>>, vector<8x32xf32>,
      %c1_164 = arith.constant 1 : index
      %c0_165 = arith.constant 0 : index
      %c0_166 = arith.constant 0 : index
      %369 = vector.load %arg2[%c1_164, %c0_165, %c0_166] : memref<2x8x16xf32, #tpu.memory_space<vmem>>, vector<1x8x16xf32>
      %370 = vector.shape_cast %369 : vector<1x8x16xf32> to vector<8x16xf32>
      %c0_167 = arith.constant 0 : index
      %c0_168 = arith.constant 0 : index
      %371 = vector.load %arg5[%c0_167, %c0_168] : memref<1x16xf32, #tpu.memory_space<vmem>>, vector<1x16xf32>
      %c0_169 = arith.constant 0 : index
      %c0_170 = arith.constant 0 : index
      %372 = vector.load %arg6[%c0_169, %c0_170] : memref<1x16xf32, #tpu.memory_space<vmem>>, vector<1x16xf32>
      %cst_171 = arith.constant dense<0.000000e+00> : vector<8xf32>
      %373 = vector.multi_reduction <add>, %370, %cst_171 [1] : vector<8x16xf32> to vector<8xf32>
      %374 = vector.shape_cast %373 : vector<8xf32> to vector<8x1xf32>
      %cst_172 = arith.constant 1.600000e+01 : f32
      %375 = vector.broadcast %cst_172 : f32 to vector<8x1xf32>
      %376 = arith.divf %374, %375 : vector<8x1xf32>
      %377 = vector.broadcast %376 : vector<8x1xf32> to vector<8x16xf32>
      %378 = arith.subf %370, %377 : vector<8x16xf32>
      %379 = arith.mulf %378, %378 : vector<8x16xf32>
      %cst_173 = arith.constant dense<0.000000e+00> : vector<8xf32>
      %380 = vector.multi_reduction <add>, %379, %cst_173 [1] : vector<8x16xf32> to vector<8xf32>
      %381 = vector.shape_cast %380 : vector<8xf32> to vector<8x1xf32>
      %cst_174 = arith.constant 1.600000e+01 : f32
      %382 = vector.broadcast %cst_174 : f32 to vector<8x1xf32>
      %383 = arith.divf %381, %382 : vector<8x1xf32>
      %384 = vector.broadcast %376 : vector<8x1xf32> to vector<8x16xf32>
      %385 = arith.subf %370, %384 : vector<8x16xf32>
      %cst_175 = arith.constant 9.99999974E-6 : f32
      %386 = vector.broadcast %cst_175 : f32 to vector<8x1xf32>
      %387 = arith.addf %383, %386 : vector<8x1xf32>
      %388 = math.rsqrt %387 : vector<8x1xf32>
      %389 = vector.broadcast %388 : vector<8x1xf32> to vector<8x16xf32>
      %390 = arith.mulf %385, %389 : vector<8x16xf32>
      %391 = vector.broadcast %371 : vector<1x16xf32> to vector<8x16xf32>
      %392 = arith.mulf %390, %391 : vector<8x16xf32>
      %393 = vector.broadcast %372 : vector<1x16xf32> to vector<8x16xf32>
      %394 = arith.addf %392, %393 : vector<8x16xf32>
      %395 = arith.truncf %394 : vector<8x16xf32> to vector<8x16xbf16>
      %c0_176 = arith.constant 0 : index
      %c0_177 = arith.constant 0 : index
      %396 = vector.load %arg7[%c0_176, %c0_177] : memref<16x32xbf16, #tpu.memory_space<vmem>>, vector<16x32xbf16>
      %cst_178 = arith.constant dense<0.000000e+00> : vector<8x32xf32>
      %397 = tpu.matmul %395, %396, %cst_178 {dimension_numbers = #tpu.dot_dimension_numbers<[1], [0], [0], [1], [0, 0, 1, 1], [], []>} : vector<8x16xbf16>, vector<16x32xbf16>, vector<8x32xf32> -> vector<8x32xf32>
      %c0_179 = arith.constant 0 : index
      %c0_180 = arith.constant 0 : index
      %398 = vector.load %arg8[%c0_179, %c0_180] : memref<1x32xf32, #tpu.memory_space<vmem>>, vector<1x32xf32>
      %399 = vector.broadcast %398 : vector<1x32xf32> to vector<8x32xf32>
      %400 = arith.addf %397, %399 : vector<8x32xf32>
      %c8 = arith.constant 8 : index
      %c0_181 = arith.constant 0 : index
      %401 = vector.load %arg25[%c8, %c0_181] : memref<16x32xf32, #tpu.memory_space<vmem>>, vector<8x32xf32>
      tpu.vector_store %arg25[%c8, %c0_181], %400 {strides = array<i32>} : memref<16x32xf32, #tpu.memory_space<vmem>>, vector<8x32xf32>,
    } else {
    }
    %c0 = arith.constant 0 : index
    %c0_1 = arith.constant 0 : index
    %3 = vector.load %arg25[%c0, %c0_1] : memref<16x32xf32, #tpu.memory_space<vmem>>, vector<16x32xf32>
    %c0_2 = arith.constant 0 : index
    %c0_3 = arith.constant 0 : index
    %c0_4 = arith.constant 0 : index
    %4 = vector.load %arg9[%c0_2, %c0_3, %c0_4] : memref<1x1x32xf32, #tpu.memory_space<vmem>>, vector<1x1x32xf32>
    %5 = vector.shape_cast %4 : vector<1x1x32xf32> to vector<1x32xf32>
    %c0_5 = arith.constant 0 : index
    %c0_6 = arith.constant 0 : index
    %c0_7 = arith.constant 0 : index
    %6 = vector.load %arg10[%c0_5, %c0_6, %c0_7] : memref<1x1x32xf32, #tpu.memory_space<vmem>>, vector<1x1x32xf32>
    %7 = vector.shape_cast %6 : vector<1x1x32xf32> to vector<1x32xf32>
    %cst = arith.constant dense<0.000000e+00> : vector<16xf32>
    %8 = vector.multi_reduction <add>, %3, %cst [1] : vector<16x32xf32> to vector<16xf32>
    %9 = vector.shape_cast %8 : vector<16xf32> to vector<16x1xf32>
    %cst_8 = arith.constant 3.200000e+01 : f32
    %10 = vector.broadcast %cst_8 : f32 to vector<16x1xf32>
    %11 = arith.divf %9, %10 : vector<16x1xf32>
    %12 = vector.broadcast %11 : vector<16x1xf32> to vector<16x32xf32>
    %13 = arith.subf %3, %12 : vector<16x32xf32>
    %14 = arith.mulf %13, %13 : vector<16x32xf32>
    %cst_9 = arith.constant dense<0.000000e+00> : vector<16xf32>
    %15 = vector.multi_reduction <add>, %14, %cst_9 [1] : vector<16x32xf32> to vector<16xf32>
    %16 = vector.shape_cast %15 : vector<16xf32> to vector<16x1xf32>
    %cst_10 = arith.constant 3.200000e+01 : f32
    %17 = vector.broadcast %cst_10 : f32 to vector<16x1xf32>
    %18 = arith.divf %16, %17 : vector<16x1xf32>
    %19 = vector.broadcast %11 : vector<16x1xf32> to vector<16x32xf32>
    %20 = arith.subf %3, %19 : vector<16x32xf32>
    %cst_11 = arith.constant 9.99999974E-6 : f32
    %21 = vector.broadcast %cst_11 : f32 to vector<16x1xf32>
    %22 = arith.addf %18, %21 : vector<16x1xf32>
    %23 = math.rsqrt %22 : vector<16x1xf32>
    %24 = vector.broadcast %23 : vector<16x1xf32> to vector<16x32xf32>
    %25 = arith.mulf %20, %24 : vector<16x32xf32>
    %26 = vector.broadcast %5 : vector<1x32xf32> to vector<16x32xf32>
    %27 = arith.mulf %25, %26 : vector<16x32xf32>
    %28 = vector.broadcast %7 : vector<1x32xf32> to vector<16x32xf32>
    %29 = arith.addf %27, %28 : vector<16x32xf32>
    %30 = arith.truncf %29 : vector<16x32xf32> to vector<16x32xbf16>
    %c0_12 = arith.constant 0 : index
    %c0_13 = arith.constant 0 : index
    %c0_14 = arith.constant 0 : index
    %31 = vector.load %arg11[%c0_12, %c0_13, %c0_14] : memref<1x32x96xbf16, #tpu.memory_space<vmem>>, vector<1x32x96xbf16>
    %32 = vector.shape_cast %31 : vector<1x32x96xbf16> to vector<32x96xbf16>
    %cst_15 = arith.constant dense<0.000000e+00> : vector<16x96xf32>
    %33 = tpu.matmul %30, %32, %cst_15 {dimension_numbers = #tpu.dot_dimension_numbers<[1], [0], [0], [1], [0, 0, 1, 1], [], []>} : vector<16x32xbf16>, vector<32x96xbf16>, vector<16x96xf32> -> vector<16x96xf32>
    %34 = vector.extract_strided_slice %33 {offsets = [0, 0], sizes = [8, 96], strides = [1, 1]} : vector<16x96xf32> to vector<8x96xf32>
    %c0_16 = arith.constant 0 : index
    %c0_17 = arith.constant 0 : index
    %c0_18 = arith.constant 0 : index
    %35 = vector.load %arg4[%c0_16, %c0_17, %c0_18] : memref<2x1x8xf32, #tpu.memory_space<vmem>>, vector<1x1x8xf32>
    %36 = vector.shape_cast %35 : vector<1x1x8xf32> to vector<1x8xf32>
    %cst_19 = arith.constant 5.000000e-01 : f32
    %37 = vector.broadcast %cst_19 : f32 to vector<1x8xf32>
    %38 = arith.cmpf ogt, %36, %37 : vector<1x8xf32>
    %c0_20 = arith.constant 0 : index
    %c0_21 = arith.constant 0 : index
    %c0_22 = arith.constant 0 : index
    %39 = vector.load %arg3[%c0_20, %c0_21, %c0_22] : memref<2x8x8xf32, #tpu.memory_space<vmem>>, vector<1x8x8xf32>
    %40 = vector.shape_cast %39 : vector<1x8x8xf32> to vector<8x8xf32>
    %cst_23 = arith.constant 1.000000e+00 : f32
    %41 = vector.broadcast %cst_23 : f32 to vector<8x8xf32>
    %42 = arith.addf %41, %40 : vector<8x8xf32>
    %43 = vector.extract_strided_slice %34 {offsets = [0, 0], sizes = [8, 8], strides = [1, 1]} : vector<8x96xf32> to vector<8x8xf32>
    %44 = vector.extract_strided_slice %34 {offsets = [0, 32], sizes = [8, 8], strides = [1, 1]} : vector<8x96xf32> to vector<8x8xf32>
    %45 = vector.extract_strided_slice %34 {offsets = [0, 64], sizes = [8, 8], strides = [1, 1]} : vector<8x96xf32> to vector<8x8xf32>
    %46 = arith.truncf %43 : vector<8x8xf32> to vector<8x8xbf16>
    %47 = arith.truncf %44 : vector<8x8xf32> to vector<8x8xbf16>
    %cst_24 = arith.constant dense<0.000000e+00> : vector<8x8xf32>
    %48 = tpu.matmul %46, %47, %cst_24 {dimension_numbers = #tpu.dot_dimension_numbers<[1], [1], [0], [0], [0, 0, 1, 0], [], []>} : vector<8x8xbf16>, vector<8x8xbf16>, vector<8x8xf32> -> vector<8x8xf32>
    %cst_25 = arith.constant -1.000000e+09 : f32
    %49 = vector.shape_cast %38 : vector<1x8xi1> to vector<1x8xi1>
    %50 = vector.broadcast %49 : vector<1x8xi1> to vector<8x8xi1>
    %51 = vector.broadcast %cst_25 : f32 to vector<8x8xf32>
    %52 = arith.select %50, %51, %48 : vector<8x8xi1>, vector<8x8xf32>
    %53 = arith.mulf %52, %42 : vector<8x8xf32>
    %cst_26 = arith.constant dense<0xFF800000> : vector<8xf32>
    %54 = vector.multi_reduction <maximumf>, %53, %cst_26 [1] : vector<8x8xf32> to vector<8xf32>
    %55 = vector.shape_cast %54 : vector<8xf32> to vector<8x1xf32>
    %56 = vector.broadcast %55 : vector<8x1xf32> to vector<8x8xf32>
    %57 = arith.subf %53, %56 : vector<8x8xf32>
    %58 = math.exp %57 : vector<8x8xf32>
    %cst_27 = arith.constant dense<0.000000e+00> : vector<8xf32>
    %59 = vector.multi_reduction <add>, %58, %cst_27 [1] : vector<8x8xf32> to vector<8xf32>
    %60 = vector.shape_cast %59 : vector<8xf32> to vector<8x1xf32>
    %61 = tpu.reciprocal %60 {approx = true} : vector<8x1xf32> -> vector<8x1xf32>
    %62 = vector.broadcast %61 : vector<8x1xf32> to vector<8x8xf32>
    %63 = arith.mulf %58, %62 : vector<8x8xf32>
    %64 = arith.truncf %63 : vector<8x8xf32> to vector<8x8xbf16>
    %c0_28 = arith.constant 0 : index
    %c0_29 = arith.constant 0 : index
    %c0_30 = arith.constant 0 : index
    %c0_31 = arith.constant 0 : index
    %c0_32 = arith.constant 0 : index
    %65 = vector.load %arg24[%c0_28, %c0_29, %c0_30, %c0_31, %c0_32] : memref<2x1x4x8x8xbf16, #tpu.memory_space<vmem>>, vector<1x1x1x8x8xbf16>
    %66 = vector.shape_cast %65 : vector<1x1x1x8x8xbf16> to vector<8x8xbf16>
    %67 = vector.shape_cast %64 : vector<8x8xbf16> to vector<1x1x1x8x8xbf16>
    tpu.vector_store %arg24[%c0_28, %c0_29, %c0_30, %c0_31, %c0_32], %67 {strides = array<i32>} : memref<2x1x4x8x8xbf16, #tpu.memory_space<vmem>>, vector<1x1x1x8x8xbf16>,
    %68 = arith.truncf %45 : vector<8x8xf32> to vector<8x8xbf16>
    %cst_33 = arith.constant dense<0.000000e+00> : vector<8x8xf32>
    %69 = tpu.matmul %64, %68, %cst_33 {dimension_numbers = #tpu.dot_dimension_numbers<[1], [0], [0], [1], [0, 0, 1, 1], [], []>} : vector<8x8xbf16>, vector<8x8xbf16>, vector<8x8xf32> -> vector<8x8xf32>
    %70 = vector.extract_strided_slice %34 {offsets = [0, 8], sizes = [8, 8], strides = [1, 1]} : vector<8x96xf32> to vector<8x8xf32>
    %71 = vector.extract_strided_slice %34 {offsets = [0, 40], sizes = [8, 8], strides = [1, 1]} : vector<8x96xf32> to vector<8x8xf32>
    %72 = vector.extract_strided_slice %34 {offsets = [0, 72], sizes = [8, 8], strides = [1, 1]} : vector<8x96xf32> to vector<8x8xf32>
    %73 = arith.truncf %70 : vector<8x8xf32> to vector<8x8xbf16>
    %74 = arith.truncf %71 : vector<8x8xf32> to vector<8x8xbf16>
    %cst_34 = arith.constant dense<0.000000e+00> : vector<8x8xf32>
    %75 = tpu.matmul %73, %74, %cst_34 {dimension_numbers = #tpu.dot_dimension_numbers<[1], [1], [0], [0], [0, 0, 1, 0], [], []>} : vector<8x8xbf16>, vector<8x8xbf16>, vector<8x8xf32> -> vector<8x8xf32>
    %cst_35 = arith.constant -1.000000e+09 : f32
    %76 = vector.shape_cast %38 : vector<1x8xi1> to vector<1x8xi1>
    %77 = vector.broadcast %76 : vector<1x8xi1> to vector<8x8xi1>
    %78 = vector.broadcast %cst_35 : f32 to vector<8x8xf32>
    %79 = arith.select %77, %78, %75 : vector<8x8xi1>, vector<8x8xf32>
    %80 = arith.mulf %79, %42 : vector<8x8xf32>
    %cst_36 = arith.constant dense<0xFF800000> : vector<8xf32>
    %81 = vector.multi_reduction <maximumf>, %80, %cst_36 [1] : vector<8x8xf32> to vector<8xf32>
    %82 = vector.shape_cast %81 : vector<8xf32> to vector<8x1xf32>
    %83 = vector.broadcast %82 : vector<8x1xf32> to vector<8x8xf32>
    %84 = arith.subf %80, %83 : vector<8x8xf32>
    %85 = math.exp %84 : vector<8x8xf32>
    %cst_37 = arith.constant dense<0.000000e+00> : vector<8xf32>
    %86 = vector.multi_reduction <add>, %85, %cst_37 [1] : vector<8x8xf32> to vector<8xf32>
    %87 = vector.shape_cast %86 : vector<8xf32> to vector<8x1xf32>
    %88 = tpu.reciprocal %87 {approx = true} : vector<8x1xf32> -> vector<8x1xf32>
    %89 = vector.broadcast %88 : vector<8x1xf32> to vector<8x8xf32>
    %90 = arith.mulf %85, %89 : vector<8x8xf32>
    %91 = arith.truncf %90 : vector<8x8xf32> to vector<8x8xbf16>
    %c0_38 = arith.constant 0 : index
    %c0_39 = arith.constant 0 : index
    %c1 = arith.constant 1 : index
    %c0_40 = arith.constant 0 : index
    %c0_41 = arith.constant 0 : index
    %92 = vector.load %arg24[%c0_38, %c0_39, %c1, %c0_40, %c0_41] : memref<2x1x4x8x8xbf16, #tpu.memory_space<vmem>>, vector<1x1x1x8x8xbf16>
    %93 = vector.shape_cast %92 : vector<1x1x1x8x8xbf16> to vector<8x8xbf16>
    %94 = vector.shape_cast %91 : vector<8x8xbf16> to vector<1x1x1x8x8xbf16>
    tpu.vector_store %arg24[%c0_38, %c0_39, %c1, %c0_40, %c0_41], %94 {strides = array<i32>} : memref<2x1x4x8x8xbf16, #tpu.memory_space<vmem>>, vector<1x1x1x8x8xbf16>,
    %95 = arith.truncf %72 : vector<8x8xf32> to vector<8x8xbf16>
    %cst_42 = arith.constant dense<0.000000e+00> : vector<8x8xf32>
    %96 = tpu.matmul %91, %95, %cst_42 {dimension_numbers = #tpu.dot_dimension_numbers<[1], [0], [0], [1], [0, 0, 1, 1], [], []>} : vector<8x8xbf16>, vector<8x8xbf16>, vector<8x8xf32> -> vector<8x8xf32>
    %97 = vector.extract_strided_slice %34 {offsets = [0, 16], sizes = [8, 8], strides = [1, 1]} : vector<8x96xf32> to vector<8x8xf32>
    %98 = vector.extract_strided_slice %34 {offsets = [0, 48], sizes = [8, 8], strides = [1, 1]} : vector<8x96xf32> to vector<8x8xf32>
    %99 = vector.extract_strided_slice %34 {offsets = [0, 80], sizes = [8, 8], strides = [1, 1]} : vector<8x96xf32> to vector<8x8xf32>
    %100 = arith.truncf %97 : vector<8x8xf32> to vector<8x8xbf16>
    %101 = arith.truncf %98 : vector<8x8xf32> to vector<8x8xbf16>
    %cst_43 = arith.constant dense<0.000000e+00> : vector<8x8xf32>
    %102 = tpu.matmul %100, %101, %cst_43 {dimension_numbers = #tpu.dot_dimension_numbers<[1], [1], [0], [0], [0, 0, 1, 0], [], []>} : vector<8x8xbf16>, vector<8x8xbf16>, vector<8x8xf32> -> vector<8x8xf32>
    %cst_44 = arith.constant -1.000000e+09 : f32
    %103 = vector.shape_cast %38 : vector<1x8xi1> to vector<1x8xi1>
    %104 = vector.broadcast %103 : vector<1x8xi1> to vector<8x8xi1>
    %105 = vector.broadcast %cst_44 : f32 to vector<8x8xf32>
    %106 = arith.select %104, %105, %102 : vector<8x8xi1>, vector<8x8xf32>
    %107 = arith.mulf %106, %42 : vector<8x8xf32>
    %cst_45 = arith.constant dense<0xFF800000> : vector<8xf32>
    %108 = vector.multi_reduction <maximumf>, %107, %cst_45 [1] : vector<8x8xf32> to vector<8xf32>
    %109 = vector.shape_cast %108 : vector<8xf32> to vector<8x1xf32>
    %110 = vector.broadcast %109 : vector<8x1xf32> to vector<8x8xf32>
    %111 = arith.subf %107, %110 : vector<8x8xf32>
    %112 = math.exp %111 : vector<8x8xf32>
    %cst_46 = arith.constant dense<0.000000e+00> : vector<8xf32>
    %113 = vector.multi_reduction <add>, %112, %cst_46 [1] : vector<8x8xf32> to vector<8xf32>
    %114 = vector.shape_cast %113 : vector<8xf32> to vector<8x1xf32>
    %115 = tpu.reciprocal %114 {approx = true} : vector<8x1xf32> -> vector<8x1xf32>
    %116 = vector.broadcast %115 : vector<8x1xf32> to vector<8x8xf32>
    %117 = arith.mulf %112, %116 : vector<8x8xf32>
    %118 = arith.truncf %117 : vector<8x8xf32> to vector<8x8xbf16>
    %c0_47 = arith.constant 0 : index
    %c0_48 = arith.constant 0 : index
    %c2 = arith.constant 2 : index
    %c0_49 = arith.constant 0 : index
    %c0_50 = arith.constant 0 : index
    %119 = vector.load %arg24[%c0_47, %c0_48, %c2, %c0_49, %c0_50] : memref<2x1x4x8x8xbf16, #tpu.memory_space<vmem>>, vector<1x1x1x8x8xbf16>
    %120 = vector.shape_cast %119 : vector<1x1x1x8x8xbf16> to vector<8x8xbf16>
    %121 = vector.shape_cast %118 : vector<8x8xbf16> to vector<1x1x1x8x8xbf16>
    tpu.vector_store %arg24[%c0_47, %c0_48, %c2, %c0_49, %c0_50], %121 {strides = array<i32>} : memref<2x1x4x8x8xbf16, #tpu.memory_space<vmem>>, vector<1x1x1x8x8xbf16>,
    %122 = arith.truncf %99 : vector<8x8xf32> to vector<8x8xbf16>
    %cst_51 = arith.constant dense<0.000000e+00> : vector<8x8xf32>
    %123 = tpu.matmul %118, %122, %cst_51 {dimension_numbers = #tpu.dot_dimension_numbers<[1], [0], [0], [1], [0, 0, 1, 1], [], []>} : vector<8x8xbf16>, vector<8x8xbf16>, vector<8x8xf32> -> vector<8x8xf32>
    %124 = vector.extract_strided_slice %34 {offsets = [0, 24], sizes = [8, 8], strides = [1, 1]} : vector<8x96xf32> to vector<8x8xf32>
    %125 = vector.extract_strided_slice %34 {offsets = [0, 56], sizes = [8, 8], strides = [1, 1]} : vector<8x96xf32> to vector<8x8xf32>
    %126 = vector.extract_strided_slice %34 {offsets = [0, 88], sizes = [8, 8], strides = [1, 1]} : vector<8x96xf32> to vector<8x8xf32>
    %127 = arith.truncf %124 : vector<8x8xf32> to vector<8x8xbf16>
    %128 = arith.truncf %125 : vector<8x8xf32> to vector<8x8xbf16>
    %cst_52 = arith.constant dense<0.000000e+00> : vector<8x8xf32>
    %129 = tpu.matmul %127, %128, %cst_52 {dimension_numbers = #tpu.dot_dimension_numbers<[1], [1], [0], [0], [0, 0, 1, 0], [], []>} : vector<8x8xbf16>, vector<8x8xbf16>, vector<8x8xf32> -> vector<8x8xf32>
    %cst_53 = arith.constant -1.000000e+09 : f32
    %130 = vector.shape_cast %38 : vector<1x8xi1> to vector<1x8xi1>
    %131 = vector.broadcast %130 : vector<1x8xi1> to vector<8x8xi1>
    %132 = vector.broadcast %cst_53 : f32 to vector<8x8xf32>
    %133 = arith.select %131, %132, %129 : vector<8x8xi1>, vector<8x8xf32>
    %134 = arith.mulf %133, %42 : vector<8x8xf32>
    %cst_54 = arith.constant dense<0xFF800000> : vector<8xf32>
    %135 = vector.multi_reduction <maximumf>, %134, %cst_54 [1] : vector<8x8xf32> to vector<8xf32>
    %136 = vector.shape_cast %135 : vector<8xf32> to vector<8x1xf32>
    %137 = vector.broadcast %136 : vector<8x1xf32> to vector<8x8xf32>
    %138 = arith.subf %134, %137 : vector<8x8xf32>
    %139 = math.exp %138 : vector<8x8xf32>
    %cst_55 = arith.constant dense<0.000000e+00> : vector<8xf32>
    %140 = vector.multi_reduction <add>, %139, %cst_55 [1] : vector<8x8xf32> to vector<8xf32>
    %141 = vector.shape_cast %140 : vector<8xf32> to vector<8x1xf32>
    %142 = tpu.reciprocal %141 {approx = true} : vector<8x1xf32> -> vector<8x1xf32>
    %143 = vector.broadcast %142 : vector<8x1xf32> to vector<8x8xf32>
    %144 = arith.mulf %139, %143 : vector<8x8xf32>
    %145 = arith.truncf %144 : vector<8x8xf32> to vector<8x8xbf16>
    %c0_56 = arith.constant 0 : index
    %c0_57 = arith.constant 0 : index
    %c3 = arith.constant 3 : index
    %c0_58 = arith.constant 0 : index
    %c0_59 = arith.constant 0 : index
    %146 = vector.load %arg24[%c0_56, %c0_57, %c3, %c0_58, %c0_59] : memref<2x1x4x8x8xbf16, #tpu.memory_space<vmem>>, vector<1x1x1x8x8xbf16>
    %147 = vector.shape_cast %146 : vector<1x1x1x8x8xbf16> to vector<8x8xbf16>
    %148 = vector.shape_cast %145 : vector<8x8xbf16> to vector<1x1x1x8x8xbf16>
    tpu.vector_store %arg24[%c0_56, %c0_57, %c3, %c0_58, %c0_59], %148 {strides = array<i32>} : memref<2x1x4x8x8xbf16, #tpu.memory_space<vmem>>, vector<1x1x1x8x8xbf16>,
    %149 = arith.truncf %126 : vector<8x8xf32> to vector<8x8xbf16>
    %cst_60 = arith.constant dense<0.000000e+00> : vector<8x8xf32>
    %150 = tpu.matmul %145, %149, %cst_60 {dimension_numbers = #tpu.dot_dimension_numbers<[1], [0], [0], [1], [0, 0, 1, 1], [], []>} : vector<8x8xbf16>, vector<8x8xbf16>, vector<8x8xf32> -> vector<8x8xf32>
    %151 = tpu.concatenate %69, %96, %123, %150 in 1 : vector<8x8xf32>, vector<8x8xf32>, vector<8x8xf32>, vector<8x8xf32> -> vector<8x32xf32>
    %152 = vector.extract_strided_slice %33 {offsets = [8, 0], sizes = [8, 96], strides = [1, 1]} : vector<16x96xf32> to vector<8x96xf32>
    %c1_61 = arith.constant 1 : index
    %c0_62 = arith.constant 0 : index
    %c0_63 = arith.constant 0 : index
    %153 = vector.load %arg4[%c1_61, %c0_62, %c0_63] : memref<2x1x8xf32, #tpu.memory_space<vmem>>, vector<1x1x8xf32>
    %154 = vector.shape_cast %153 : vector<1x1x8xf32> to vector<1x8xf32>
    %cst_64 = arith.constant 5.000000e-01 : f32
    %155 = vector.broadcast %cst_64 : f32 to vector<1x8xf32>
    %156 = arith.cmpf ogt, %154, %155 : vector<1x8xf32>
    %c1_65 = arith.constant 1 : index
    %c0_66 = arith.constant 0 : index
    %c0_67 = arith.constant 0 : index
    %157 = vector.load %arg3[%c1_65, %c0_66, %c0_67] : memref<2x8x8xf32, #tpu.memory_space<vmem>>, vector<1x8x8xf32>
    %158 = vector.shape_cast %157 : vector<1x8x8xf32> to vector<8x8xf32>
    %cst_68 = arith.constant 1.000000e+00 : f32
    %159 = vector.broadcast %cst_68 : f32 to vector<8x8xf32>
    %160 = arith.addf %159, %158 : vector<8x8xf32>
    %161 = vector.extract_strided_slice %152 {offsets = [0, 0], sizes = [8, 8], strides = [1, 1]} : vector<8x96xf32> to vector<8x8xf32>
    %162 = vector.extract_strided_slice %152 {offsets = [0, 32], sizes = [8, 8], strides = [1, 1]} : vector<8x96xf32> to vector<8x8xf32>
    %163 = vector.extract_strided_slice %152 {offsets = [0, 64], sizes = [8, 8], strides = [1, 1]} : vector<8x96xf32> to vector<8x8xf32>
    %164 = arith.truncf %161 : vector<8x8xf32> to vector<8x8xbf16>
    %165 = arith.truncf %162 : vector<8x8xf32> to vector<8x8xbf16>
    %cst_69 = arith.constant dense<0.000000e+00> : vector<8x8xf32>
    %166 = tpu.matmul %164, %165, %cst_69 {dimension_numbers = #tpu.dot_dimension_numbers<[1], [1], [0], [0], [0, 0, 1, 0], [], []>} : vector<8x8xbf16>, vector<8x8xbf16>, vector<8x8xf32> -> vector<8x8xf32>
    %cst_70 = arith.constant -1.000000e+09 : f32
    %167 = vector.shape_cast %156 : vector<1x8xi1> to vector<1x8xi1>
    %168 = vector.broadcast %167 : vector<1x8xi1> to vector<8x8xi1>
    %169 = vector.broadcast %cst_70 : f32 to vector<8x8xf32>
    %170 = arith.select %168, %169, %166 : vector<8x8xi1>, vector<8x8xf32>
    %171 = arith.mulf %170, %160 : vector<8x8xf32>
    %cst_71 = arith.constant dense<0xFF800000> : vector<8xf32>
    %172 = vector.multi_reduction <maximumf>, %171, %cst_71 [1] : vector<8x8xf32> to vector<8xf32>
    %173 = vector.shape_cast %172 : vector<8xf32> to vector<8x1xf32>
    %174 = vector.broadcast %173 : vector<8x1xf32> to vector<8x8xf32>
    %175 = arith.subf %171, %174 : vector<8x8xf32>
    %176 = math.exp %175 : vector<8x8xf32>
    %cst_72 = arith.constant dense<0.000000e+00> : vector<8xf32>
    %177 = vector.multi_reduction <add>, %176, %cst_72 [1] : vector<8x8xf32> to vector<8xf32>
    %178 = vector.shape_cast %177 : vector<8xf32> to vector<8x1xf32>
    %179 = tpu.reciprocal %178 {approx = true} : vector<8x1xf32> -> vector<8x1xf32>
    %180 = vector.broadcast %179 : vector<8x1xf32> to vector<8x8xf32>
    %181 = arith.mulf %176, %180 : vector<8x8xf32>
    %182 = arith.truncf %181 : vector<8x8xf32> to vector<8x8xbf16>
    %c1_73 = arith.constant 1 : index
    %c0_74 = arith.constant 0 : index
    %c0_75 = arith.constant 0 : index
    %c0_76 = arith.constant 0 : index
    %c0_77 = arith.constant 0 : index
    %183 = vector.load %arg24[%c1_73, %c0_74, %c0_75, %c0_76, %c0_77] : memref<2x1x4x8x8xbf16, #tpu.memory_space<vmem>>, vector<1x1x1x8x8xbf16>
    %184 = vector.shape_cast %183 : vector<1x1x1x8x8xbf16> to vector<8x8xbf16>
    %185 = vector.shape_cast %182 : vector<8x8xbf16> to vector<1x1x1x8x8xbf16>
    tpu.vector_store %arg24[%c1_73, %c0_74, %c0_75, %c0_76, %c0_77], %185 {strides = array<i32>} : memref<2x1x4x8x8xbf16, #tpu.memory_space<vmem>>, vector<1x1x1x8x8xbf16>,
    %186 = arith.truncf %163 : vector<8x8xf32> to vector<8x8xbf16>
    %cst_78 = arith.constant dense<0.000000e+00> : vector<8x8xf32>
    %187 = tpu.matmul %182, %186, %cst_78 {dimension_numbers = #tpu.dot_dimension_numbers<[1], [0], [0], [1], [0, 0, 1, 1], [], []>} : vector<8x8xbf16>, vector<8x8xbf16>, vector<8x8xf32> -> vector<8x8xf32>
    %188 = vector.extract_strided_slice %152 {offsets = [0, 8], sizes = [8, 8], strides = [1, 1]} : vector<8x96xf32> to vector<8x8xf32>
    %189 = vector.extract_strided_slice %152 {offsets = [0, 40], sizes = [8, 8], strides = [1, 1]} : vector<8x96xf32> to vector<8x8xf32>
    %190 = vector.extract_strided_slice %152 {offsets = [0, 72], sizes = [8, 8], strides = [1, 1]} : vector<8x96xf32> to vector<8x8xf32>
    %191 = arith.truncf %188 : vector<8x8xf32> to vector<8x8xbf16>
    %192 = arith.truncf %189 : vector<8x8xf32> to vector<8x8xbf16>
    %cst_79 = arith.constant dense<0.000000e+00> : vector<8x8xf32>
    %193 = tpu.matmul %191, %192, %cst_79 {dimension_numbers = #tpu.dot_dimension_numbers<[1], [1], [0], [0], [0, 0, 1, 0], [], []>} : vector<8x8xbf16>, vector<8x8xbf16>, vector<8x8xf32> -> vector<8x8xf32>
    %cst_80 = arith.constant -1.000000e+09 : f32
    %194 = vector.shape_cast %156 : vector<1x8xi1> to vector<1x8xi1>
    %195 = vector.broadcast %194 : vector<1x8xi1> to vector<8x8xi1>
    %196 = vector.broadcast %cst_80 : f32 to vector<8x8xf32>
    %197 = arith.select %195, %196, %193 : vector<8x8xi1>, vector<8x8xf32>
    %198 = arith.mulf %197, %160 : vector<8x8xf32>
    %cst_81 = arith.constant dense<0xFF800000> : vector<8xf32>
    %199 = vector.multi_reduction <maximumf>, %198, %cst_81 [1] : vector<8x8xf32> to vector<8xf32>
    %200 = vector.shape_cast %199 : vector<8xf32> to vector<8x1xf32>
    %201 = vector.broadcast %200 : vector<8x1xf32> to vector<8x8xf32>
    %202 = arith.subf %198, %201 : vector<8x8xf32>
    %203 = math.exp %202 : vector<8x8xf32>
    %cst_82 = arith.constant dense<0.000000e+00> : vector<8xf32>
    %204 = vector.multi_reduction <add>, %203, %cst_82 [1] : vector<8x8xf32> to vector<8xf32>
    %205 = vector.shape_cast %204 : vector<8xf32> to vector<8x1xf32>
    %206 = tpu.reciprocal %205 {approx = true} : vector<8x1xf32> -> vector<8x1xf32>
    %207 = vector.broadcast %206 : vector<8x1xf32> to vector<8x8xf32>
    %208 = arith.mulf %203, %207 : vector<8x8xf32>
    %209 = arith.truncf %208 : vector<8x8xf32> to vector<8x8xbf16>
    %c1_83 = arith.constant 1 : index
    %c0_84 = arith.constant 0 : index
    %c1_85 = arith.constant 1 : index
    %c0_86 = arith.constant 0 : index
    %c0_87 = arith.constant 0 : index
    %210 = vector.load %arg24[%c1_83, %c0_84, %c1_85, %c0_86, %c0_87] : memref<2x1x4x8x8xbf16, #tpu.memory_space<vmem>>, vector<1x1x1x8x8xbf16>
    %211 = vector.shape_cast %210 : vector<1x1x1x8x8xbf16> to vector<8x8xbf16>
    %212 = vector.shape_cast %209 : vector<8x8xbf16> to vector<1x1x1x8x8xbf16>
    tpu.vector_store %arg24[%c1_83, %c0_84, %c1_85, %c0_86, %c0_87], %212 {strides = array<i32>} : memref<2x1x4x8x8xbf16, #tpu.memory_space<vmem>>, vector<1x1x1x8x8xbf16>,
    %213 = arith.truncf %190 : vector<8x8xf32> to vector<8x8xbf16>
    %cst_88 = arith.constant dense<0.000000e+00> : vector<8x8xf32>
    %214 = tpu.matmul %209, %213, %cst_88 {dimension_numbers = #tpu.dot_dimension_numbers<[1], [0], [0], [1], [0, 0, 1, 1], [], []>} : vector<8x8xbf16>, vector<8x8xbf16>, vector<8x8xf32> -> vector<8x8xf32>
    %215 = vector.extract_strided_slice %152 {offsets = [0, 16], sizes = [8, 8], strides = [1, 1]} : vector<8x96xf32> to vector<8x8xf32>
    %216 = vector.extract_strided_slice %152 {offsets = [0, 48], sizes = [8, 8], strides = [1, 1]} : vector<8x96xf32> to vector<8x8xf32>
    %217 = vector.extract_strided_slice %152 {offsets = [0, 80], sizes = [8, 8], strides = [1, 1]} : vector<8x96xf32> to vector<8x8xf32>
    %218 = arith.truncf %215 : vector<8x8xf32> to vector<8x8xbf16>
    %219 = arith.truncf %216 : vector<8x8xf32> to vector<8x8xbf16>
    %cst_89 = arith.constant dense<0.000000e+00> : vector<8x8xf32>
    %220 = tpu.matmul %218, %219, %cst_89 {dimension_numbers = #tpu.dot_dimension_numbers<[1], [1], [0], [0], [0, 0, 1, 0], [], []>} : vector<8x8xbf16>, vector<8x8xbf16>, vector<8x8xf32> -> vector<8x8xf32>
    %cst_90 = arith.constant -1.000000e+09 : f32
    %221 = vector.shape_cast %156 : vector<1x8xi1> to vector<1x8xi1>
    %222 = vector.broadcast %221 : vector<1x8xi1> to vector<8x8xi1>
    %223 = vector.broadcast %cst_90 : f32 to vector<8x8xf32>
    %224 = arith.select %222, %223, %220 : vector<8x8xi1>, vector<8x8xf32>
    %225 = arith.mulf %224, %160 : vector<8x8xf32>
    %cst_91 = arith.constant dense<0xFF800000> : vector<8xf32>
    %226 = vector.multi_reduction <maximumf>, %225, %cst_91 [1] : vector<8x8xf32> to vector<8xf32>
    %227 = vector.shape_cast %226 : vector<8xf32> to vector<8x1xf32>
    %228 = vector.broadcast %227 : vector<8x1xf32> to vector<8x8xf32>
    %229 = arith.subf %225, %228 : vector<8x8xf32>
    %230 = math.exp %229 : vector<8x8xf32>
    %cst_92 = arith.constant dense<0.000000e+00> : vector<8xf32>
    %231 = vector.multi_reduction <add>, %230, %cst_92 [1] : vector<8x8xf32> to vector<8xf32>
    %232 = vector.shape_cast %231 : vector<8xf32> to vector<8x1xf32>
    %233 = tpu.reciprocal %232 {approx = true} : vector<8x1xf32> -> vector<8x1xf32>
    %234 = vector.broadcast %233 : vector<8x1xf32> to vector<8x8xf32>
    %235 = arith.mulf %230, %234 : vector<8x8xf32>
    %236 = arith.truncf %235 : vector<8x8xf32> to vector<8x8xbf16>
    %c1_93 = arith.constant 1 : index
    %c0_94 = arith.constant 0 : index
    %c2_95 = arith.constant 2 : index
    %c0_96 = arith.constant 0 : index
    %c0_97 = arith.constant 0 : index
    %237 = vector.load %arg24[%c1_93, %c0_94, %c2_95, %c0_96, %c0_97] : memref<2x1x4x8x8xbf16, #tpu.memory_space<vmem>>, vector<1x1x1x8x8xbf16>
    %238 = vector.shape_cast %237 : vector<1x1x1x8x8xbf16> to vector<8x8xbf16>
    %239 = vector.shape_cast %236 : vector<8x8xbf16> to vector<1x1x1x8x8xbf16>
    tpu.vector_store %arg24[%c1_93, %c0_94, %c2_95, %c0_96, %c0_97], %239 {strides = array<i32>} : memref<2x1x4x8x8xbf16, #tpu.memory_space<vmem>>, vector<1x1x1x8x8xbf16>,
    %240 = arith.truncf %217 : vector<8x8xf32> to vector<8x8xbf16>
    %cst_98 = arith.constant dense<0.000000e+00> : vector<8x8xf32>
    %241 = tpu.matmul %236, %240, %cst_98 {dimension_numbers = #tpu.dot_dimension_numbers<[1], [0], [0], [1], [0, 0, 1, 1], [], []>} : vector<8x8xbf16>, vector<8x8xbf16>, vector<8x8xf32> -> vector<8x8xf32>
    %242 = vector.extract_strided_slice %152 {offsets = [0, 24], sizes = [8, 8], strides = [1, 1]} : vector<8x96xf32> to vector<8x8xf32>
    %243 = vector.extract_strided_slice %152 {offsets = [0, 56], sizes = [8, 8], strides = [1, 1]} : vector<8x96xf32> to vector<8x8xf32>
    %244 = vector.extract_strided_slice %152 {offsets = [0, 88], sizes = [8, 8], strides = [1, 1]} : vector<8x96xf32> to vector<8x8xf32>
    %245 = arith.truncf %242 : vector<8x8xf32> to vector<8x8xbf16>
    %246 = arith.truncf %243 : vector<8x8xf32> to vector<8x8xbf16>
    %cst_99 = arith.constant dense<0.000000e+00> : vector<8x8xf32>
    %247 = tpu.matmul %245, %246, %cst_99 {dimension_numbers = #tpu.dot_dimension_numbers<[1], [1], [0], [0], [0, 0, 1, 0], [], []>} : vector<8x8xbf16>, vector<8x8xbf16>, vector<8x8xf32> -> vector<8x8xf32>
    %cst_100 = arith.constant -1.000000e+09 : f32
    %248 = vector.shape_cast %156 : vector<1x8xi1> to vector<1x8xi1>
    %249 = vector.broadcast %248 : vector<1x8xi1> to vector<8x8xi1>
    %250 = vector.broadcast %cst_100 : f32 to vector<8x8xf32>
    %251 = arith.select %249, %250, %247 : vector<8x8xi1>, vector<8x8xf32>
    %252 = arith.mulf %251, %160 : vector<8x8xf32>
    %cst_101 = arith.constant dense<0xFF800000> : vector<8xf32>
    %253 = vector.multi_reduction <maximumf>, %252, %cst_101 [1] : vector<8x8xf32> to vector<8xf32>
    %254 = vector.shape_cast %253 : vector<8xf32> to vector<8x1xf32>
    %255 = vector.broadcast %254 : vector<8x1xf32> to vector<8x8xf32>
    %256 = arith.subf %252, %255 : vector<8x8xf32>
    %257 = math.exp %256 : vector<8x8xf32>
    %cst_102 = arith.constant dense<0.000000e+00> : vector<8xf32>
    %258 = vector.multi_reduction <add>, %257, %cst_102 [1] : vector<8x8xf32> to vector<8xf32>
    %259 = vector.shape_cast %258 : vector<8xf32> to vector<8x1xf32>
    %260 = tpu.reciprocal %259 {approx = true} : vector<8x1xf32> -> vector<8x1xf32>
    %261 = vector.broadcast %260 : vector<8x1xf32> to vector<8x8xf32>
    %262 = arith.mulf %257, %261 : vector<8x8xf32>
    %263 = arith.truncf %262 : vector<8x8xf32> to vector<8x8xbf16>
    %c1_103 = arith.constant 1 : index
    %c0_104 = arith.constant 0 : index
    %c3_105 = arith.constant 3 : index
    %c0_106 = arith.constant 0 : index
    %c0_107 = arith.constant 0 : index
    %264 = vector.load %arg24[%c1_103, %c0_104, %c3_105, %c0_106, %c0_107] : memref<2x1x4x8x8xbf16, #tpu.memory_space<vmem>>, vector<1x1x1x8x8xbf16>
    %265 = vector.shape_cast %264 : vector<1x1x1x8x8xbf16> to vector<8x8xbf16>
    %266 = vector.shape_cast %263 : vector<8x8xbf16> to vector<1x1x1x8x8xbf16>
    tpu.vector_store %arg24[%c1_103, %c0_104, %c3_105, %c0_106, %c0_107], %266 {strides = array<i32>} : memref<2x1x4x8x8xbf16, #tpu.memory_space<vmem>>, vector<1x1x1x8x8xbf16>,
    %267 = arith.truncf %244 : vector<8x8xf32> to vector<8x8xbf16>
    %cst_108 = arith.constant dense<0.000000e+00> : vector<8x8xf32>
    %268 = tpu.matmul %263, %267, %cst_108 {dimension_numbers = #tpu.dot_dimension_numbers<[1], [0], [0], [1], [0, 0, 1, 1], [], []>} : vector<8x8xbf16>, vector<8x8xbf16>, vector<8x8xf32> -> vector<8x8xf32>
    %269 = tpu.concatenate %187, %214, %241, %268 in 1 : vector<8x8xf32>, vector<8x8xf32>, vector<8x8xf32>, vector<8x8xf32> -> vector<8x32xf32>
    %270 = tpu.concatenate %151, %269 in 0 : vector<8x32xf32>, vector<8x32xf32> -> vector<16x32xf32>
    %271 = arith.truncf %270 : vector<16x32xf32> to vector<16x32xbf16>
    %c0_109 = arith.constant 0 : index
    %c0_110 = arith.constant 0 : index
    %c0_111 = arith.constant 0 : index
    %272 = vector.load %arg12[%c0_109, %c0_110, %c0_111] : memref<1x32x32xbf16, #tpu.memory_space<vmem>>, vector<1x32x32xbf16>
    %273 = vector.shape_cast %272 : vector<1x32x32xbf16> to vector<32x32xbf16>
    %cst_112 = arith.constant dense<0.000000e+00> : vector<16x32xf32>
    %274 = tpu.matmul %271, %273, %cst_112 {dimension_numbers = #tpu.dot_dimension_numbers<[1], [0], [0], [1], [0, 0, 1, 1], [], []>} : vector<16x32xbf16>, vector<32x32xbf16>, vector<16x32xf32> -> vector<16x32xf32>
    %275 = arith.addf %3, %274 : vector<16x32xf32>
    %c0_113 = arith.constant 0 : index
    %c0_114 = arith.constant 0 : index
    %c0_115 = arith.constant 0 : index
    %276 = vector.load %arg13[%c0_113, %c0_114, %c0_115] : memref<1x1x32xf32, #tpu.memory_space<vmem>>, vector<1x1x32xf32>
    %277 = vector.shape_cast %276 : vector<1x1x32xf32> to vector<1x32xf32>
    %c0_116 = arith.constant 0 : index
    %c0_117 = arith.constant 0 : index
    %c0_118 = arith.constant 0 : index
    %278 = vector.load %arg14[%c0_116, %c0_117, %c0_118] : memref<1x1x32xf32, #tpu.memory_space<vmem>>, vector<1x1x32xf32>
    %279 = vector.shape_cast %278 : vector<1x1x32xf32> to vector<1x32xf32>
    %cst_119 = arith.constant dense<0.000000e+00> : vector<16xf32>
    %280 = vector.multi_reduction <add>, %275, %cst_119 [1] : vector<16x32xf32> to vector<16xf32>
    %281 = vector.shape_cast %280 : vector<16xf32> to vector<16x1xf32>
    %cst_120 = arith.constant 3.200000e+01 : f32
    %282 = vector.broadcast %cst_120 : f32 to vector<16x1xf32>
    %283 = arith.divf %281, %282 : vector<16x1xf32>
    %284 = vector.broadcast %283 : vector<16x1xf32> to vector<16x32xf32>
    %285 = arith.subf %275, %284 : vector<16x32xf32>
    %286 = arith.mulf %285, %285 : vector<16x32xf32>
    %cst_121 = arith.constant dense<0.000000e+00> : vector<16xf32>
    %287 = vector.multi_reduction <add>, %286, %cst_121 [1] : vector<16x32xf32> to vector<16xf32>
    %288 = vector.shape_cast %287 : vector<16xf32> to vector<16x1xf32>
    %cst_122 = arith.constant 3.200000e+01 : f32
    %289 = vector.broadcast %cst_122 : f32 to vector<16x1xf32>
    %290 = arith.divf %288, %289 : vector<16x1xf32>
    %291 = vector.broadcast %283 : vector<16x1xf32> to vector<16x32xf32>
    %292 = arith.subf %275, %291 : vector<16x32xf32>
    %cst_123 = arith.constant 9.99999974E-6 : f32
    %293 = vector.broadcast %cst_123 : f32 to vector<16x1xf32>
    %294 = arith.addf %290, %293 : vector<16x1xf32>
    %295 = math.rsqrt %294 : vector<16x1xf32>
    %296 = vector.broadcast %295 : vector<16x1xf32> to vector<16x32xf32>
    %297 = arith.mulf %292, %296 : vector<16x32xf32>
    %298 = vector.broadcast %277 : vector<1x32xf32> to vector<16x32xf32>
    %299 = arith.mulf %297, %298 : vector<16x32xf32>
    %300 = vector.broadcast %279 : vector<1x32xf32> to vector<16x32xf32>
    %301 = arith.addf %299, %300 : vector<16x32xf32>
    %302 = arith.truncf %301 : vector<16x32xf32> to vector<16x32xbf16>
    %c0_124 = arith.constant 0 : index
    %c0_125 = arith.constant 0 : index
    %c0_126 = arith.constant 0 : index
    %303 = vector.load %arg15[%c0_124, %c0_125, %c0_126] : memref<1x32x64xbf16, #tpu.memory_space<vmem>>, vector<1x32x64xbf16>
    %304 = vector.shape_cast %303 : vector<1x32x64xbf16> to vector<32x64xbf16>
    %cst_127 = arith.constant dense<0.000000e+00> : vector<16x64xf32>
    %305 = tpu.matmul %302, %304, %cst_127 {dimension_numbers = #tpu.dot_dimension_numbers<[1], [0], [0], [1], [0, 0, 1, 1], [], []>} : vector<16x32xbf16>, vector<32x64xbf16>, vector<16x64xf32> -> vector<16x64xf32>
    %c0_128 = arith.constant 0 : index
    %c0_129 = arith.constant 0 : index
    %c0_130 = arith.constant 0 : index
    %306 = vector.load %arg16[%c0_128, %c0_129, %c0_130] : memref<1x1x64xf32, #tpu.memory_space<vmem>>, vector<1x1x64xf32>
    %307 = vector.shape_cast %306 : vector<1x1x64xf32> to vector<1x64xf32>
    %308 = vector.broadcast %307 : vector<1x64xf32> to vector<16x64xf32>
    %309 = arith.addf %305, %308 : vector<16x64xf32>
    %310 = arith.mulf %309, %309 : vector<16x64xf32>
    %311 = arith.mulf %309, %310 : vector<16x64xf32>
    %cst_131 = arith.constant 4.471500e-02 : f32
    %312 = vector.broadcast %cst_131 : f32 to vector<16x64xf32>
    %313 = arith.mulf %312, %311 : vector<16x64xf32>
    %314 = arith.addf %309, %313 : vector<16x64xf32>
    %cst_132 = arith.constant 0.797884583 : f32
    %315 = vector.broadcast %cst_132 : f32 to vector<16x64xf32>
    %316 = arith.mulf %315, %314 : vector<16x64xf32>
    %317 = math.tanh %316 : vector<16x64xf32>
    %cst_133 = arith.constant 1.000000e+00 : f32
    %318 = vector.broadcast %cst_133 : f32 to vector<16x64xf32>
    %319 = arith.addf %318, %317 : vector<16x64xf32>
    %cst_134 = arith.constant 5.000000e-01 : f32
    %320 = vector.broadcast %cst_134 : f32 to vector<16x64xf32>
    %321 = arith.mulf %320, %319 : vector<16x64xf32>
    %322 = arith.mulf %309, %321 : vector<16x64xf32>
    %323 = arith.truncf %322 : vector<16x64xf32> to vector<16x64xbf16>
    %c0_135 = arith.constant 0 : index
    %c0_136 = arith.constant 0 : index
    %c0_137 = arith.constant 0 : index
    %324 = vector.load %arg17[%c0_135, %c0_136, %c0_137] : memref<1x64x32xbf16, #tpu.memory_space<vmem>>, vector<1x64x32xbf16>
    %325 = vector.shape_cast %324 : vector<1x64x32xbf16> to vector<64x32xbf16>
    %cst_138 = arith.constant dense<0.000000e+00> : vector<16x32xf32>
    %326 = tpu.matmul %323, %325, %cst_138 {dimension_numbers = #tpu.dot_dimension_numbers<[1], [0], [0], [1], [0, 0, 1, 1], [], []>} : vector<16x64xbf16>, vector<64x32xbf16>, vector<16x32xf32> -> vector<16x32xf32>
    %c0_139 = arith.constant 0 : index
    %c0_140 = arith.constant 0 : index
    %c0_141 = arith.constant 0 : index
    %327 = vector.load %arg18[%c0_139, %c0_140, %c0_141] : memref<1x1x32xf32, #tpu.memory_space<vmem>>, vector<1x1x32xf32>
    %328 = vector.shape_cast %327 : vector<1x1x32xf32> to vector<1x32xf32>
    %329 = vector.broadcast %328 : vector<1x32xf32> to vector<16x32xf32>
    %330 = arith.addf %326, %329 : vector<16x32xf32>
    %331 = arith.addf %275, %330 : vector<16x32xf32>
    %c0_142 = arith.constant 0 : index
    %c0_143 = arith.constant 0 : index
    %332 = vector.load %arg25[%c0_142, %c0_143] : memref<16x32xf32, #tpu.memory_space<vmem>>, vector<16x32xf32>
    tpu.vector_store %arg25[%c0_142, %c0_143], %331 {strides = array<i32>} : memref<16x32xf32, #tpu.memory_space<vmem>>, vector<16x32xf32>,
    %c1_i32 = arith.constant 1 : i32
    %333 = arith.cmpi eq, %arg1, %c1_i32 : i32
    %334 = arith.extui %333 : i1 to i32
    %c0_i32_144 = arith.constant 0 : i32
    %335 = arith.cmpi ne, %334, %c0_i32_144 : i32
    scf.if %335 {
      %336 = vector.extract_strided_slice %331 {offsets = [0, 0], sizes = [8, 32], strides = [1, 1]} : vector<16x32xf32> to vector<8x32xf32>
      %c0_145 = arith.constant 0 : index
      %c0_146 = arith.constant 0 : index
      %337 = vector.load %arg19[%c0_145, %c0_146] : memref<1x32xf32, #tpu.memory_space<vmem>>, vector<1x32xf32>
      %c0_147 = arith.constant 0 : index
      %c0_148 = arith.constant 0 : index
      %338 = vector.load %arg20[%c0_147, %c0_148] : memref<1x32xf32, #tpu.memory_space<vmem>>, vector<1x32xf32>
      %cst_149 = arith.constant dense<0.000000e+00> : vector<8xf32>
      %339 = vector.multi_reduction <add>, %336, %cst_149 [1] : vector<8x32xf32> to vector<8xf32>
      %340 = vector.shape_cast %339 : vector<8xf32> to vector<8x1xf32>
      %cst_150 = arith.constant 3.200000e+01 : f32
      %341 = vector.broadcast %cst_150 : f32 to vector<8x1xf32>
      %342 = arith.divf %340, %341 : vector<8x1xf32>
      %343 = vector.broadcast %342 : vector<8x1xf32> to vector<8x32xf32>
      %344 = arith.subf %336, %343 : vector<8x32xf32>
      %345 = arith.mulf %344, %344 : vector<8x32xf32>
      %cst_151 = arith.constant dense<0.000000e+00> : vector<8xf32>
      %346 = vector.multi_reduction <add>, %345, %cst_151 [1] : vector<8x32xf32> to vector<8xf32>
      %347 = vector.shape_cast %346 : vector<8xf32> to vector<8x1xf32>
      %cst_152 = arith.constant 3.200000e+01 : f32
      %348 = vector.broadcast %cst_152 : f32 to vector<8x1xf32>
      %349 = arith.divf %347, %348 : vector<8x1xf32>
      %350 = vector.broadcast %342 : vector<8x1xf32> to vector<8x32xf32>
      %351 = arith.subf %336, %350 : vector<8x32xf32>
      %cst_153 = arith.constant 9.99999974E-6 : f32
      %352 = vector.broadcast %cst_153 : f32 to vector<8x1xf32>
      %353 = arith.addf %349, %352 : vector<8x1xf32>
      %354 = math.rsqrt %353 : vector<8x1xf32>
      %355 = vector.broadcast %354 : vector<8x1xf32> to vector<8x32xf32>
      %356 = arith.mulf %351, %355 : vector<8x32xf32>
      %357 = vector.broadcast %337 : vector<1x32xf32> to vector<8x32xf32>
      %358 = arith.mulf %356, %357 : vector<8x32xf32>
      %359 = vector.broadcast %338 : vector<1x32xf32> to vector<8x32xf32>
      %360 = arith.addf %358, %359 : vector<8x32xf32>
      %c0_154 = arith.constant 0 : index
      %c0_155 = arith.constant 0 : index
      %361 = vector.load %arg21[%c0_154, %c0_155] : memref<5x32xbf16, #tpu.memory_space<vmem>>, vector<5x32xbf16>
      %362 = arith.truncf %360 : vector<8x32xf32> to vector<8x32xbf16>
      %cst_156 = arith.constant dense<0.000000e+00> : vector<5x8xf32>
      %363 = tpu.matmul %361, %362, %cst_156 {dimension_numbers = #tpu.dot_dimension_numbers<[1], [1], [0], [0], [0, 0, 1, 0], [], []>} : vector<5x32xbf16>, vector<8x32xbf16>, vector<5x8xf32> -> vector<5x8xf32>
      %c0_157 = arith.constant 0 : index
      %c0_158 = arith.constant 0 : index
      %364 = vector.load %arg22[%c0_157, %c0_158] : memref<5x1xf32, #tpu.memory_space<vmem>>, vector<5x1xf32>
      %365 = vector.broadcast %364 : vector<5x1xf32> to vector<5x8xf32>
      %366 = arith.addf %363, %365 : vector<5x8xf32>
      %c0_159 = arith.constant 0 : index
      %c0_160 = arith.constant 0 : index
      %c0_161 = arith.constant 0 : index
      %367 = vector.load %arg23[%c0_159, %c0_160, %c0_161] : memref<2x5x8xf32, #tpu.memory_space<vmem>>, vector<1x5x8xf32>
      %368 = vector.shape_cast %367 : vector<1x5x8xf32> to vector<5x8xf32>
      %369 = vector.shape_cast %366 : vector<5x8xf32> to vector<1x5x8xf32>
      tpu.vector_store %arg23[%c0_159, %c0_160, %c0_161], %369 {strides = array<i32>} : memref<2x5x8xf32, #tpu.memory_space<vmem>>, vector<1x5x8xf32>,
      %370 = vector.extract_strided_slice %331 {offsets = [8, 0], sizes = [8, 32], strides = [1, 1]} : vector<16x32xf32> to vector<8x32xf32>
      %c0_162 = arith.constant 0 : index
      %c0_163 = arith.constant 0 : index
      %371 = vector.load %arg19[%c0_162, %c0_163] : memref<1x32xf32, #tpu.memory_space<vmem>>, vector<1x32xf32>
      %c0_164 = arith.constant 0 : index
      %c0_165 = arith.constant 0 : index
      %372 = vector.load %arg20[%c0_164, %c0_165] : memref<1x32xf32, #tpu.memory_space<vmem>>, vector<1x32xf32>
      %cst_166 = arith.constant dense<0.000000e+00> : vector<8xf32>
      %373 = vector.multi_reduction <add>, %370, %cst_166 [1] : vector<8x32xf32> to vector<8xf32>
      %374 = vector.shape_cast %373 : vector<8xf32> to vector<8x1xf32>
      %cst_167 = arith.constant 3.200000e+01 : f32
      %375 = vector.broadcast %cst_167 : f32 to vector<8x1xf32>
      %376 = arith.divf %374, %375 : vector<8x1xf32>
      %377 = vector.broadcast %376 : vector<8x1xf32> to vector<8x32xf32>
      %378 = arith.subf %370, %377 : vector<8x32xf32>
      %379 = arith.mulf %378, %378 : vector<8x32xf32>
      %cst_168 = arith.constant dense<0.000000e+00> : vector<8xf32>
      %380 = vector.multi_reduction <add>, %379, %cst_168 [1] : vector<8x32xf32> to vector<8xf32>
      %381 = vector.shape_cast %380 : vector<8xf32> to vector<8x1xf32>
      %cst_169 = arith.constant 3.200000e+01 : f32
      %382 = vector.broadcast %cst_169 : f32 to vector<8x1xf32>
      %383 = arith.divf %381, %382 : vector<8x1xf32>
      %384 = vector.broadcast %376 : vector<8x1xf32> to vector<8x32xf32>
      %385 = arith.subf %370, %384 : vector<8x32xf32>
      %cst_170 = arith.constant 9.99999974E-6 : f32
      %386 = vector.broadcast %cst_170 : f32 to vector<8x1xf32>
      %387 = arith.addf %383, %386 : vector<8x1xf32>
      %388 = math.rsqrt %387 : vector<8x1xf32>
      %389 = vector.broadcast %388 : vector<8x1xf32> to vector<8x32xf32>
      %390 = arith.mulf %385, %389 : vector<8x32xf32>
      %391 = vector.broadcast %371 : vector<1x32xf32> to vector<8x32xf32>
      %392 = arith.mulf %390, %391 : vector<8x32xf32>
      %393 = vector.broadcast %372 : vector<1x32xf32> to vector<8x32xf32>
      %394 = arith.addf %392, %393 : vector<8x32xf32>
      %c0_171 = arith.constant 0 : index
      %c0_172 = arith.constant 0 : index
      %395 = vector.load %arg21[%c0_171, %c0_172] : memref<5x32xbf16, #tpu.memory_space<vmem>>, vector<5x32xbf16>
      %396 = arith.truncf %394 : vector<8x32xf32> to vector<8x32xbf16>
      %cst_173 = arith.constant dense<0.000000e+00> : vector<5x8xf32>
      %397 = tpu.matmul %395, %396, %cst_173 {dimension_numbers = #tpu.dot_dimension_numbers<[1], [1], [0], [0], [0, 0, 1, 0], [], []>} : vector<5x32xbf16>, vector<8x32xbf16>, vector<5x8xf32> -> vector<5x8xf32>
      %c0_174 = arith.constant 0 : index
      %c0_175 = arith.constant 0 : index
      %398 = vector.load %arg22[%c0_174, %c0_175] : memref<5x1xf32, #tpu.memory_space<vmem>>, vector<5x1xf32>
      %399 = vector.broadcast %398 : vector<5x1xf32> to vector<5x8xf32>
      %400 = arith.addf %397, %399 : vector<5x8xf32>
      %c1_176 = arith.constant 1 : index
      %c0_177 = arith.constant 0 : index
      %c0_178 = arith.constant 0 : index
      %401 = vector.load %arg23[%c1_176, %c0_177, %c0_178] : memref<2x5x8xf32, #tpu.memory_space<vmem>>, vector<1x5x8xf32>
      %402 = vector.shape_cast %401 : vector<1x5x8xf32> to vector<5x8xf32>
      %403 = vector.shape_cast %400 : vector<5x8xf32> to vector<1x5x8xf32>
      tpu.vector_store %arg23[%c1_176, %c0_177, %c0_178], %403 {strides = array<i32>} : memref<2x5x8xf32, #tpu.memory_space<vmem>>, vector<1x5x8xf32>,
    } else {
    }
    return
  }
  func.func @transform_0(%arg0: i32, %arg1: i32) -> (i32, i32, i32) {
    %c0_i32 = arith.constant 0 : i32
    %c0_i32_0 = arith.constant 0 : i32
    %c0_i32_1 = arith.constant 0 : i32
    return %arg0, %c0_i32, %c0_i32_0 : i32, i32, i32
  }
  func.func @transform_1(%arg0: i32, %arg1: i32) -> (i32, i32, i32) {
    %c0_i32 = arith.constant 0 : i32
    %c0_i32_0 = arith.constant 0 : i32
    %c0_i32_1 = arith.constant 0 : i32
    return %arg0, %c0_i32, %c0_i32_0 : i32, i32, i32
  }
  func.func @transform_2(%arg0: i32, %arg1: i32) -> (i32, i32, i32) {
    %c0_i32 = arith.constant 0 : i32
    %c0_i32_0 = arith.constant 0 : i32
    %c0_i32_1 = arith.constant 0 : i32
    return %arg0, %c0_i32, %c0_i32_0 : i32, i32, i32
  }
  func.func @transform_3(%arg0: i32, %arg1: i32) -> (i32, i32) {
    %c0_i32 = arith.constant 0 : i32
    %c0_i32_0 = arith.constant 0 : i32
    %c0_i32_1 = arith.constant 0 : i32
    return %c0_i32, %c0_i32_0 : i32, i32
  }
  func.func @transform_4(%arg0: i32, %arg1: i32) -> (i32, i32) {
    %c0_i32 = arith.constant 0 : i32
    %c0_i32_0 = arith.constant 0 : i32
    %c0_i32_1 = arith.constant 0 : i32
    return %c0_i32, %c0_i32_0 : i32, i32
  }
  func.func @transform_5(%arg0: i32, %arg1: i32) -> (i32, i32) {
    %c0_i32 = arith.constant 0 : i32
    %c0_i32_0 = arith.constant 0 : i32
    %c0_i32_1 = arith.constant 0 : i32
    return %c0_i32, %c0_i32_0 : i32, i32
  }
  func.func @transform_6(%arg0: i32, %arg1: i32) -> (i32, i32) {
    %c0_i32 = arith.constant 0 : i32
    %c0_i32_0 = arith.constant 0 : i32
    %c0_i32_1 = arith.constant 0 : i32
    return %c0_i32, %c0_i32_0 : i32, i32
  }
  func.func @transform_7(%arg0: i32, %arg1: i32) -> (i32, i32, i32) {
    %c0_i32 = arith.constant 0 : i32
    %c0_i32_0 = arith.constant 0 : i32
    %c0_i32_1 = arith.constant 0 : i32
    return %arg1, %c0_i32, %c0_i32_0 : i32, i32, i32
  }
  func.func @transform_8(%arg0: i32, %arg1: i32) -> (i32, i32, i32) {
    %c0_i32 = arith.constant 0 : i32
    %c0_i32_0 = arith.constant 0 : i32
    %c0_i32_1 = arith.constant 0 : i32
    return %arg1, %c0_i32, %c0_i32_0 : i32, i32, i32
  }
  func.func @transform_9(%arg0: i32, %arg1: i32) -> (i32, i32, i32) {
    %c0_i32 = arith.constant 0 : i32
    %c0_i32_0 = arith.constant 0 : i32
    %c0_i32_1 = arith.constant 0 : i32
    return %arg1, %c0_i32, %c0_i32_0 : i32, i32, i32
  }
  func.func @transform_10(%arg0: i32, %arg1: i32) -> (i32, i32, i32) {
    %c0_i32 = arith.constant 0 : i32
    %c0_i32_0 = arith.constant 0 : i32
    %c0_i32_1 = arith.constant 0 : i32
    return %arg1, %c0_i32, %c0_i32_0 : i32, i32, i32
  }
  func.func @transform_11(%arg0: i32, %arg1: i32) -> (i32, i32, i32) {
    %c0_i32 = arith.constant 0 : i32
    %c0_i32_0 = arith.constant 0 : i32
    %c0_i32_1 = arith.constant 0 : i32
    return %arg1, %c0_i32, %c0_i32_0 : i32, i32, i32
  }
  func.func @transform_12(%arg0: i32, %arg1: i32) -> (i32, i32, i32) {
    %c0_i32 = arith.constant 0 : i32
    %c0_i32_0 = arith.constant 0 : i32
    %c0_i32_1 = arith.constant 0 : i32
    return %arg1, %c0_i32, %c0_i32_0 : i32, i32, i32
  }
  func.func @transform_13(%arg0: i32, %arg1: i32) -> (i32, i32, i32) {
    %c0_i32 = arith.constant 0 : i32
    %c0_i32_0 = arith.constant 0 : i32
    %c0_i32_1 = arith.constant 0 : i32
    return %arg1, %c0_i32, %c0_i32_0 : i32, i32, i32
  }
  func.func @transform_14(%arg0: i32, %arg1: i32) -> (i32, i32, i32) {
    %c0_i32 = arith.constant 0 : i32
    %c0_i32_0 = arith.constant 0 : i32
    %c0_i32_1 = arith.constant 0 : i32
    return %arg1, %c0_i32, %c0_i32_0 : i32, i32, i32
  }
  func.func @transform_15(%arg0: i32, %arg1: i32) -> (i32, i32, i32) {
    %c0_i32 = arith.constant 0 : i32
    %c0_i32_0 = arith.constant 0 : i32
    %c0_i32_1 = arith.constant 0 : i32
    return %arg1, %c0_i32, %c0_i32_0 : i32, i32, i32
  }
  func.func @transform_16(%arg0: i32, %arg1: i32) -> (i32, i32, i32) {
    %c0_i32 = arith.constant 0 : i32
    %c0_i32_0 = arith.constant 0 : i32
    %c0_i32_1 = arith.constant 0 : i32
    return %arg1, %c0_i32, %c0_i32_0 : i32, i32, i32
  }
  func.func @transform_17(%arg0: i32, %arg1: i32) -> (i32, i32) {
    %c0_i32 = arith.constant 0 : i32
    %c0_i32_0 = arith.constant 0 : i32
    %c0_i32_1 = arith.constant 0 : i32
    return %c0_i32, %c0_i32_0 : i32, i32
  }
  func.func @transform_18(%arg0: i32, %arg1: i32) -> (i32, i32) {
    %c0_i32 = arith.constant 0 : i32
    %c0_i32_0 = arith.constant 0 : i32
    %c0_i32_1 = arith.constant 0 : i32
    return %c0_i32, %c0_i32_0 : i32, i32
  }
  func.func @transform_19(%arg0: i32, %arg1: i32) -> (i32, i32) {
    %c0_i32 = arith.constant 0 : i32
    %c0_i32_0 = arith.constant 0 : i32
    %c0_i32_1 = arith.constant 0 : i32
    return %c0_i32, %c0_i32_0 : i32, i32
  }
  func.func @transform_20(%arg0: i32, %arg1: i32) -> (i32, i32) {
    %c0_i32 = arith.constant 0 : i32
    %c0_i32_0 = arith.constant 0 : i32
    %c0_i32_1 = arith.constant 0 : i32
    return %c0_i32, %c0_i32_0 : i32, i32
  }
  func.func @transform_21(%arg0: i32, %arg1: i32) -> (i32, i32, i32) {
    %c0_i32 = arith.constant 0 : i32
    %c0_i32_0 = arith.constant 0 : i32
    %c0_i32_1 = arith.constant 0 : i32
    return %arg0, %c0_i32, %c0_i32_0 : i32, i32, i32
  }
  func.func @transform_22(%arg0: i32, %arg1: i32) -> (i32, i32, i32, i32, i32) {
    %c0_i32 = arith.constant 0 : i32
    %c0_i32_0 = arith.constant 0 : i32
    %c0_i32_1 = arith.constant 0 : i32
    %c0_i32_2 = arith.constant 0 : i32
    return %arg0, %arg1, %c0_i32, %c0_i32_0, %c0_i32_1 : i32, i32, i32, i32, i32
  }
}

</mosaic_0001>

<bundles_post_ra>
// kernel: tpu_custom_call.1
= control target key start
LH: loop header
LB: loop body
LE: loop exit
PB: predicated region body
PF: predicated region fallthrough
CT: control target
= control target key end

     0   :  { %s5294_s0 = inlined_call_operand.vmem [shape: f32[4,8,16], index: 0, kind: input, shape index: {}]   ;;  %s5295_s1 = inlined_call_operand.vmem [shape: f32[4,8,8], index: 1, kind: input, shape index: {}]   ;;  %s5296_s2 = inlined_call_operand.vmem [shape: f32[4,1,8], index: 2, kind: input, shape index: {}]   ;;  %s5297_s3 = inlined_call_operand.hbm [shape: f32[1,16], index: 3, kind: input, shape index: {}]   ;;  %s5298_s4 = inlined_call_operand.hbm [shape: f32[1,16], index: 4, kind: input, shape index: {}]   ;;  %s5299_s5 = inlined_call_operand.hbm [shape: bf16[16,32], index: 5, kind: input, shape index: {}]   ;;  %s5300_s6 = inlined_call_operand.hbm [shape: f32[1,32], index: 6, kind: input, shape index: {}]   ;;  %s5301_s7 = inlined_call_operand.hbm [shape: f32[2,1,32], index: 7, kind: input, shape index: {}]   ;;  %s5302_s8 = inlined_call_operand.hbm [shape: f32[2,1,32], index: 8, kind: input, shape index: {}]   ;;  %s5303_s9 = inlined_call_operand.vmem [shape: bf16[2,32,96], index: 9, kind: input, shape index: {}]   ;;  %s5304_s10 = inlined_call_operand.hbm [shape: bf16[2,32,32], index: 10, kind: input, shape index: {}]   ;;  %s5305_s11 = inlined_call_operand.hbm [shape: f32[2,1,32], index: 11, kind: input, shape index: {}]   ;;  %s5306_s12 = inlined_call_operand.hbm [shape: f32[2,1,32], index: 12, kind: input, shape index: {}]   ;;  %s5307_s13 = inlined_call_operand.hbm [shape: bf16[2,32,64], index: 13, kind: input, shape index: {}]   ;;  %s5308_s14 = inlined_call_operand.hbm [shape: f32[2,1,64], index: 14, kind: input, shape index: {}]   ;;  %s5309_s15 = inlined_call_operand.vmem [shape: bf16[2,64,32], index: 15, kind: input, shape index: {}]   ;;  %s5310_s16 = inlined_call_operand.hbm [shape: f32[2,1,32], index: 16, kind: input, shape index: {}]   ;;  %s5311_s17 = inlined_call_operand.hbm [shape: f32[1,32], index: 17, kind: input, shape index: {}]   ;;  %s5312_s18 = inlined_call_operand.hbm [shape: f32[1,32], index: 18, kind: input, shape index: {}]   ;;  %s5313_s19 = inlined_call_operand.vmem [shape: bf16[5,32], index: 19, kind: input, shape index: {}]   ;;  %s5314_s20 = inlined_call_operand.vmem [shape: f32[5,1], index: 20, kind: input, shape index: {}]   ;;  %s5315_s21 = inlined_call_operand.vmem [shape: f32[4,5,8], index: 21, kind: output, shape index: {0}]   ;;  %s5316_s22 = inlined_call_operand.hbm [shape: bf16[4,2,4,8,8], index: 22, kind: output, shape index: {1}]  }
   0x1   :  { %5344 = sst [smem:[#allocation46_spill]] %s5294_s0 }
   0x2   :  { %5345 = sst [smem:[#allocation47_spill]] %s5295_s1 }
   0x3   :  { %5346 = sst [smem:[#allocation48_spill]] %s5296_s2 }
   0x4   :  { %5347 = sst [smem:[#allocation49_spill]] %s5297_s3 }
   0x5   :  { %5348 = sst [smem:[#allocation50_spill]] %s5298_s4 }
   0x6   :  { %5349 = sst [smem:[#allocation51_spill]] %s5299_s5 }
   0x7   :  { %5350 = sst [smem:[#allocation52_spill]] %s5300_s6 }
   0x8   :  { %5351 = sst [smem:[#allocation53_spill]] %s5301_s7 }
   0x9   :  { %5352 = sst [smem:[#allocation54_spill]] %s5302_s8 }
   0xa   :  { %5353 = sst [smem:[#allocation55_spill]] %s5303_s9 }
   0xb   :  { %5354 = sst [smem:[#allocation56_spill]] %s5304_s10 }
   0xc   :  { %5355 = sst [smem:[#allocation57_spill]] %s5305_s11 }
   0xd   :  { %5356 = sst [smem:[#allocation58_spill]] %s5306_s12 }
   0xe   :  { %5357 = sst [smem:[#allocation59_spill]] %s5307_s13 }
   0xf   :  { %5358 = sst [smem:[#allocation60_spill]] %s5308_s14 }
  0x10   :  { %5359 = sst [smem:[#allocation61_spill]] %s5309_s15 }
  0x11   :  { %5360 = sst [smem:[#allocation62_spill]] %s5312_s18 }
  0x12   :  { %5361 = sst [smem:[#allocation63_spill]] %s5313_s19 }
  0x13   :  { %5362 = sst [smem:[#allocation64_spill]] %s5314_s20 }
  0x14   :  { %5363 = sst [smem:[#allocation65_spill]] %s5315_s21 }
  0x15   :  { %5364 = sst [smem:[#allocation66_spill]] %s5316_s22 }
  0x16   :  { %28 = vsyncpa [#allocation4], 0 }
  0x17   :  { %29 = vsyncpa [#allocation7], 0 }
  0x18   :  { %30 = vsyncpa [#allocation10], 0 }
  0x19   :  { %31 = vsyncpa [#allocation5], 0 }
  0x1a   :  { %33 = vsyncpa [#allocation5 + $0x1], 0  ;;  %s4549_s3 = smov 0   ;;  %s4551_s28 = smov 0  }
  0x1b   :  { %s4553_s29 = smov 0   ;;  %s4555_s30 = smov 0  }
  0x1c   :  { %s4557_s4 = smov 0   ;;  %s4559_s0 = smov 0  }
  0x1d   :  { %s4561_s23 = smov 0   ;;  %s4563_s1 = smov 0  }
  0x1e   :  { %s4565_s5 = smov 0   ;;  %s4567_s24 = smov 0  }
  0x1f   :  { %s4569_s6 = smov 0  }
  0x20 LB: > { %5365 = sst [smem:[#allocation31_spill]] %s4348_s3  ;;  %s4605_s25 = sadd.s32 4294967295, %s4388_s6   ;;  %s4388_s6 = sphi %s4569_s6, %s39_s6   ;;  %s4384_s24 = sphi %s4567_s24, %s5458_s24   ;;  %s4380_s5 = sphi %s4565_s5, %s5457_s5   ;;  %s4376_s1 = sphi %s4563_s1, %s5451_s1   ;;  %s4372_s23 = sphi %s4561_s23, %s5456_s23   ;;  %s4368_s0 = sphi %s4559_s0, %s5450_s0   ;;  %s4364_s4 = sphi %s4557_s4, %s5449_s4   ;;  %s4360_s30 = sphi %s4555_s30, %s5448_s30   ;;  %s4356_s29 = sphi %s4553_s29, %s5447_s29   ;;  %s4352_s28 = sphi %s4551_s28, %s5455_s28   ;;  %s4348_s3 = sphi %s4549_s3, %s5454_s3  }
  0x21   : > { %5366 = sst [smem:[#allocation32_spill]] %s4356_s29  ;;  %p3251_p0 = scmp.ge.s32.totalorder %s4388_s6, 1 }
  0x22   : > { %5367 = sst [smem:[#allocation33_spill]] %s4364_s4  ;;  %p5333_p1 = scmp.eq.s32.totalorder %s4605_s25, 0 }
  0x23   : > { %5368 = sst [smem:[#allocation34_spill]] %s4368_s0  ;;  %p603_p2 = scmp.eq.s32.totalorder %s4605_s25, 3 }
  0x24   : > { %5369 = sst [smem:[#allocation35_spill]] %s4372_s23  ;;  %p616_p3 = scmp.lt.s32.totalorder %s4388_s6, 5 }
  0x25   : > { %5370 = sst [smem:[#allocation36_spill]] %s4376_s1  ;;  %s4390_s2 = smov [#allocation3]  }
  0x26   : > { %5371 = sst [smem:[#allocation37_spill]] %s4384_s24  ;;  %p4611_p4 = pnand %p3251_p0, %p616_p3 }
  0x27   : > { %5372 = sst [smem:[#allocation38_spill]] %s4388_s6  ;;  %s629_s27 = sshll.u32 %s4390_s2, 4  ;;  %s630_s27 = int_to_ptr.vmem [resolvable:$true] %s629_s27 }
  0x28   : > { %s5373_s26 = scalar_select %p4611_p4, 1, 0 }
  0x29   : > { %p3627_p5 = pneg %p4611_p4  ;;  %s3905_s20 = scalar_lea.vmem %s630_s27, 16 }
  0x2a   : > { %5374 = sst [smem:[#allocation39_spill]] %s5373_s26  ;;  %p3906_p8 = scmp.ne.s32.totalorder %s630_s27, %s3905_s20 }
  0x2b   : > { %p4619_p6 = pnand %p3627_p5, %p5333_p1  ;;  %s3912_s2 = scalar_lea.vmem %s630_s27, 32 }
  0x2c   : > { %p3913_p11 = scmp.lt.s32.totalorder %s630_s27, %s630_s27  ;;  %p3914_p12 = scmp.lt.s32.totalorder %s3912_s2, %s3905_s20 }
  0x2d   : > { %p4625_p7 = pneg %p4619_p6 }
  0x2e   : > { %p3915_p13 = por %p3914_p12, %p3913_p11 }
  0x2f   : > { %p3908_p9 = pnand %p3906_p8, %p4625_p7 }
  0x31   : > { %p3909_p10 = pneg %p3908_p9 }
  0x33   : > { %p3916_p0 = pnand %p3915_p13, %p3909_p10 }
  0x35   : > { %3919 = shalt.err (!%p3916_p0)
}
  0x36   : > { %s5377_s9 = sld [smem:[#allocation49_spill]]  ;;  %s3250_s20 = sadd.s32 4294967294, %s4388_s6  }
  0x37   : > { %s48_s2 = sadd.s32 1, %s4380_s5  ;;  %s51_s23 = sadd.s32 1, %s4384_s24 }
  0x38   : > { %p49_p3 = scmp.ge.s32.totalorder %s48_s2, 2  ;;  %s220_s15 = sadd.s32 1, %s4368_s0 }
  0x39   : > { %p227_p5 = scmp.ne.s32.totalorder %s4368_s0, %s4364_s4  ;;  %p228_p8 = scmp.eq.s32.totalorder %s4388_s6, 0 }
  0x3a   : > { %s5460_s2 = smov (%p49_p3, %s48_s2), 0  ;;  %s5462_s23 = smov (!%p49_p3, %s51_s23), %s4384_s24 }
  0x3b   : > { %5378 = sst [smem:[#allocation40_spill]] %s5460_s2  ;;  %s217_s21 = ssub.s32 %s4380_s5, %s5460_s2 }
  0x3c   : > { %3630 = dma.hbm_to_vmem [thread:$0]  (!%p4619_p6), %s5377_s9, 16, %s630_s27, [#allocation4]  }
  0x3d   : > { %p53_p9 = scmp.ge.s32.totalorder %s5462_s23, 2  ;;  %p218_p10 = scmp.eq.s32.totalorder %s217_s21, 0 }
  0x3e   : > { %p4648_p11 = por %p228_p8, %p227_p5  ;;  %p233_p12 = scmp.ne.s32.totalorder %s4364_s4, %s4360_s30 }
  0x3f   : > { %s5464_s23 = smov (%p53_p9, %s5462_s23), 0  ;;  %s592_s18 = sadd.s32 1, %s4356_s29 }
  0x40   : > { %5380 = sst [smem:[#allocation41_spill]] %s5464_s23  ;;  %p4661_p13 = por %p5333_p1, %p233_p12 }
  0x41   : > { %s4657_s27 = scalar_select %p218_p10, %s4368_s0, %s220_s15  }
  0x42   : > { %s5382_s2 = scalar_select %p4661_p13, 1, 0 }
  0x43   : > { %5381 = sst [smem:[#allocation42_spill]] %s4657_s27  ;;  %s587_s1 = ssub.s32 %s4384_s24, %s5464_s23 }
  0x44   : > { %s589_s26 = sor.u32 %s587_s1, %s217_s21  ;;  %p602_p3 = scmp.ne.s32.totalorder %s4356_s29, %s4352_s28 }
  0x45   : > { %p590_p0 = scmp.eq.s32.totalorder %s589_s26, 0  ;;  %p608_p5 = scmp.ne.s32.totalorder %s4352_s28, %s4348_s3 }
  0x46   : > { %p609_p8 = scmp.eq.s32.totalorder %s3250_s20, 3  ;;  %p4677_p9 = por %p603_p2, %p602_p3 }
  0x47   : > { %s4673_s30 = scalar_select %p590_p0, %s4356_s29, %s592_s18  }
  0x48   : > { %s5384_s4 = scalar_select %p4677_p9, 1, 0 }
  0x49   : > { %5383 = sst [smem:[#allocation43_spill]] %s4673_s30  ;;  %p4681_p10 = por %p609_p8, %p608_p5 }
  0x4a   : > { %5385 = sst [smem:[#allocation44_spill]] %s5384_s4  ;;  %p3681_p12 = scmp.lt.s32.totalorder %s4388_s6, 4 }
  0x4b   : > { %s5386_s15 = scalar_select %p4681_p10, 1, 0 }
  0x4c   : > { %s729_s23 = sand.u32 1, %s4388_s6   ;;  %s4688_s1 = sand.u32 1, %s4368_s0  }
  0x4d   : > { %5387 = sst [smem:[#allocation45_spill]] %s5386_s15  ;;  %s4691_s26 = sshll.u32 %s4380_s5, 4 }
  0x4e   : > { %s5388_s7 = sld [smem:[#allocation53_spill]]  ;;  %s732_s24 = scalar_lea.vmem [#allocation11], %s4688_s1 }
  0x4f   : > { %s739_s27 = sshll.u32 %s732_s24, 4  ;;  %p4700_p2 = pnand %p3681_p12, %p4648_p11  ;;  %s740_s27 = int_to_ptr.vmem [resolvable:$true] %s739_s27 }
  0x50   : > { %s5390_s8 = sld [smem:[#allocation54_spill]]  ;;  %s749_s3 = scalar_lea.vmem [#allocation12], %s4688_s1 }
  0x51   : > { %s756_s6 = sshll.u32 %s749_s3, 4  ;;  %s4709_s4 = scalar_lea.sflag [#allocation4], %s729_s23  ;;  %s757_s6 = int_to_ptr.vmem [resolvable:$true] %s756_s6 }
  0x52   : > { %p4713_p0 = pneg %p4700_p2  ;;  %s3933_s24 = scalar_lea.vmem %s740_s27, 16 }
  0x53   : > { %p3934_p11 = scmp.ne.s32.totalorder %s740_s27, %s3933_s24  ;;  %s4391_s9 = smov [#allocation11]  }
  0x54   : > { %s737_s21 = scalar_lea.hbm %s5388_s7, %s4691_s26  ;;  %s3938_s20 = sshll.u32 %s4391_s9, 4  ;;  %s3939_s20 = int_to_ptr.vmem [resolvable:$false] %s3938_s20 }
  0x55   : > { %p3936_p3 = pnand %p3934_p11, %p4713_p0  ;;  %s3940_s29 = scalar_lea.vmem %s3939_s20, 32 }
  0x56   : > { %s754_s15 = scalar_lea.hbm %s5390_s8, %s4691_s26  ;;  %p3941_p8 = scmp.lt.s32.totalorder %s740_s27, %s3939_s20 }
  0x57   : > { %p3937_p5 = pneg %p3936_p3  ;;  %p3942_p12 = scmp.lt.s32.totalorder %s3940_s29, %s3933_s24 }
  0x59   : > { %p3943_p1 = por %p3942_p12, %p3941_p8 }
  0x5b   : > { %p3944_p10 = pnand %p3943_p1, %p3937_p5 }
  0x5d   : > { %3947 = shalt.err (!%p3944_p10)
}
  0x5e   : > { %3649 = dma.hbm_to_vmem [thread:$0]  (!%p4700_p2), %s737_s21, 16, %s740_s27, %s4709_s4  }
  0x5f   : > { %s3961_s3 = scalar_lea.vmem %s757_s6, 16  ;;  %s4392_s0 = smov [#allocation12]  }
  0x60   : > { %p3962_p9 = scmp.ne.s32.totalorder %s757_s6, %s3961_s3  ;;  %s3966_s23 = sshll.u32 %s4392_s0, 4  ;;  %s3967_s23 = int_to_ptr.vmem [resolvable:$false] %s3966_s23 }
  0x61   : > { %s3968_s9 = scalar_lea.vmem %s3967_s23, 32  ;;  %p3969_p13 = scmp.lt.s32.totalorder %s757_s6, %s3967_s23 }
  0x62   : > { %p3964_p11 = pnand %p3962_p9, %p4713_p0  ;;  %p3970_p4 = scmp.lt.s32.totalorder %s3968_s9, %s3961_s3 }
  0x64   : > { %p3965_p3 = pneg %p3964_p11  ;;  %p3971_p8 = por %p3970_p4, %p3969_p13 }
  0x66   : > { %p3972_p1 = pnand %p3971_p8, %p3965_p3 }
  0x68   : > { %3975 = shalt.err (!%p3972_p1)
}
  0x69   : > { %3652 = dma.hbm_to_vmem [thread:$0]  (!%p4700_p2), %s754_s15, 16, %s757_s6, %s4709_s4  }
  0x6a   : > { %s5337_s21 = sshll.u32 %s4688_s1, 4  ;;  %s5338_s20 = sshll.u32 %s4380_s5, 8 }
  0x6b   : > { %s5392_s10 = sld [smem:[#allocation56_spill]]  ;;  %s775_s23 = scalar_lea.vmem [#allocation13], %s5337_s21 }
  0x6c   : > { %s782_s9 = sshll.u32 %s775_s23, 4  ;;  %s4393_s27 = smov [#allocation13]   ;;  %s783_s9 = int_to_ptr.vmem [resolvable:$true] %s782_s9 }
  0x6d   : > { %s3989_s24 = scalar_lea.vmem %s783_s9, 256  ;;  %s3994_s7 = sshll.u32 %s4393_s27, 4  ;;  %s3995_s7 = int_to_ptr.vmem [resolvable:$false] %s3994_s7 }
  0x6e   : > { %p3990_p4 = scmp.ne.s32.totalorder %s783_s9, %s3989_s24  ;;  %s3996_s6 = scalar_lea.vmem %s3995_s7, 512 }
  0x6f   : > { %p3997_p10 = scmp.lt.s32.totalorder %s783_s9, %s3995_s7  ;;  %p3998_p5 = scmp.lt.s32.totalorder %s3996_s6, %s3989_s24 }
  0x70   : > { %p3992_p13 = pnand %p3990_p4, %p4713_p0 }
  0x71   : > { %s781_s0 = scalar_lea.hbm %s5392_s10, %s5338_s20  ;;  %p3999_p12 = por %p3998_p5, %p3997_p10 }
  0x72   : > { %p3993_p9 = pneg %p3992_p13 }
  0x74   : > { %p4000_p11 = pnand %p3999_p12, %p3993_p9 }
  0x76   : > { %4003 = shalt.err (!%p4000_p11)
}
  0x77   : > { %s5339_s15 = smov 64   ;;  %s5341_s29 = smov 4  }
  0x78   : > { %3655 = dma.hbm_to_vmem [thread:$0]  (!%p4700_p2), %s781_s0, 256, %s783_s9, %s4709_s4, %s5339_s15, %s5339_s15, %s5341_s29  }
  0x79   : > { %s5393_s11 = sld [smem:[#allocation57_spill]]  ;;  %s795_s24 = scalar_lea.vmem [#allocation14], %s4688_s1 }
  0x7a   : > { %s802_s27 = sshll.u32 %s795_s24, 4  ;;  %s4396_s21 = smov [#allocation14]   ;;  %s803_s27 = int_to_ptr.vmem [resolvable:$true] %s802_s27 }
  0x7b   : > { %s4017_s6 = scalar_lea.vmem %s803_s27, 16  ;;  %s4022_s20 = sshll.u32 %s4396_s21, 4  ;;  %s4023_s20 = int_to_ptr.vmem [resolvable:$false] %s4022_s20 }
  0x7c   : > { %p4018_p3 = scmp.ne.s32.totalorder %s803_s27, %s4017_s6  ;;  %s4024_s8 = scalar_lea.vmem %s4023_s20, 32 }
  0x7d   : > { %p4025_p4 = scmp.lt.s32.totalorder %s803_s27, %s4023_s20  ;;  %p4026_p13 = scmp.lt.s32.totalorder %s4024_s8, %s4017_s6 }
  0x7e   : > { %p4020_p8 = pnand %p4018_p3, %p4713_p0 }
  0x7f   : > { %s800_s7 = scalar_lea.hbm %s5393_s11, %s4691_s26  ;;  %p4027_p9 = por %p4026_p13, %p4025_p4 }
  0x80   : > { %p4021_p1 = pneg %p4020_p8 }
  0x82   : > { %p4028_p10 = pnand %p4027_p9, %p4021_p1 }
  0x84   : > { %4031 = shalt.err (!%p4028_p10)
}
  0x85   : > { %3658 = dma.hbm_to_vmem [thread:$0]  (!%p4700_p2), %s800_s7, 16, %s803_s27, %s4709_s4  }
  0x86   : > { %s5394_s12 = sld [smem:[#allocation58_spill]]  ;;  %s812_s23 = scalar_lea.vmem [#allocation15], %s4688_s1 }
  0x87   : > { %s819_s21 = sshll.u32 %s812_s23, 4  ;;  %s4397_s8 = smov [#allocation15]   ;;  %s820_s21 = int_to_ptr.vmem [resolvable:$true] %s819_s21 }
  0x88   : > { %s4045_s24 = scalar_lea.vmem %s820_s21, 16  ;;  %s4050_s20 = sshll.u32 %s4397_s8, 4  ;;  %s4051_s20 = int_to_ptr.vmem [resolvable:$false] %s4050_s20 }
  0x89   : > { %p4046_p5 = scmp.ne.s32.totalorder %s820_s21, %s4045_s24  ;;  %s4052_s6 = scalar_lea.vmem %s4051_s20, 32 }
  0x8a   : > { %p4053_p3 = scmp.lt.s32.totalorder %s820_s21, %s4051_s20  ;;  %p4054_p8 = scmp.lt.s32.totalorder %s4052_s6, %s4045_s24 }
  0x8b   : > { %p4048_p12 = pnand %p4046_p5, %p4713_p0 }
  0x8c   : > { %s817_s3 = scalar_lea.hbm %s5394_s12, %s4691_s26  ;;  %p4055_p1 = por %p4054_p8, %p4053_p3 }
  0x8d   : > { %p4049_p11 = pneg %p4048_p12 }
  0x8f   : > { %p4056_p4 = pnand %p4055_p1, %p4049_p11 }
  0x91   : > { %4059 = shalt.err (!%p4056_p4)
}
  0x92   : > { %3661 = dma.hbm_to_vmem [thread:$0]  (!%p4700_p2), %s817_s3, 16, %s820_s21, %s4709_s4  }
  0x93   : > { %s4398_s7 = smov [#allocation6]   ;;  %s5395_s0 = sshll.u32 %s4380_s5, 8 }
  0x94   : > { %s640_s27 = sshll.u32 %s4398_s7, 4  ;;  %s5396_s13 = sld [smem:[#allocation59_spill]]  ;;  %s641_s27 = int_to_ptr.vmem [resolvable:$true] %s640_s27 }
  0x95   : > { %s4071_s20 = scalar_lea.vmem %s641_s27, 16  ;;  %s4078_s24 = scalar_lea.vmem %s641_s27, 32 }
  0x96   : > { %p4072_p13 = scmp.ne.s32.totalorder %s641_s27, %s4071_s20  ;;  %p4079_p5 = scmp.lt.s32.totalorder %s641_s27, %s641_s27 }
  0x97   : > { %p4080_p12 = scmp.lt.s32.totalorder %s4078_s24, %s4071_s20 }
  0x98   : > { %p4074_p9 = pnand %p4072_p13, %p4625_p7 }
  0x99   : > { %p4081_p11 = por %p4080_p12, %p4079_p5 }
  0x9a   : > { %s4774_s8 = scalar_lea.hbm %s5396_s13, %s5395_s0  ;;  %p4075_p10 = pneg %p4074_p9 }
  0x9c   : > { %p4082_p3 = pnand %p4081_p11, %p4075_p10 }
  0x9e   : > { %4085 = shalt.err (!%p4082_p3)
}
  0x9f   : > { %s5397_s6 = sld [smem:[#allocation50_spill]]  ;;  %s5398_s7 = sshll.u32 %s4688_s1, 4 }
  0xa0   : > { %s830_s0 = scalar_lea.vmem [#allocation16], %s5398_s7  ;;  %s4399_s23 = smov [#allocation8]  }
  0xa1   : > { %s837_s9 = sshll.u32 %s830_s0, 4  ;;  %s650_s15 = sshll.u32 %s4399_s23, 4  ;;  %s838_s9 = int_to_ptr.vmem [resolvable:$true] %s837_s9  ;;  %s651_s15 = int_to_ptr.vmem [resolvable:$true] %s650_s15 }
  0xa2   : > { %s4099_s29 = scalar_lea.vmem %s838_s9, 256  ;;  %s4400_s20 = smov [#allocation16]  }
  0xa3   : > { %p4100_p8 = scmp.ne.s32.totalorder %s838_s9, %s4099_s29  ;;  %s4104_s24 = sshll.u32 %s4400_s20, 4  ;;  %s4105_s24 = int_to_ptr.vmem [resolvable:$false] %s4104_s24 }
  0xa4   : > { %s4106_s10 = scalar_lea.vmem %s4105_s24, 512  ;;  %p4107_p13 = scmp.lt.s32.totalorder %s838_s9, %s4105_s24 }
  0xa5   : > { %3633 = dma.hbm_to_vmem [thread:$0]  (!%p4619_p6), %s5397_s6, 16, %s641_s27, [#allocation7]  }
  0xa6   : > { %p4102_p1 = pnand %p4100_p8, %p4713_p0  ;;  %p4108_p9 = scmp.lt.s32.totalorder %s4106_s10, %s4099_s29 }
  0xa8   : > { %p4103_p4 = pneg %p4102_p1  ;;  %p4109_p10 = por %p4108_p9, %p4107_p13 }
  0xaa   : > { %p4110_p5 = pnand %p4109_p10, %p4103_p4 }
  0xac   : > { %4113 = shalt.err (!%p4110_p5)
}
  0xad   : > { %s5399_s27 = smov 4   ;;  %s5400_s3 = smov 64  }
  0xae   : > { %3664 = dma.hbm_to_vmem [thread:$0]  (!%p4700_p2), %s4774_s8, 256, %s838_s9, %s4709_s4, %s5400_s3, %s5400_s3, %s5399_s27  }
  0xaf   : > { %s4125_s21 = scalar_lea.vmem %s651_s15, 128  ;;  %p4133_p8 = scmp.lt.s32.totalorder %s651_s15, %s651_s15 }
  0xb0   : > { %p4126_p12 = scmp.ne.s32.totalorder %s651_s15, %s4125_s21  ;;  %p4134_p1 = scmp.lt.s32.totalorder %s4125_s21, %s4125_s21 }
  0xb2   : > { %p4128_p11 = pnand %p4126_p12, %p4625_p7  ;;  %p4135_p13 = por %p4134_p1, %p4133_p8 }
  0xb4   : > { %p4129_p3 = pneg %p4128_p11 }
  0xb6   : > { %p4136_p4 = pnand %p4135_p13, %p4129_p3 }
  0xb8   : > { %4139 = shalt.err (!%p4136_p4)
}
  0xb9   : > { %s5401_s6 = sld [smem:[#allocation51_spill]]  ;;  %s4401_s8 = smov [#allocation9]  }
  0xba   : > { %s664_s7 = sshll.u32 %s4401_s8, 4  ;;  %s5402_s14 = sld [smem:[#allocation60_spill]]  ;;  %s665_s7 = int_to_ptr.vmem [resolvable:$true] %s664_s7 }
  0xbb   : > { %s4151_s20 = scalar_lea.vmem %s665_s7, 16  ;;  %s4158_s24 = scalar_lea.vmem %s665_s7, 32 }
  0xbc   : > { %p4152_p9 = scmp.ne.s32.totalorder %s665_s7, %s4151_s20  ;;  %p4159_p12 = scmp.lt.s32.totalorder %s665_s7, %s665_s7 }
  0xbd   : > { %p4160_p11 = scmp.lt.s32.totalorder %s4158_s24, %s4151_s20 }
  0xbe   : > { %p4154_p10 = pnand %p4152_p9, %p4625_p7 }
  0xbf   : > { %3636 = dma.hbm_to_vmem [thread:$0]  (!%p4619_p6), %s5401_s6, 128, %s651_s15, [#allocation7], %s5400_s3, %s5400_s3, %s5399_s27  }
  0xc0   : > { %s855_s23 = scalar_lea.hbm %s5402_s14, %s4691_s26  ;;  %p4155_p5 = pneg %p4154_p10 }
  0xc1   : > { %p4161_p3 = por %p4160_p11, %p4159_p12 }
  0xc3   : > { %p4162_p8 = pnand %p4161_p3, %p4155_p5 }
  0xc5   : > { %4165 = shalt.err (!%p4162_p8)
}
  0xc6   : > { %s5403_s3 = sld [smem:[#allocation52_spill]]  ;;  %s850_s21 = scalar_lea.vmem [#allocation17], %s4688_s1 }
  0xc7   : > { %s857_s10 = sshll.u32 %s850_s21, 4  ;;  %s4402_s29 = smov [#allocation19]   ;;  %s858_s10 = int_to_ptr.vmem [resolvable:$true] %s857_s10 }
  0xc8   : > { %s675_s6 = sshll.u32 %s4402_s29, 4  ;;  %s4179_s8 = scalar_lea.vmem %s858_s10, 16  ;;  %s676_s6 = int_to_ptr.vmem [resolvable:$true] %s675_s6 }
  0xc9   : > { %p4180_p1 = scmp.ne.s32.totalorder %s858_s10, %s4179_s8  ;;  %s4403_s0 = smov [#allocation17]  }
  0xca   : > { %s4184_s9 = sshll.u32 %s4403_s0, 4  ;;  %s4185_s9 = int_to_ptr.vmem [resolvable:$false] %s4184_s9 }
  0xcb   : > { %p4182_p13 = pnand %p4180_p1, %p4713_p0  ;;  %s4186_s20 = scalar_lea.vmem %s4185_s9, 32 }
  0xcc   : > { %3639 = dma.hbm_to_vmem [thread:$0]  (!%p4619_p6), %s5403_s3, 16, %s665_s7, [#allocation10]  }
  0xcd   : > { %p4183_p4 = pneg %p4182_p13  ;;  %p4187_p9 = scmp.lt.s32.totalorder %s858_s10, %s4185_s9 }
  0xce   : > { %p4188_p10 = scmp.lt.s32.totalorder %s4186_s20, %s4179_s8 }
  0xd0   : > { %p4189_p5 = por %p4188_p10, %p4187_p9 }
  0xd2   : > { %p4190_p12 = pnand %p4189_p5, %p4183_p4 }
  0xd4   : > { %4193 = shalt.err (!%p4190_p12)
}
  0xd5   : > { %3667 = dma.hbm_to_vmem [thread:$0]  (!%p4700_p2), %s855_s23, 16, %s858_s10, %s4709_s4  }
  0xd6   : > { %s4205_s15 = scalar_lea.vmem %s676_s6, 16  ;;  %s4212_s27 = scalar_lea.vmem %s676_s6, 32 }
  0xd7   : > { %p4206_p11 = scmp.ne.s32.totalorder %s676_s6, %s4205_s15  ;;  %p4213_p1 = scmp.lt.s32.totalorder %s676_s6, %s676_s6 }
  0xd8   : > { %p4214_p13 = scmp.lt.s32.totalorder %s4212_s27, %s4205_s15 }
  0xd9   : > { %p4208_p3 = pnand %p4206_p11, %p4625_p7 }
  0xda   : > { %p4215_p4 = por %p4214_p13, %p4213_p1 }
  0xdb   : > { %p4209_p8 = pneg %p4208_p3 }
  0xdd   : > { %p4216_p9 = pnand %p4215_p4, %p4209_p8 }
  0xdf   : > { %4219 = shalt.err (!%p4216_p9)
}
  0xe0   : > { %3642 = dma.hbm_to_vmem [thread:$0]  (!%p4619_p6), %s5311_s17, 16, %s676_s6, [#allocation7]  }
  0xe1   : > { %s4404_s23 = smov [#allocation20]   ;;  %s880_s0 = scalar_lea.hbm %s5310_s16, %s4691_s26 }
  0xe2   : > { %s686_s10 = sshll.u32 %s4404_s23, 4  ;;  %s687_s10 = int_to_ptr.vmem [resolvable:$true] %s686_s10 }
  0xe3   : > { %s4231_s9 = scalar_lea.vmem %s687_s10, 16  ;;  %s4238_s20 = scalar_lea.vmem %s687_s10, 32 }
  0xe4   : > { %p4232_p10 = scmp.ne.s32.totalorder %s687_s10, %s4231_s9  ;;  %p4239_p11 = scmp.lt.s32.totalorder %s687_s10, %s687_s10 }
  0xe5   : > { %p4240_p3 = scmp.lt.s32.totalorder %s4238_s20, %s4231_s9 }
  0xe6   : > { %p4234_p5 = pnand %p4232_p10, %p4625_p7 }
  0xe7   : > { %p4241_p8 = por %p4240_p3, %p4239_p11 }
  0xe8   : > { %p4235_p12 = pneg %p4234_p5 }
  0xea   : > { %p4242_p1 = pnand %p4241_p8, %p4235_p12 }
  0xec   : > { %4245 = shalt.err (!%p4242_p1)
}
  0xed   : > { %s5404_s24 = sld [smem:[#allocation62_spill]]  ;;  %s875_s15 = scalar_lea.vmem [#allocation18], %s4688_s1 }
  0xee   : > { %s882_s27 = sshll.u32 %s875_s15, 4  ;;  %s4405_s3 = smov [#allocation18]   ;;  %s883_s27 = int_to_ptr.vmem [resolvable:$true] %s882_s27 }
  0xef   : > { %s4259_s19 = scalar_lea.vmem %s883_s27, 16  ;;  %s4264_s21 = sshll.u32 %s4405_s3, 4  ;;  %s4265_s21 = int_to_ptr.vmem [resolvable:$false] %s4264_s21 }
  0xf0   : > { %p4260_p7 = scmp.ne.s32.totalorder %s883_s27, %s4259_s19  ;;  %s4266_s23 = scalar_lea.vmem %s4265_s21, 32 }
  0xf1   : > { %p4267_p9 = scmp.lt.s32.totalorder %s883_s27, %s4265_s21  ;;  %p4268_p10 = scmp.lt.s32.totalorder %s4266_s23, %s4259_s19 }
  0xf2   : > { %p4262_p13 = pnand %p4260_p7, %p4713_p0 }
  0xf3   : > { %3645 = dma.hbm_to_vmem [thread:$0]  (!%p4619_p6), %s5404_s24, 16, %s687_s10, [#allocation10]  }
  0xf4   : > { %p4263_p4 = pneg %p4262_p13  ;;  %p4269_p5 = por %p4268_p10, %p4267_p9 }
  0xf6   : > { %p4270_p12 = pnand %p4269_p5, %p4263_p4 }
  0xf8   : > { %4273 = shalt.err (!%p4270_p12)
}
  0xf9   : > { %3670 = dma.hbm_to_vmem [thread:$0]  (!%p4700_p2), %s880_s0, 16, %s883_s27, %s4709_s4  }
  0xfa   : > { %s5405_s18 = sld [smem:[#allocation39_spill]] }
 0x100   : > { %p5406_p6 = scmp.ne.s32.totalorder %s5405_s18, 0 }
 0x101   : > { %p5407_p0 = scmp.eq.s32.totalorder (!%p5406_p6), %s4605_s25, 0 }
 0x102   : > { %891 = sbr.rel (%p5406_p6) target bundleno = 3881 (0xf29), region = 104 }
 0x107   : > { %4319 = dma.done.wait (%p5407_p0), [#allocation4], 16   ;;  %p5408_p11 = pmov %p5407_p0 }
 0x108   : > { %p5409_p3 = pmov %p5407_p0 }
 0x109   : > { %4321 = vsyncadd (%p5408_p11), [#allocation4], 4294967280 }
 0x10a   : > { %4323 = dma.done.wait (%p5409_p3), [#allocation7], 144   ;;  %p5410_p8 = pmov %p5407_p0 }
 0x10b   : > { %p5411_p1 = pmov %p5407_p0 }
 0x10c   : > { %4325 = vsyncadd (%p5410_p8), [#allocation7], 4294967152 }
 0x10d   : > { %4327 = dma.done.wait (%p5411_p1), [#allocation10], 16   ;;  %p5412_p2 = pmov %p5407_p0 }
 0x10e   : > { %s5413_s4 = sld [smem:[#allocation33_spill]]  ;;  %s909_s30 = sand.u32 1, %s4605_s25  }
 0x10f   : > { %4329 = vsyncadd (%p5412_p2), [#allocation10], 4294967280  ;;  %s910_s10 = scalar_lea.sflag [#allocation4], %s909_s30  ;;  %p5414_p7 = scmp.ne.s32.totalorder %s5382_s2, 0 }
 0x114   : > { %s4871_s26 = sand.u32 1, %s5413_s4  }
 0x115   : > { %4331 = dma.done.wait (%p5414_p7), %s910_s10, 608  }
 0x116   : > { %4333 = vsyncadd (%p5414_p7), %s910_s10, 4294966688  ;;  %s3276_s8 = sshll.u32 %s4871_s26, 4  ;;  %p5415_p13 = pmov %p5407_p0 }
 0x117   : > { %s4880_s9 = scalar_lea.vmem [#allocation13], %s3276_s8  ;;  %s4884_s7 = scalar_lea.vmem [#allocation16], %s3276_s8 }
 0x118   : > { %4335 = dma.done.wait (%p5415_p13), [#allocation7], 16   ;;  %p5416_p4 = pmov %p5407_p0 }
 0x119   : > { %p5417_p9 = pmov %p5407_p0 }
 0x11a   : > { %4337 = vsyncadd (%p5416_p4), [#allocation7], 4294967280 }
 0x11b   : > { %4339 = dma.done.wait (%p5417_p9), [#allocation10], 16   ;;  %p5418_p10 = pmov %p5407_p0 }
 0x11c   : > { %s5419_s2 = sld [smem:[#allocation36_spill]]  ;;  %s5343_s19 = sand.u32 1, %s4352_s28  }
 0x11d   : > { %4341 = vsyncadd (%p5418_p10), [#allocation10], 4294967280  ;;  %s5420_s27 = sld [smem:[#allocation35_spill]]  ;;  %s3280_s21 = sshll.u32 %s5343_s19, 5 }
 0x11e   : > { %s5421_s4 = sld [smem:[#allocation48_spill]]  ;;  %s4930_s6 = scalar_lea.vmem [#allocation21], %s3280_s21 }
 0x11f   : > { %s5422_s8 = sld [smem:[#allocation46_spill]] }
 0x120   : > { %s5423_s20 = sld [smem:[#allocation47_spill]] }
 0x121   : > { %s5424_s12 = sld [smem:[#allocation55_spill]] }
 0x122   : > { %s3281_s3 = sshll.u32 %s5419_s2, 1  ;;  %s5426_s10 = sld [smem:[#allocation65_spill]] }
 0x123   : > { %p1098_p5 = scmp.lt.s32.totalorder %s3281_s3, 3  ;;  %p1114_p12 = scmp.lt.s32.totalorder %s5420_s27, 1 }
 0x124   : > { %p3292_p6 = scmp.ne.s32.totalorder %s5420_s27, 0 }
 0x125   : > { %s5466_s3 = smov (!%p1098_p5, %s3281_s3), 3 }
 0x126   : > { %s1115_s23 = scalar_select %p1114_p12, %s5420_s27, 1 }
 0x127   : > { %s3282_s22 = sshll.u32 %s5466_s3, 3  ;;  %s4905_s30 = scalar_lea.vmem %s5421_s4, %s5466_s3 }
 0x128   : > { %s1101_s15 = scalar_lea.vmem %s5422_s8, %s3282_s22  ;;  %s4913_s2 = scalar_lea.vmem %s5423_s20, %s3282_s22 }
 0x129   : > { %s3366_s19 = sshll.u32 %s1115_s23, 4  ;;  %s3367_s0 = sshll.u32 %s1115_s23, 5 }
 0x12a   : > { %s4918_s13 = scalar_lea.vmem %s5424_s12, %s3366_s19  ;;  %s5425_s3 = sld [smem:[#allocation61_spill]] }
 0x12b   : > { %s4928_s8 = scalar_lea.vmem %s5426_s10, %s3282_s22 }
 0x12c   : > { %1135 = sbr.rel (%p3292_p6) target bundleno = 819 (0x333), region = 164 }
 0x130   : > { %s4923_s18 = scalar_lea.vmem %s5425_s3, %s3367_s0 }
 0x131   : > { %v1136_v0 = vld [vmem:[%s1101_s15] sm:$0xff]  ;;  %vm1139_vm0 = vcmask 130048   ;;  %v3298_v1 = vld [vmem:[%s1101_s15 + $0x8] sm:$0xff]  ;;  %v3813_v14 = vld [vmem:[#allocation8] sm:$0xff]   ;;  %v4406_v15 = vmov 0.0   ;;  %vm4407_vm1 = vmmov 0  }
 0x132   : > { %v1140_v2 = vsel %vm1139_vm0, %v1136_v0, 0.0  ;;  %v1233_v3 = vsel %vm1139_vm0, %v3298_v1, 0.0  ;;  %3423 = vmatprep.subr.bf16.mxu0 %v4406_v15  ;;  %3425 = vmatprep.mubr.msk.bf16.mxu0 %vm4407_vm1, %v4406_v15  ;;  %v3814_v16 = vld [vmem:[#allocation8] sm:$0xff]   ;;  %v3293_v24 = vld [vmem:[#allocation3] ss:$0 sm:$0xff]  ;;  %vm1227_vm2 = vcmask 261120  }
 0x133   : > { %1141 = vadd.xlane.f32.xlu0 %v1140_v2  ;;  %3424 = vmatpush3.bf16.msra.mxu0 %v3813_v14  ;;  %v3294_v26 = vld [vmem:[#allocation6] ss:$0 sm:$0xff]  ;;  %v3295_v35 = vld [vmem:[#allocation9] ss:$0 sm:$0xff] }
 0x134   : > { %3429 = vmatprep.subr.bf16.mxu1 %v4406_v15  ;;  %3431 = vmatprep.mubr.msk.bf16.mxu1 %vm4407_vm1, %v4406_v15 }
 0x135   : > { %3430 = vmatpush3.bf16.msra.mxu1 %v3814_v16 }
 0x137   : > { %1234 = vadd.xlane.f32.xlu0 %v1233_v3 }
 0x1bc   : > { %v1142_v4 = vpop.xlane.xlu0 %1141 }
 0x1bd   : > { %v1144_v5 = vmul.f32 0.0625, %v1142_v4 }
 0x1bf   : > { %v1145_v6 = vsub.f32 %v1136_v0, %v1144_v5 }
 0x1c0   : > { %v1235_v7 = vpop.xlane.xlu0 %1234 }
 0x1c1   : > { %v1236_v8 = vmul.f32 0.0625, %v1235_v7  ;;  %v1146_v9 = vmul.f32 %v1145_v6, %v1145_v6 }
 0x1c3   : > { %v1237_v10 = vsub.f32 %v3298_v1, %v1236_v8  ;;  %v1147_v11 = vsel %vm1139_vm0, %v1146_v9, 0.0 }
 0x1c4   : > { %1148 = vadd.xlane.f32.xlu1 %v1147_v11 }
 0x1c5   : > { %v1238_v12 = vmul.f32 %v1237_v10, %v1237_v10 }
 0x1c7   : > { %v1239_v13 = vsel %vm1139_vm0, %v1238_v12, 0.0 }
 0x1c8   : > { %1240 = vadd.xlane.f32.xlu1 %v1239_v13 }
 0x24d   : > { %v1149_v17 = vpop.xlane.xlu1 %1148 }
 0x24e   : > { %v1150_v18 = vmul.f32 0.0625, %v1149_v17 }
 0x250   : > { %v1151_v19 = vadd.f32 1e-05, %v1150_v18 }
 0x251   : > { %v1241_v20 = vpop.xlane.xlu1 %1240 }
 0x252   : > { %3815 = vrsqrt.f32 %v1151_v19  ;;  %v1242_v21 = vmul.f32 0.0625, %v1241_v20 }
 0x254   : > { %v1243_v22 = vadd.f32 1e-05, %v1242_v21 }
 0x256   : > { %3817 = vrsqrt.f32 %v1243_v22 }
 0x25f   : > { %v3816_v23 = vpop.eup %3815 }
 0x260   : > { %v1153_v25 = vmul.f32 %v3816_v23, %v1145_v6 }
 0x262   : > { %v1160_v27 = vmul.f32 %v3293_v24, %v1153_v25 }
 0x263   : > { %v3818_v28 = vpop.eup %3817 }
 0x264   : > { %v1167_v29 = vadd.f32 %v3294_v26, %v1160_v27  ;;  %v1245_v30 = vmul.f32 %v3818_v28, %v1237_v10 }
 0x266   : > { %v1168_v31 = vpack.c.bf16 %v1167_v29, %v1167_v29  ;;  %v1252_v32 = vmul.f32 %v3293_v24, %v1245_v30 }
 0x268   : > { %3426 = vmatmul.mubr.msk.bf16.vlgmr.msra.gmra.mxu0 %vm1139_vm0, %v1168_v31  ;;  %v1259_v33 = vadd.f32 %v3294_v26, %v1252_v32 }
 0x26a   : > { %v1260_v34 = vpack.c.bf16 %v1259_v33, %v1259_v33 }
 0x26c   : > { %3432 = vmatmul.mubr.msk.bf16.vlgmr.msra.gmra.mxu1 %vm1139_vm0, %v1260_v34 }
 0x328   : > { %v1221_v36 = vpop.f32.mrf.mxu0 }
 0x329   : > { %v1222_v37 = vadd.f32 %v3295_v35, %v1221_v36 }
 0x32a   : > { %v3427_v38 = vpop.f32.mrf.mxu0 }
 0x32b   : > { %1228 = vst.msk [vmem:[#allocation2] sm:$0xff] %vm1227_vm2, %v1222_v37 }
 0x32c   : > { %v1224_v39 = vpop.f32.mrf.mxu0  ;;  %v1313_v40 = vpop.f32.mrf.mxu1 }
 0x32d   : > { %v1314_v41 = vadd.f32 %v3295_v35, %v1313_v40 }
 0x32e   : > { %v3428_v42 = vpop.f32.mrf.mxu0  ;;  %v3433_v43 = vpop.f32.mrf.mxu1 }
 0x32f   : > { %1319 = vst.msk [vmem:[#allocation2 + $0x8] sm:$0xff] %vm1227_vm2, %v1314_v41 }
 0x330   : > { %v1316_v44 = vpop.f32.mrf.mxu1 }
 0x332   : > { %v3434_v45 = vpop.f32.mrf.mxu1 }
 0x333 PF: > { %v4939_v46 = vld [vmem:[#allocation2] sm:$0xff]  ;;  %vm1324_vm3 = vcmask 261120   ;;  %v3834_v60 = vld [vmem:[%s4918_s13 + $0x8] sm:$0xff]   ;;  %v4408_v61 = vmov 0.0   ;;  %vm4409_vm4 = vmmov 0   ;;  %s5427_s11 = scalar_lea.vmem [#allocation11], %s4871_s26  ;;  %v1485_v44 = vlaneseq }
 0x334   : > { %v1325_v48 = vsel %vm1324_vm3, %v4939_v46, 0.0  ;;  %3435 = vmatprep.subr.bf16.mxu0 %v4408_v61  ;;  %3439 = vmatprep.mubr.msk.bf16.mxu0 %vm4409_vm4, %v4408_v61  ;;  %v3835_v62 = vld [vmem:[%s4918_s13] sm:$0xff]   ;;  %s5428_s12 = scalar_lea.vmem [#allocation12], %s4871_s26  ;;  %s4410_s13 = smov 88   ;;  %vm1437_vm5 = vcmask 64512   ;;  %vm1511_vm10 = vcmask 1043456  }
 0x335   : > { %1326 = vadd.xlane.f32.xlu0 %v1325_v48  ;;  %3436 = vmatpush3.bf16.msra.mxu0 %v3834_v60  ;;  %v3304_v7 = vld [vmem:[%s5427_s11] ss:$0 sm:$0xff]  ;;  %s4411_s14 = smov 96   ;;  %s4412_s29 = smov 120   ;;  %v1486_v48 = vshrl.u32 %v1485_v44, 7  ;;  %vm1504_vm11 = vcmask 60416  }
 0x336   : > { %v4941_v47 = vld [vmem:[#allocation2 + $0x8] sm:$0xff]  ;;  %3443 = vmatprep.subr.bf16.mxu1 %v4408_v61  ;;  %3437 = vmatprep.subr.bf16.mxu0 %v4408_v61  ;;  %v3305_v11 = vld [vmem:[%s5428_s12] ss:$0 sm:$0xff]  ;;  %s4413_s0 = smov 112   ;;  %s4414_s20 = smov 80   ;;  %vm1910_vm12 = vcmask 130048  }
 0x337   : > { %v1328_v49 = vsel %vm1324_vm3, %v4941_v47, 0.0  ;;  %3445 = vmatprep.mubr.msk.bf16.mxu1 %vm4409_vm4, %v4408_v61  ;;  %s4415_s24 = smov 104   ;;  %s4416_s15 = smov 72   ;;  %v1429_v45 = vld [vmem:[%s4905_s30] sm:$0x1]  ;;  %vm1912_vm13 = vcmask 195584  }
 0x338   : > { %vm1430_vm6 = vcmp.gt.f32.partialorder %v1429_v45, 0.5  ;;  %s4418_s27 = smov 64   ;;  %s4419_s19 = smov 56   ;;  %vm2630_vm14 = vcmask 523264  }
 0x339   : > { %1329 = vadd.xlane.f32.xlu0 %v1328_v49  ;;  %3438 = vmatpush3.bf16.msra.mxu0 %v3835_v62  ;;  %v1487_v49 = vsub.s32 0, %v1486_v48  ;;  %s4420_s21 = smov 48   ;;  %s4421_s23 = smov 40  }
 0x33a   : > { %3449 = vmatprep.subr.bf16.mxu0 %v4408_v61  ;;  %s4422_s22 = smov 8   ;;  %s5431_s1 = scalar_lea.vmem [#allocation17], %s4871_s26 }
 0x33b   : > { %s5432_s3 = scalar_lea.vmem [#allocation18], %s4871_s26 }
 0x3be   : > { %v1327_v50 = vpop.xlane.xlu0 %1326 }
 0x3bf   : > { %v1332_v51 = vmul.f32 0.03125, %v1327_v50  ;;  %v4417_v50 = vmov 0  }
 0x3c1   : > { %v1334_v52 = vsub.f32 %v4939_v46, %v1332_v51  ;;  %v1484_v51 = vsel %vm1430_vm6, 1, %v4417_v50 }
 0x3c2   : > { %v1330_v53 = vpop.xlane.xlu0 %1329 }
 0x3c3   : > { %v1333_v54 = vmul.f32 0.03125, %v1330_v53  ;;  %v1336_v55 = vmul.f32 %v1334_v52, %v1334_v52  ;;  %v1431_v53 = vld [vmem:[%s4913_s2] sm:$0xff] }
 0x3c5   : > { %v1335_v56 = vsub.f32 %v4941_v47, %v1333_v54  ;;  %v1338_v57 = vsel %vm1324_vm3, %v1336_v55, 0.0  ;;  %v1432_v54 = vadd.f32 1.0, %v1431_v53 }
 0x3c6   : > { %1339 = vadd.xlane.f32.xlu1 %v1338_v57 }
 0x3c7   : > { %v1337_v58 = vmul.f32 %v1335_v56, %v1335_v56 }
 0x3c9   : > { %v1341_v59 = vsel %vm1324_vm3, %v1337_v58, 0.0 }
 0x3ca   : > { %1342 = vadd.xlane.f32.xlu1 %v1341_v59 }
 0x44f   : > { %v1340_v63 = vpop.xlane.xlu1 %1339 }
 0x450   : > { %v1344_v0 = vmul.f32 0.03125, %v1340_v63 }
 0x452   : > { %v1346_v1 = vadd.f32 1e-05, %v1344_v0 }
 0x453   : > { %v1343_v2 = vpop.xlane.xlu1 %1342 }
 0x454   : > { %3844 = vrsqrt.f32 %v1346_v1  ;;  %v1345_v3 = vmul.f32 0.03125, %v1343_v2 }
 0x456   : > { %v1347_v4 = vadd.f32 1e-05, %v1345_v3 }
 0x458   : > { %3846 = vrsqrt.f32 %v1347_v4 }
 0x461   : > { %v3845_v5 = vpop.eup %3844 }
 0x462   : > { %v1350_v6 = vmul.f32 %v3845_v5, %v1334_v52  ;;  %v1488_v52 = vrot.slane %v1484_v51, %v1487_v49 }
 0x464   : > { %v1358_v10 = vmul.f32 %v3304_v7, %v1350_v6  ;;  %vm1489_vm7 = vcmp.eq.s32.totalorder %v1488_v52, 1 }
 0x465   : > { %v3847_v8 = vpop.eup %3846 }
 0x466   : > { %v1351_v9 = vmul.f32 %v3847_v8, %v1335_v56  ;;  %v1366_v13 = vadd.f32 %v3305_v11, %v1358_v10 }
 0x468   : > { %v1359_v12 = vmul.f32 %v3304_v7, %v1351_v9 }
 0x46a   : > { %v1367_v14 = vadd.f32 %v3305_v11, %v1359_v12 }
 0x46c   : > { %v1368_v15 = vpack.c.bf16 %v1367_v14, %v1366_v13 }
 0x46e   : > { %3440 = vmatmul.mubr.msk.bf16.vlgmr.msra.gmra.mxu0 %vm1324_vm3, %v1368_v15 }
 0x46f   : > { %3451 = vmatprep.mubr.msk.bf16.mxu0 %vm4409_vm4, %v4408_v61 }
 0x52e   : > { %v1422_v16 = vpop.f32.mrf.mxu0 }
 0x52f   : > { %v4968_v17 = vpack.c.bf16 %v1422_v16, %v1422_v16 }
 0x530   : > { %v3441_v18 = vpop.f32.mrf.mxu0 }
 0x531   : > { %1557 = vrot.lane.b32.xlu1 %v4968_v17, %s4410_s13  ;;  %1435 = vrot.lane.b32.xlu0 %v4968_v17, %s4411_s14 }
 0x532   : > { %v1425_v19 = vpop.f32.mrf.mxu0 }
 0x533   : > { %v4976_v21 = vpack.c.bf16 %v1425_v19, %v1425_v19 }
 0x534   : > { %v3442_v20 = vpop.f32.mrf.mxu0 }
 0x535   : > { %1555 = vrot.lane.b32.xlu1 %v4968_v17, %s4412_s29  ;;  %1669 = vrot.lane.b32.xlu0 %v4968_v17, %s4413_s0  ;;  %v3320_v20 = vld [vmem:[%s4905_s30 + $0x1] sm:$0x1]  ;;  %s4423_s30 = smov 16  }
 0x536   : > { %vm1916_vm8 = vcmp.gt.f32.partialorder %v3320_v20, 0.5 }
 0x539   : > { %1671 = vrot.lane.b32.xlu1 %v4968_v17, %s4414_s20  ;;  %1783 = vrot.lane.b32.xlu0 %v4968_v17, %s4415_s24 }
 0x53d   : > { %1785 = vrot.lane.b32.xlu1 %v4968_v17, %s4416_s15  ;;  %2042 = vrot.lane.b32.xlu0 %v4976_v21, %s4410_s13 }
 0x541   : > { %2156 = vrot.lane.b32.xlu0 %v4976_v21, %s4414_s20  ;;  %1922 = vrot.lane.b32.xlu1 %v4976_v21, %s4411_s14 }
 0x545   : > { %2270 = vrot.lane.b32.xlu0 %v4976_v21, %s4416_s15  ;;  %2040 = vrot.lane.b32.xlu1 %v4976_v21, %s4412_s29 }
 0x549   : > { %2154 = vrot.lane.b32.xlu1 %v4976_v21, %s4413_s0 }
 0x54d   : > { %2268 = vrot.lane.b32.xlu1 %v4976_v21, %s4415_s24 }
 0x5a3   : > { %v1436_v22 = vpop.permute.xlu0 %1435  ;;  %v1558_v24 = vpop.permute.xlu1 %1557 }
 0x5a4   : > { %v1442_v23 = vsel %vm1437_vm5, %v1436_v22, 0  ;;  %v1563_v26 = vsel %vm1437_vm5, %v1558_v24, 0 }
 0x5a5   : > { %3444 = vmatpush3.bf16.xpose.msra.mxu1 %v1442_v23 }
 0x5a6   : > { %3455 = vmatprep.subr.bf16.mxu1 %v4408_v61 }
 0x5a7   : > { %v1556_v25 = vpop.permute.xlu1 %1555  ;;  %v1670_v30 = vpop.permute.xlu0 %1669 }
 0x5ab   : > { %v1672_v27 = vpop.permute.xlu1 %1671  ;;  %v1784_v33 = vpop.permute.xlu0 %1783 }
 0x5ac   : > { %3446 = vmatmul.mubr.msk.bf16.vlgmr.msra.gmra.mxu1 %vm1437_vm5, %v4968_v17  ;;  %v1677_v28 = vsel %vm1437_vm5, %v1672_v27, 0 }
 0x5ad   : > { %3456 = vmatpush3.bf16.xpose.msra.mxu1 %v1563_v26  ;;  %3457 = vmatprep.mubr.msk.bf16.mxu1 %vm4409_vm4, %v4408_v61 }
 0x5ae   : > { %3467 = vmatprep.subr.bf16.mxu1 %v4408_v61 }
 0x5af   : > { %v1786_v29 = vpop.permute.xlu1 %1785  ;;  %v2043_v35 = vpop.permute.xlu0 %2042 }
 0x5b0   : > { %v1791_v31 = vsel %vm1437_vm5, %v1786_v29, 0  ;;  %v2048_v36 = vsel %vm1437_vm5, %v2043_v35, 0 }
 0x5b3   : > { %v1923_v32 = vpop.permute.xlu1 %1922  ;;  %v2157_v37 = vpop.permute.xlu0 %2156 }
 0x5b4   : > { %3458 = vmatmul.mubr.msk.bf16.vlgmr.msra.gmra.mxu1 %vm1437_vm5, %v1556_v25  ;;  %v1928_v34 = vsel %vm1437_vm5, %v1923_v32, 0  ;;  %v2162_v39 = vsel %vm1437_vm5, %v2157_v37, 0  ;;  %v1970_v25 = vsel %vm1916_vm8, 1, %v4417_v50 }
 0x5b5   : > { %3468 = vmatpush3.bf16.xpose.msra.mxu1 %v1677_v28  ;;  %3469 = vmatprep.mubr.msk.bf16.mxu1 %vm4409_vm4, %v4408_v61  ;;  %v1974_v29 = vrot.slane %v1970_v25, %v1487_v49 }
 0x5b6   : > { %3479 = vmatprep.subr.bf16.mxu1 %v4408_v61 }
 0x5b7   : > { %v2041_v38 = vpop.permute.xlu1 %2040  ;;  %v2271_v40 = vpop.permute.xlu0 %2270  ;;  %vm1975_vm9 = vcmp.eq.s32.totalorder %v1974_v29, 1 }
 0x5b8   : > { %v2276_v42 = vsel %vm1437_vm5, %v2271_v40, 0 }
 0x5bb   : > { %v2155_v41 = vpop.permute.xlu1 %2154 }
 0x5bc   : > { %3470 = vmatmul.mubr.msk.bf16.vlgmr.msra.gmra.mxu1 %vm1437_vm5, %v1670_v30 }
 0x5bd   : > { %3480 = vmatpush3.bf16.xpose.msra.mxu1 %v1791_v31  ;;  %3481 = vmatprep.mubr.msk.bf16.mxu1 %vm4409_vm4, %v4408_v61 }
 0x5be   : > { %3491 = vmatprep.subr.bf16.mxu1 %v4408_v61 }
 0x5bf   : > { %v2269_v43 = vpop.permute.xlu1 %2268 }
 0x5c4   : > { %3482 = vmatmul.mubr.msk.bf16.vlgmr.msra.gmra.mxu1 %vm1437_vm5, %v1784_v33  ;;  %v3321_v33 = vld [vmem:[%s4913_s2 + $0x8] sm:$0xff]  ;;  %s4424_s2 = smov 24  }
 0x5c5   : > { %3492 = vmatpush3.bf16.xpose.msra.mxu1 %v1928_v34  ;;  %3493 = vmatprep.mubr.msk.bf16.mxu1 %vm4409_vm4, %v4408_v61  ;;  %v1919_v37 = vadd.f32 1.0, %v3321_v33 }
 0x5c6   : > { %3503 = vmatprep.subr.bf16.mxu1 %v4408_v61 }
 0x5cc   : > { %3494 = vmatmul.mubr.msk.bf16.vlgmr.msra.gmra.mxu1 %vm1437_vm5, %v4976_v21 }
 0x5cd   : > { %3504 = vmatpush3.bf16.xpose.msra.mxu1 %v2048_v36  ;;  %3505 = vmatprep.mubr.msk.bf16.mxu1 %vm4409_vm4, %v4408_v61 }
 0x5ce   : > { %3515 = vmatprep.subr.bf16.mxu1 %v4408_v61 }
 0x5d4   : > { %3506 = vmatmul.mubr.msk.bf16.vlgmr.msra.gmra.mxu1 %vm1437_vm5, %v2041_v38 }
 0x5d5   : > { %3516 = vmatpush3.bf16.xpose.msra.mxu1 %v2162_v39  ;;  %3517 = vmatprep.mubr.msk.bf16.mxu1 %vm4409_vm4, %v4408_v61 }
 0x5d6   : > { %3527 = vmatprep.subr.bf16.mxu1 %v4408_v61 }
 0x5dc   : > { %3518 = vmatmul.mubr.msk.bf16.vlgmr.msra.gmra.mxu1 %vm1437_vm5, %v2155_v41 }
 0x5dd   : > { %3528 = vmatpush3.bf16.xpose.msra.mxu1 %v2276_v42  ;;  %3529 = vmatprep.mubr.msk.bf16.mxu1 %vm4409_vm4, %v4408_v61 }
 0x5de   : > { %3539 = vmatprep.subr.bf16.mxu1 %v4408_v61 }
 0x5e4   : > { %3530 = vmatmul.mubr.msk.bf16.vlgmr.msra.gmra.mxu1 %vm1437_vm5, %v2269_v43 }
 0x5e5   : > { %3543 = vmatprep.mubr.msk.bf16.mxu1 %vm4409_vm4, %v4408_v61 }
 0x66c   : > { %v1478_v55 = vpop.f32.mrf.mxu1 }
 0x66d   : > { %v1490_v56 = vsel %vm1489_vm7, -1e+09, %v1478_v55 }
 0x66e   : > { %v5031_v57 = vmul.f32 %v1490_v56, %v1432_v54  ;;  %v3447_v58 = vpop.f32.mrf.mxu1 }
 0x670   : > { %v1481_v59 = vpop.f32.mrf.mxu1  ;;  %v1492_v60 = vsel %vm1437_vm5, %v5031_v57, -inf }
 0x671   : > { %1493 = vmax.xlane.f32.xlu0 %v1492_v60 }
 0x672   : > { %v3448_v62 = vpop.f32.mrf.mxu1 }
 0x674   : > { %v1599_v63 = vpop.f32.mrf.mxu1 }
 0x675   : > { %v1605_v0 = vsel %vm1489_vm7, -1e+09, %v1599_v63 }
 0x676   : > { %v5036_v1 = vmul.f32 %v1605_v0, %v1432_v54  ;;  %v3459_v2 = vpop.f32.mrf.mxu1 }
 0x678   : > { %v1602_v3 = vpop.f32.mrf.mxu1  ;;  %v1607_v4 = vsel %vm1437_vm5, %v5036_v1, -inf }
 0x679   : > { %1608 = vmax.xlane.f32.xlu1 %v1607_v4 }
 0x67a   : > { %v3460_v5 = vpop.f32.mrf.mxu1 }
 0x67c   : > { %v1713_v6 = vpop.f32.mrf.mxu1 }
 0x67d   : > { %v1719_v27 = vsel %vm1489_vm7, -1e+09, %v1713_v6 }
 0x67e   : > { %v3471_v7 = vpop.f32.mrf.mxu1  ;;  %v1720_v31 = vmul.f32 %v1719_v27, %v1432_v54 }
 0x680   : > { %v1716_v8 = vpop.f32.mrf.mxu1  ;;  %v1721_v38 = vsel %vm1437_vm5, %v1720_v31, -inf }
 0x682   : > { %v3472_v9 = vpop.f32.mrf.mxu1 }
 0x684   : > { %v1827_v10 = vpop.f32.mrf.mxu1 }
 0x685   : > { %v1833_v32 = vsel %vm1489_vm7, -1e+09, %v1827_v10 }
 0x686   : > { %v3483_v11 = vpop.f32.mrf.mxu1  ;;  %v1834_v36 = vmul.f32 %v1833_v32, %v1432_v54 }
 0x687   : > { %1506 = vrot.lane.b32.xlu0 %v4968_v17, %s4418_s27 }
 0x688   : > { %v1830_v12 = vpop.f32.mrf.mxu1  ;;  %v1835_v45 = vsel %vm1437_vm5, %v1834_v36, -inf }
 0x68a   : > { %v3484_v13 = vpop.f32.mrf.mxu1  ;;  %1621 = vrot.lane.b32.xlu1 %v4968_v17, %s4419_s19 }
 0x68c   : > { %v1964_v14 = vpop.f32.mrf.mxu1 }
 0x68d   : > { %v1976_v39 = vsel %vm1975_vm9, -1e+09, %v1964_v14 }
 0x68e   : > { %v3495_v15 = vpop.f32.mrf.mxu1  ;;  %v1977_v43 = vmul.f32 %v1976_v39, %v1919_v37 }
 0x690   : > { %v1967_v16 = vpop.f32.mrf.mxu1  ;;  %v1978_v53 = vsel %vm1437_vm5, %v1977_v43, -inf }
 0x692   : > { %v3496_v18 = vpop.f32.mrf.mxu1 }
 0x694   : > { %v2084_v19 = vpop.f32.mrf.mxu1 }
 0x695   : > { %v2090_v40 = vsel %vm1975_vm9, -1e+09, %v2084_v19 }
 0x696   : > { %v3507_v22 = vpop.f32.mrf.mxu1  ;;  %v2091_v44 = vmul.f32 %v2090_v40, %v1919_v37 }
 0x698   : > { %v2087_v23 = vpop.f32.mrf.mxu1  ;;  %v2092_v54 = vsel %vm1437_vm5, %v2091_v44, -inf }
 0x69a   : > { %v3508_v24 = vpop.f32.mrf.mxu1 }
 0x69c   : > { %v2198_v26 = vpop.f32.mrf.mxu1 }
 0x69d   : > { %v2204_v48 = vsel %vm1975_vm9, -1e+09, %v2198_v26 }
 0x69e   : > { %v3519_v28 = vpop.f32.mrf.mxu1  ;;  %v5050_v51 = vmul.f32 %v2204_v48, %v1919_v37 }
 0x6a0   : > { %v2201_v30 = vpop.f32.mrf.mxu1  ;;  %v2206_v55 = vsel %vm1437_vm5, %v5050_v51, -inf }
 0x6a2   : > { %v3520_v34 = vpop.f32.mrf.mxu1 }
 0x6a4   : > { %v2312_v35 = vpop.f32.mrf.mxu1 }
 0x6a5   : > { %v2318_v49 = vsel %vm1975_vm9, -1e+09, %v2312_v35 }
 0x6a6   : > { %1722 = vmax.xlane.f32.xlu0 %v1721_v38  ;;  %v3531_v41 = vpop.f32.mrf.mxu1  ;;  %v5052_v52 = vmul.f32 %v2318_v49, %v1919_v37 }
 0x6a8   : > { %v2315_v42 = vpop.f32.mrf.mxu1  ;;  %v2320_v56 = vsel %vm1437_vm5, %v5052_v52, -inf }
 0x6aa   : > { %1836 = vmax.xlane.f32.xlu0 %v1835_v45  ;;  %v3532_v50 = vpop.f32.mrf.mxu1 }
 0x6ae   : > { %1979 = vmax.xlane.f32.xlu0 %v1978_v53  ;;  %2093 = vmax.xlane.f32.xlu1 %v2092_v54 }
 0x6b2   : > { %2207 = vmax.xlane.f32.xlu0 %v2206_v55  ;;  %2321 = vmax.xlane.f32.xlu1 %v2320_v56 }
 0x6c8   : > { %1735 = vrot.lane.b32.xlu0 %v4968_v17, %s4420_s21 }
 0x6fa   : > { %v1494_v58 = vpop.xlane.xlu0 %1493 }
 0x6fb   : > { %v1495_v59 = vsub.f32 %v5031_v57, %v1494_v58 }
 0x6fd   : > { %v1496_v60 = vmul.f32 1.442695, %v1495_v59 }
 0x6fe   : > { %v1507_v62 = vpop.permute.xlu0 %1506 }
 0x6ff   : > { %3848 = vpow2.f32 %v1496_v60  ;;  %v1513_v63 = vsel %vm1511_vm10, %v1507_v62, 0 }
 0x700   : > { %3450 = vmatpush3.bf16.msra.mxu0 %v1513_v63 }
 0x701   : > { %3461 = vmatprep.subr.bf16.mxu0 %v4408_v61 }
 0x702   : > { %v1609_v0 = vpop.xlane.xlu1 %1608 }
 0x703   : > { %v1610_v2 = vsub.f32 %v5036_v1, %v1609_v0 }
 0x705   : > { %v1611_v3 = vmul.f32 1.442695, %v1610_v2 }
 0x706   : > { %v1622_v10 = vpop.permute.xlu1 %1621 }
 0x707   : > { %3850 = vpow2.f32 %v1611_v3 }
 0x70c   : > { %v3849_v4 = vpop.eup %3848 }
 0x70d   : > { %v1498_v5 = vsel %vm1437_vm5, %v3849_v4, 0.0 }
 0x70e   : > { %1499 = vadd.xlane.f32.xlu0 %v1498_v5 }
 0x714   : > { %v5067_v6 = vpop.eup %3850 }
 0x715   : > { %v1613_v57 = vsel %vm1437_vm5, %v5067_v6, 0.0 }
 0x716   : > { %1614 = vadd.xlane.f32.xlu1 %v1613_v57 }
 0x727   : > { %1992 = vrot.lane.b32.xlu1 %v4976_v21, %s4418_s27 }
 0x72f   : > { %v1723_v7 = vpop.xlane.xlu0 %1722 }
 0x730   : > { %v1724_v8 = vsub.f32 %v1720_v31, %v1723_v7 }
 0x732   : > { %v1725_v9 = vmul.f32 1.442695, %v1724_v8 }
 0x733   : > { %v1837_v1 = vpop.xlane.xlu0 %1836 }
 0x734   : > { %3852 = vpow2.f32 %v1725_v9  ;;  %v1838_v11 = vsub.f32 %v1834_v36, %v1837_v1 }
 0x736   : > { %v1839_v12 = vmul.f32 1.442695, %v1838_v11 }
 0x737   : > { %v1980_v13 = vpop.xlane.xlu0 %1979  ;;  %v2094_v14 = vpop.xlane.xlu1 %2093 }
 0x738   : > { %v1981_v15 = vsub.f32 %v1977_v43, %v1980_v13  ;;  %3854 = vpow2.f32 %v1839_v12  ;;  %v2095_v18 = vsub.f32 %v2091_v44, %v2094_v14  ;;  %v1627_v44 = vsel %vm1511_vm10, %v1622_v10, 0 }
 0x73a   : > { %v1982_v16 = vmul.f32 1.442695, %v1981_v15  ;;  %v2096_v19 = vmul.f32 1.442695, %v2095_v18 }
 0x73b   : > { %v2208_v29 = vpop.xlane.xlu0 %2207  ;;  %v2322_v32 = vpop.xlane.xlu1 %2321 }
 0x73c   : > { %3856 = vpow2.f32 %v1982_v16  ;;  %v2209_v30 = vsub.f32 %v5050_v51, %v2208_v29  ;;  %v2323_v33 = vsub.f32 %v5052_v52, %v2322_v32 }
 0x73d   : > { %3858 = vpow2.f32 %v2096_v19 }
 0x73e   : > { %v2210_v31 = vmul.f32 1.442695, %v2209_v30  ;;  %v2324_v34 = vmul.f32 1.442695, %v2323_v33 }
 0x73f   : > { %v1736_v38 = vpop.permute.xlu0 %1735 }
 0x740   : > { %3860 = vpow2.f32 %v2210_v31  ;;  %v1741_v49 = vsel %vm1511_vm10, %v1736_v38, 0 }
 0x741   : > { %v5073_v20 = vpop.eup %3852  ;;  %3862 = vpow2.f32 %v2324_v34 }
 0x742   : > { %v1727_v22 = vsel %vm1437_vm5, %v5073_v20, 0.0 }
 0x743   : > { %1728 = vadd.xlane.f32.xlu0 %v1727_v22 }
 0x745   : > { %v5077_v23 = vpop.eup %3854 }
 0x746   : > { %v1841_v24 = vsel %vm1437_vm5, %v5077_v23, 0.0 }
 0x749   : > { %v5081_v25 = vpop.eup %3856 }
 0x74a   : > { %v1984_v26 = vsel %vm1437_vm5, %v5081_v25, 0.0  ;;  %v5085_v27 = vpop.eup %3858 }
 0x74b   : > { %1842 = vadd.xlane.f32.xlu1 %v1841_v24  ;;  %v2098_v28 = vsel %vm1437_vm5, %v5085_v27, 0.0 }
 0x74d   : > { %v5094_v35 = vpop.eup %3860 }
 0x74e   : > { %v2212_v36 = vsel %vm1437_vm5, %v5094_v35, 0.0 }
 0x74f   : > { %1985 = vadd.xlane.f32.xlu1 %v1984_v26 }
 0x753   : > { %2099 = vadd.xlane.f32.xlu1 %v2098_v28 }
 0x759   : > { %1849 = vrot.lane.b32.xlu0 %v4968_v17, %s4421_s23  ;;  %v5098_v17 = vpop.eup %3862 }
 0x75a   : > { %v2326_v37 = vsel %vm1437_vm5, %v5098_v17, 0.0 }
 0x764   : > { %2106 = vrot.lane.b32.xlu1 %v4976_v21, %s4419_s19 }
 0x778   : > { %2213 = vadd.xlane.f32.xlu0 %v2212_v36 }
 0x788   : > { %2327 = vadd.xlane.f32.xlu1 %v2326_v37 }
 0x78e   : > { %2220 = vrot.lane.b32.xlu0 %v4976_v21, %s4420_s21 }
 0x797   : > { %v1500_v39 = vpop.xlane.xlu0 %1499 }
 0x798   : > { %3864 = vrcp.f32 %v1500_v39 }
 0x799   : > { %2334 = vrot.lane.b32.xlu1 %v4976_v21, %s4421_s23 }
 0x79f   : > { %v1615_v40 = vpop.xlane.xlu1 %1614 }
 0x7a0   : > { %3866 = vrcp.f32 %v1615_v40 }
 0x7a3   : > { %v1993_v51 = vpop.permute.xlu1 %1992 }
 0x7a4   : > { %v1998_v3 = vsel %vm1511_vm10, %v1993_v51, 0 }
 0x7a5   : > { %v3865_v41 = vpop.eup %3864 }
 0x7a6   : > { %v1502_v42 = vmul.f32 %v3865_v41, %v3849_v4 }
 0x7a8   : > { %v1503_v43 = vpack.c.bf16 %v1502_v42, %v1502_v42 }
 0x7aa   : > { %1505 = vst.msk [vmem:[%s4930_s6] sm:$0xf] %vm1504_vm11, %v1503_v43  ;;  %3452 = vmatmul.mubr.msk.bf16.vlgmr.msra.gmra.mxu0 %vm1437_vm5, %v1503_v43 }
 0x7ab   : > { %3462 = vmatpush3.bf16.msra.mxu0 %v1627_v44  ;;  %3463 = vmatprep.mubr.msk.bf16.mxu0 %vm4409_vm4, %v4408_v61 }
 0x7ac   : > { %3473 = vmatprep.subr.bf16.mxu0 %v4408_v61 }
 0x7ad   : > { %v3867_v21 = vpop.eup %3866 }
 0x7ae   : > { %v1617_v45 = vmul.f32 %v3867_v21, %v5067_v6 }
 0x7b0   : > { %v1618_v48 = vpack.c.bf16 %v1617_v45, %v1617_v45 }
 0x7b2   : > { %3312 = vst.msk [vmem:[%s4930_s6 + $0x4] sm:$0xf] %vm1504_vm11, %v1618_v48  ;;  %3464 = vmatmul.mubr.msk.bf16.vlgmr.msra.gmra.mxu0 %vm1437_vm5, %v1618_v48  ;;  %v3836_v48 = vld [vmem:[%s4880_s9 + $0x8] sm:$0xff]  }
 0x7b3   : > { %3474 = vmatpush3.bf16.msra.mxu0 %v1741_v49  ;;  %3475 = vmatprep.mubr.msk.bf16.mxu0 %vm4409_vm4, %v4408_v61 }
 0x7b4   : > { %3485 = vmatprep.subr.bf16.mxu0 %v4408_v61  ;;  %3540 = vmatpush3.bf16.msra.mxu1 %v3836_v48 }
 0x7b5   : > { %3541 = vmatprep.subr.bf16.mxu1 %v4408_v61 }
 0x7cc   : > { %v1729_v50 = vpop.xlane.xlu0 %1728 }
 0x7cd   : > { %3868 = vrcp.f32 %v1729_v50 }
 0x7d0   : > { %v1850_v56 = vpop.permute.xlu0 %1849 }
 0x7d1   : > { %v1855_v60 = vsel %vm1511_vm10, %v1850_v56, 0 }
 0x7d4   : > { %v1843_v52 = vpop.xlane.xlu1 %1842 }
 0x7d5   : > { %3870 = vrcp.f32 %v1843_v52 }
 0x7d8   : > { %v1986_v53 = vpop.xlane.xlu1 %1985 }
 0x7d9   : > { %3872 = vrcp.f32 %v1986_v53 }
 0x7da   : > { %v3869_v54 = vpop.eup %3868 }
 0x7db   : > { %v1731_v55 = vmul.f32 %v3869_v54, %v5073_v20  ;;  %v3837_v54 = vld [vmem:[%s4880_s9] sm:$0xff]   ;;  %s5429_s9 = scalar_lea.vmem [#allocation14], %s4871_s26 }
 0x7dc   : > { %v2100_v58 = vpop.xlane.xlu1 %2099  ;;  %3542 = vmatpush3.bf16.msra.mxu1 %v3837_v54  ;;  %v3339_v54 = vld [vmem:[%s5431_s1] ss:$0 sm:$0xff] }
 0x7dd   : > { %3874 = vrcp.f32 %v2100_v58  ;;  %v1732_v59 = vpack.c.bf16 %v1731_v55, %v1731_v55  ;;  %3555 = vmatprep.subr.bf16.mxu1 %v4408_v61 }
 0x7df   : > { %3315 = vst.msk [vmem:[%s4930_s6 + $0x8] sm:$0xf] %vm1504_vm11, %v1732_v59  ;;  %3476 = vmatmul.mubr.msk.bf16.vlgmr.msra.gmra.mxu0 %vm1437_vm5, %v1732_v59 }
 0x7e0   : > { %3486 = vmatpush3.bf16.msra.mxu0 %v1855_v60  ;;  %3487 = vmatprep.mubr.msk.bf16.mxu0 %vm4409_vm4, %v4408_v61  ;;  %v2107_v7 = vpop.permute.xlu1 %2106 }
 0x7e1   : > { %3497 = vmatprep.subr.bf16.mxu0 %v4408_v61  ;;  %v2112_v9 = vsel %vm1511_vm10, %v2107_v7, 0 }
 0x7e2   : > { %v3871_v62 = vpop.eup %3870 }
 0x7e3   : > { %v1845_v63 = vmul.f32 %v3871_v62, %v5077_v23 }
 0x7e5   : > { %v1846_v0 = vpack.c.bf16 %v1845_v63, %v1845_v63 }
 0x7e6   : > { %v3873_v2 = vpop.eup %3872 }
 0x7e7   : > { %3318 = vst.msk [vmem:[%s4930_s6 + $0xc] sm:$0xf] %vm1504_vm11, %v1846_v0  ;;  %3488 = vmatmul.mubr.msk.bf16.vlgmr.msra.gmra.mxu0 %vm1437_vm5, %v1846_v0  ;;  %v1988_v4 = vmul.f32 %v3873_v2, %v5081_v25 }
 0x7e8   : > { %3498 = vmatpush3.bf16.msra.mxu0 %v1998_v3  ;;  %3499 = vmatprep.mubr.msk.bf16.mxu0 %vm4409_vm4, %v4408_v61 }
 0x7e9   : > { %3509 = vmatprep.subr.bf16.mxu0 %v4408_v61  ;;  %v1989_v5 = vpack.c.bf16 %v1988_v4, %v1988_v4 }
 0x7ea   : > { %v3875_v6 = vpop.eup %3874 }
 0x7eb   : > { %3323 = vst.msk [vmem:[%s4930_s6 + $0x10] sm:$0xf] %vm1504_vm11, %v1989_v5  ;;  %v2102_v57 = vmul.f32 %v3875_v6, %v5085_v27 }
 0x7ed   : > { %v2103_v8 = vpack.c.bf16 %v2102_v57, %v2102_v57 }
 0x7ef   : > { %3500 = vmatmul.mubr.msk.bf16.vlgmr.msra.gmra.mxu0 %vm1437_vm5, %v1989_v5  ;;  %3326 = vst.msk [vmem:[%s4930_s6 + $0x14] sm:$0xf] %vm1504_vm11, %v2103_v8 }
 0x7f0   : > { %3510 = vmatpush3.bf16.msra.mxu0 %v2112_v9  ;;  %3511 = vmatprep.mubr.msk.bf16.mxu0 %vm4409_vm4, %v4408_v61 }
 0x7f1   : > { %3521 = vmatprep.subr.bf16.mxu0 %v4408_v61 }
 0x7f7   : > { %3512 = vmatmul.mubr.msk.bf16.vlgmr.msra.gmra.mxu0 %vm1437_vm5, %v2103_v8 }
 0x7f8   : > { %3523 = vmatprep.mubr.msk.bf16.mxu0 %vm4409_vm4, %v4408_v61 }
 0x801   : > { %v2214_v10 = vpop.xlane.xlu0 %2213 }
 0x802   : > { %3876 = vrcp.f32 %v2214_v10 }
 0x805   : > { %v2221_v1 = vpop.permute.xlu0 %2220 }
 0x806   : > { %v2226_v11 = vsel %vm1511_vm10, %v2221_v1, 0 }
 0x807   : > { %3522 = vmatpush3.bf16.msra.mxu0 %v2226_v11 }
 0x808   : > { %3533 = vmatprep.subr.bf16.mxu0 %v4408_v61 }
 0x80f   : > { %v3877_v12 = vpop.eup %3876 }
 0x810   : > { %v2216_v13 = vmul.f32 %v3877_v12, %v5094_v35 }
 0x811   : > { %v2328_v14 = vpop.xlane.xlu1 %2327 }
 0x812   : > { %3878 = vrcp.f32 %v2328_v14  ;;  %v2217_v15 = vpack.c.bf16 %v2216_v13, %v2216_v13 }
 0x814   : > { %3329 = vst.msk [vmem:[%s4930_s6 + $0x18] sm:$0xf] %vm1504_vm11, %v2217_v15  ;;  %3524 = vmatmul.mubr.msk.bf16.vlgmr.msra.gmra.mxu0 %vm1437_vm5, %v2217_v15 }
 0x815   : > { %v2335_v16 = vpop.permute.xlu1 %2334  ;;  %3535 = vmatprep.mubr.msk.bf16.mxu0 %vm4409_vm4, %v4408_v61 }
 0x816   : > { %v2340_v18 = vsel %vm1511_vm10, %v2335_v16, 0 }
 0x817   : > { %3534 = vmatpush3.bf16.msra.mxu0 %v2340_v18 }
 0x818   : > { %3547 = vmatprep.subr.bf16.mxu0 %v4408_v61 }
 0x81f   : > { %v3879_v19 = vpop.eup %3878 }
 0x820   : > { %v2330_v20 = vmul.f32 %v3879_v19, %v5098_v17 }
 0x822   : > { %v2331_v22 = vpack.c.bf16 %v2330_v20, %v2330_v20 }
 0x824   : > { %3332 = vst.msk [vmem:[%s4930_s6 + $0x1c] sm:$0xf] %vm1504_vm11, %v2331_v22  ;;  %3536 = vmatmul.mubr.msk.bf16.vlgmr.msra.gmra.mxu0 %vm1437_vm5, %v2331_v22 }
 0x825   : > { %3551 = vmatprep.mubr.msk.bf16.mxu0 %vm4409_vm4, %v4408_v61 }
 0x86a   : > { %v1549_v23 = vpop.f32.mrf.mxu0 }
 0x86c   : > { %v3453_v24 = vpop.f32.mrf.mxu0 }
 0x86e   : > { %v1552_v25 = vpop.f32.mrf.mxu0 }
 0x870   : > { %v3454_v26 = vpop.f32.mrf.mxu0 }
 0x872   : > { %v1663_v27 = vpop.f32.mrf.mxu0 }
 0x874   : > { %v3465_v28 = vpop.f32.mrf.mxu0 }
 0x876   : > { %v1666_v29 = vpop.f32.mrf.mxu0 }
 0x878   : > { %v3466_v30 = vpop.f32.mrf.mxu0 }
 0x89f   : > { %v1777_v31 = vpop.f32.mrf.mxu0 }
 0x8a1   : > { %v3477_v32 = vpop.f32.mrf.mxu0 }
 0x8a2   : > { %v3839_v32 = vld [vmem:[%s4884_s7] sm:$0xff]  }
 0x8a3   : > { %v1780_v33 = vpop.f32.mrf.mxu0 }
 0x8a5   : > { %v3478_v34 = vpop.f32.mrf.mxu0 }
 0x8a7   : > { %v1891_v35 = vpop.f32.mrf.mxu0 }
 0x8a9   : > { %v3489_v36 = vpop.f32.mrf.mxu0 }
 0x8ab   : > { %v1894_v17 = vpop.f32.mrf.mxu0 }
 0x8ad   : > { %v3490_v37 = vpop.f32.mrf.mxu0 }
 0x8af   : > { %v2034_v38 = vpop.f32.mrf.mxu0 }
 0x8b1   : > { %v3501_v39 = vpop.f32.mrf.mxu0 }
 0x8b3   : > { %v2037_v40 = vpop.f32.mrf.mxu0 }
 0x8b4   : > { %v3337_v40 = vld [vmem:[%s5429_s9] ss:$0 sm:$0xff] }
 0x8b5   : > { %v3502_v41 = vpop.f32.mrf.mxu0 }
 0x8b7   : > { %v2148_v42 = vpop.f32.mrf.mxu0 }
 0x8b8   : > { %v3819_v43 = vpack.i.bf16 %v2148_v42, %v1663_v27 }
 0x8b9   : > { %v3513_v44 = vpop.f32.mrf.mxu0 }
 0x8ba   : > { %3820 = vrot.lane.b32.xlu0 %v3819_v43, %s4422_s22 }
 0x8bb   : > { %v2151_v21 = vpop.f32.mrf.mxu0 }
 0x8bd   : > { %v3514_v45 = vpop.f32.mrf.mxu0 }
 0x8d4   : > { %v2262_v49 = vpop.f32.mrf.mxu0 }
 0x8d5   : > { %v3824_v50 = vpack.i.bf16 %v2262_v49, %v1777_v31  ;;  %v3838_v31 = vld [vmem:[%s4884_s7 + $0x8] sm:$0xff]   ;;  %s5430_s7 = scalar_lea.vmem [#allocation15], %s4871_s26 }
 0x8d6   : > { %v3525_v51 = vpop.f32.mrf.mxu0  ;;  %3548 = vmatpush3.bf16.msra.mxu0 %v3838_v31  ;;  %v3338_v44 = vld [vmem:[%s5430_s7] ss:$0 sm:$0xff] }
 0x8d7   : > { %3825 = vrot.lane.b32.xlu1 %v3824_v50, %s4423_s30  ;;  %3549 = vmatprep.subr.bf16.mxu0 %v4408_v61  ;;  %v3840_v50 = vld [vmem:[%s4923_s18 + $0x18] sm:$0xff]   ;;  %v3841_v51 = vld [vmem:[%s4923_s18 + $0x10] sm:$0xff]  }
 0x8d8   : > { %v2265_v52 = vpop.f32.mrf.mxu0 }
 0x8d9   : > { %v3842_v52 = vld [vmem:[%s4923_s18 + $0x8] sm:$0xff]  }
 0x8da   : > { %v3526_v53 = vpop.f32.mrf.mxu0  ;;  %3550 = vmatpush3.bf16.msra.mxu0 %v3839_v32 }
 0x8db   : > { %v3843_v53 = vld [vmem:[%s4923_s18] sm:$0xff]   ;;  %s5433_s18 = sld [smem:[#allocation35_spill]] }
 0x8e1   : > { %p3349_p0 = scmp.ne.s32.totalorder %s5433_s18, 1 }
 0x8e2   : > { %s5434_s25 = sld [smem:[#allocation64_spill]] (!%p3349_p0) }
 0x8e3   : > { %s5435_s14 = sld [smem:[#allocation63_spill]] (!%p3349_p0) }
 0x8e4   : > { %v2376_v55 = vpop.f32.mrf.mxu0 }
 0x8e5   : > { %v3829_v56 = vpack.i.bf16 %v2376_v55, %v1891_v35 }
 0x8e6   : > { %v3537_v58 = vpop.f32.mrf.mxu0 }
 0x8e7   : > { %3830 = vrot.lane.b32.xlu0 %v3829_v56, %s4424_s2 }
 0x8e8   : > { %v2379_v59 = vpop.f32.mrf.mxu0 }
 0x8ea   : > { %v3538_v60 = vpop.f32.mrf.mxu0 }
 0x92c   : > { %v3821_v62 = vpop.permute.xlu0 %3820 }
 0x92d   : > { %v3823_v0 = vunpack.i.h.bf16 %v3821_v62  ;;  %v3822_v2 = vunpack.i.l.bf16 %v3821_v62 }
 0x92f   : > { %v2394_v6 = vsel %vm1437_vm5, %v2034_v38, %v3823_v0  ;;  %v1909_v57 = vsel %vm1437_vm5, %v1549_v23, %v3822_v2 }
 0x949   : > { %v3826_v63 = vpop.permute.xlu1 %3825 }
 0x94a   : > { %v3828_v3 = vunpack.i.h.bf16 %v3826_v63  ;;  %v3827_v4 = vunpack.i.l.bf16 %v3826_v63 }
 0x94c   : > { %v2395_v9 = vsel %vm1910_vm12, %v2394_v6, %v3828_v3  ;;  %v1911_v10 = vsel %vm1910_vm12, %v1909_v57, %v3827_v4 }
 0x959   : > { %v3831_v5 = vpop.permute.xlu0 %3830 }
 0x95a   : > { %v3833_v7 = vunpack.i.h.bf16 %v3831_v5  ;;  %v3832_v8 = vunpack.i.l.bf16 %v3831_v5 }
 0x95c   : > { %v2396_v1 = vsel %vm1912_vm13, %v2395_v9, %v3833_v7  ;;  %v1913_v11 = vsel %vm1912_vm13, %v1911_v10, %v3832_v8 }
 0x95d   : > { %v2397_v12 = vpack.c.bf16 %v2396_v1, %v1913_v11 }
 0x95f   : > { %3544 = vmatmul.mubr.msk.bf16.vlgmr.msra.gmra.mxu1 %vm1324_vm3, %v2397_v12 }
 0x960   : > { %3563 = vmatprep.mubr.msk.bf16.mxu1 %vm4409_vm4, %v4408_v61  ;;  %3556 = vmatpush3.bf16.msra.mxu1 %v3840_v50 }
 0x961   : > { %3557 = vmatprep.subr.bf16.mxu1 %v4408_v61 }
 0x964   : > { %3558 = vmatpush3.bf16.msra.mxu1 %v3841_v51 }
 0x965   : > { %3559 = vmatprep.subr.bf16.mxu1 %v4408_v61 }
 0x968   : > { %3560 = vmatpush3.bf16.msra.mxu1 %v3842_v52 }
 0x969   : > { %3561 = vmatprep.subr.bf16.mxu1 %v4408_v61 }
 0x96c   : > { %3562 = vmatpush3.bf16.msra.mxu1 %v3843_v53 }
 0xa1f   : > { %v2451_v13 = vpop.f32.mrf.mxu1 }
 0xa20   : > { %v5176_v14 = vadd.f32 %v2451_v13, %v4939_v46 }
 0xa21   : > { %v3545_v15 = vpop.f32.mrf.mxu1 }
 0xa22   : > { %v2462_v16 = vsel %vm1324_vm3, %v5176_v14, 0.0 }
 0xa23   : > { %2463 = vadd.xlane.f32.xlu1 %v2462_v16  ;;  %v2454_v18 = vpop.f32.mrf.mxu1 }
 0xa24   : > { %v5181_v19 = vadd.f32 %v2454_v18, %v4941_v47  ;;  %v3343_v18 = vld [vmem:[%s5432_s3] ss:$0 sm:$0xff] }
 0xa25   : > { %v3546_v20 = vpop.f32.mrf.mxu1 }
 0xa26   : > { %v2465_v22 = vsel %vm1324_vm3, %v5181_v19, 0.0 }
 0xa27   : > { %2466 = vadd.xlane.f32.xlu0 %v2465_v22 }
 0xaac   : > { %v2464_v23 = vpop.xlane.xlu1 %2463 }
 0xaad   : > { %v2468_v24 = vmul.f32 0.03125, %v2464_v23 }
 0xaaf   : > { %v2470_v46 = vsub.f32 %v5176_v14, %v2468_v24 }
 0xab0   : > { %v2467_v25 = vpop.xlane.xlu0 %2466 }
 0xab1   : > { %v2469_v26 = vmul.f32 0.03125, %v2467_v25  ;;  %v2472_v27 = vmul.f32 %v2470_v46, %v2470_v46 }
 0xab3   : > { %v2471_v28 = vsub.f32 %v5181_v19, %v2469_v26  ;;  %v2474_v29 = vsel %vm1324_vm3, %v2472_v27, 0.0 }
 0xab4   : > { %2475 = vadd.xlane.f32.xlu0 %v2474_v29 }
 0xab5   : > { %v2473_v47 = vmul.f32 %v2471_v28, %v2471_v28 }
 0xab7   : > { %v2477_v30 = vsel %vm1324_vm3, %v2473_v47, 0.0 }
 0xab8   : > { %2478 = vadd.xlane.f32.xlu0 %v2477_v30 }
 0xb3d   : > { %v2476_v33 = vpop.xlane.xlu0 %2475 }
 0xb3e   : > { %v2480_v34 = vmul.f32 0.03125, %v2476_v33 }
 0xb40   : > { %v2482_v35 = vadd.f32 1e-05, %v2480_v34 }
 0xb41   : > { %v2479_v36 = vpop.xlane.xlu0 %2478 }
 0xb42   : > { %3880 = vrsqrt.f32 %v2482_v35  ;;  %v2481_v17 = vmul.f32 0.03125, %v2479_v36 }
 0xb44   : > { %v2483_v37 = vadd.f32 1e-05, %v2481_v17 }
 0xb46   : > { %3882 = vrsqrt.f32 %v2483_v37 }
 0xb4f   : > { %v3881_v38 = vpop.eup %3880 }
 0xb50   : > { %v2486_v39 = vmul.f32 %v3881_v38, %v2470_v46 }
 0xb52   : > { %v2494_v43 = vmul.f32 %v3337_v40, %v2486_v39 }
 0xb53   : > { %v3883_v41 = vpop.eup %3882 }
 0xb54   : > { %v2487_v42 = vmul.f32 %v3883_v41, %v2471_v28  ;;  %v2502_v45 = vadd.f32 %v3338_v44, %v2494_v43 }
 0xb56   : > { %v2495_v21 = vmul.f32 %v3337_v40, %v2487_v42 }
 0xb58   : > { %v2503_v48 = vadd.f32 %v3338_v44, %v2495_v21 }
 0xb5a   : > { %v2504_v49 = vpack.c.bf16 %v2503_v48, %v2502_v45 }
 0xb5c   : > { %3552 = vmatmul.mubr.msk.bf16.vlgmr.msra.gmra.mxu0 %vm1324_vm3, %v2504_v49 }
 0xc1c   : > { %v2565_v55 = vpop.f32.mrf.mxu0 }
 0xc1d   : > { %v2566_v56 = vadd.f32 %v3339_v54, %v2565_v55 }
 0xc1e   : > { %v3553_v58 = vpop.f32.mrf.mxu0 }
 0xc1f   : > { %v2572_v59 = vmul.f32 %v2566_v56, %v2566_v56 }
 0xc20   : > { %v2568_v60 = vpop.f32.mrf.mxu0 }
 0xc21   : > { %v2574_v62 = vmul.f32 %v2572_v59, %v2566_v56  ;;  %v2569_v63 = vadd.f32 %v3339_v54, %v2568_v60 }
 0xc22   : > { %v3554_v0 = vpop.f32.mrf.mxu0 }
 0xc23   : > { %v2576_v2 = vmul.f32 0.044715, %v2574_v62  ;;  %v2573_v3 = vmul.f32 %v2569_v63, %v2569_v63 }
 0xc25   : > { %v2578_v4 = vadd.f32 %v2576_v2, %v2566_v56  ;;  %v2575_v5 = vmul.f32 %v2573_v3, %v2569_v63 }
 0xc27   : > { %v2580_v6 = vmul.f32 0.7978846, %v2578_v4  ;;  %v2577_v57 = vmul.f32 0.044715, %v2575_v5 }
 0xc29   : > { %3884 = vtanh.f32 %v2580_v6  ;;  %v2579_v61 = vadd.f32 %v2577_v57, %v2569_v63 }
 0xc2b   : > { %v2581_v7 = vmul.f32 0.7978846, %v2579_v61 }
 0xc2d   : > { %3886 = vtanh.f32 %v2581_v7 }
 0xc36   : > { %v3885_v8 = vpop.eup %3884 }
 0xc37   : > { %v2584_v9 = vadd.f32 1.0, %v3885_v8 }
 0xc39   : > { %v2586_v1 = vmul.f32 0.5, %v2584_v9 }
 0xc3a   : > { %v3887_v10 = vpop.eup %3886 }
 0xc3b   : > { %v2585_v11 = vadd.f32 1.0, %v3887_v10  ;;  %v2588_v13 = vmul.f32 %v2586_v1, %v2566_v56 }
 0xc3d   : > { %v2587_v12 = vmul.f32 0.5, %v2585_v11 }
 0xc3f   : > { %v2589_v15 = vmul.f32 %v2587_v12, %v2569_v63 }
 0xc41   : > { %v2590_v16 = vpack.c.bf16 %v2589_v15, %v2588_v13 }
 0xc43   : > { %3564 = vmatmul.mubr.msk.bf16.vlgmr.msra.gmra.mxu1 %vm2630_vm14, %v2590_v16 }
 0xd03   : > { %v2668_v20 = vpop.f32.mrf.mxu1 }
 0xd04   : > { %v2669_v22 = vadd.f32 %v3343_v18, %v2668_v20 }
 0xd05   : > { %v3565_v23 = vpop.f32.mrf.mxu1 }
 0xd06   : > { %v2675_v24 = vadd.f32 %v2669_v22, %v5176_v14 }
 0xd07   : > { %v2671_v46 = vpop.f32.mrf.mxu1 }
 0xd08   : > { %2677 = vst.msk [vmem:[#allocation2] sm:$0xff] %vm1324_vm3, %v2675_v24  ;;  %v2672_v25 = vadd.f32 %v3343_v18, %v2671_v46  ;;  %2682 = sbr.rel (%p3349_p0) target bundleno = 3862 (0xf16), region = 168 }
 0xd09   : > { %v3566_v26 = vpop.f32.mrf.mxu1 }
 0xd0a   : > { %v2676_v27 = vadd.f32 %v2672_v25, %v5181_v19 }
 0xd0c   : > { %2678 = vst.msk [vmem:[#allocation2 + $0x8] sm:$0xff] %vm1324_vm3, %v2676_v27 }
 0xd0d   : > { %v2685_v28 = vsel %vm1324_vm3, %v2675_v24, 0.0  ;;  %v2770_v29 = vsel %vm1324_vm3, %v2676_v27, 0.0  ;;  %v4425_v17 = vmov 0.0   ;;  %vm4426_vm15 = vmmov 0   ;;  %v2714_v37 = vld [vmem:[%s5434_s25] sm:$0x1f] }
 0xd0e   : > { %2686 = vadd.xlane.f32.xlu0 %v2685_v28  ;;  %3567 = vmatprep.subr.bf16.mxu0 %v4425_v17  ;;  %v2799_v38 = vld [vmem:[%s5434_s25] sm:$0x1f]  ;;  %v4427_v39 = vmov 0   ;;  %v3350_v48 = vld [vmem:[#allocation19] ss:$0 sm:$0xff]  ;;  %vm2766_vm0 = vcmask 61440  }
 0xd0f   : > { %3573 = vmatprep.subr.bf16.mxu1 %v4425_v17  ;;  %3569 = vmatprep.mubr.msk.bf16.mxu0 %vm4426_vm15, %v4425_v17  ;;  %v3351_v50 = vld [vmem:[#allocation20] ss:$0 sm:$0xff]  ;;  %v2712_v63 = vld [vmem:[%s5435_s14] sm:$0x7] }
 0xd10   : > { %3575 = vmatprep.mubr.msk.bf16.mxu1 %vm4426_vm15, %v4425_v17  ;;  %3888 = vset.pattern.permute.xlu0 %v4427_v39  ;;  %v2797_v0 = vld [vmem:[%s5435_s14] sm:$0x7] }
 0xd11   : > { %3889 = vset.pattern.permute.xlu1 %v4427_v39 }
 0xd12   : > { %2771 = vadd.xlane.f32.xlu0 %v2770_v29 }
 0xd28   : > { %2717 = vperm.xlu0 %3888, %v2714_v37  }
 0xd97   : > { %v2687_v47 = vpop.xlane.xlu0 %2686 }
 0xd98   : > { %v2688_v14 = vmul.f32 0.03125, %v2687_v47 }
 0xd9a   : > { %v2689_v30 = vsub.f32 %v2675_v24, %v2688_v14 }
 0xd9b   : > { %v2772_v31 = vpop.xlane.xlu0 %2771 }
 0xd9c   : > { %v2773_v32 = vmul.f32 0.03125, %v2772_v31  ;;  %v2690_v33 = vmul.f32 %v2689_v30, %v2689_v30 }
 0xd9e   : > { %v2774_v34 = vsub.f32 %v2676_v27, %v2773_v32  ;;  %v2691_v19 = vsel %vm1324_vm3, %v2690_v33, 0.0 }
 0xd9f   : > { %2692 = vadd.xlane.f32.xlu1 %v2691_v19 }
 0xda0   : > { %v2775_v35 = vmul.f32 %v2774_v34, %v2774_v34 }
 0xda2   : > { %v2776_v36 = vsel %vm1324_vm3, %v2775_v35, 0.0 }
 0xda3   : > { %2777 = vadd.xlane.f32.xlu1 %v2776_v36  ;;  %v2718_v2 = vpop.permute.xlu0 %2717 }
 0xdb4   : > { %2802 = vperm.xlu1 %3889, %v2799_v38  }
 0xe28   : > { %v2693_v40 = vpop.xlane.xlu1 %2692 }
 0xe29   : > { %v2694_v41 = vmul.f32 0.03125, %v2693_v40 }
 0xe2b   : > { %v2695_v42 = vadd.f32 1e-05, %v2694_v41 }
 0xe2c   : > { %v2778_v43 = vpop.xlane.xlu1 %2777 }
 0xe2d   : > { %3890 = vrsqrt.f32 %v2695_v42  ;;  %v2779_v44 = vmul.f32 0.03125, %v2778_v43 }
 0xe2f   : > { %v2780_v21 = vadd.f32 1e-05, %v2779_v44 }
 0xe30   : > { %v2803_v6 = vpop.permute.xlu1 %2802 }
 0xe31   : > { %3892 = vrsqrt.f32 %v2780_v21 }
 0xe3a   : > { %v3891_v45 = vpop.eup %3890 }
 0xe3b   : > { %v2697_v49 = vmul.f32 %v3891_v45, %v2689_v30 }
 0xe3d   : > { %v2704_v51 = vmul.f32 %v3350_v48, %v2697_v49 }
 0xe3e   : > { %v3893_v52 = vpop.eup %3892 }
 0xe3f   : > { %v2711_v53 = vadd.f32 %v3351_v50, %v2704_v51  ;;  %v2782_v54 = vmul.f32 %v3893_v52, %v2774_v34 }
 0xe41   : > { %v2713_v55 = vpack.c.bf16 %v2711_v53, %v2711_v53  ;;  %v2789_v56 = vmul.f32 %v3350_v48, %v2782_v54 }
 0xe43   : > { %v2724_v58 = vsel %vm1324_vm3, %v2713_v55, 0  ;;  %v2796_v59 = vadd.f32 %v3351_v50, %v2789_v56 }
 0xe44   : > { %3568 = vmatpush3.bf16.xpose.msra.mxu0 %v2724_v58 }
 0xe45   : > { %v2798_v60 = vpack.c.bf16 %v2796_v59, %v2796_v59 }
 0xe47   : > { %v2809_v62 = vsel %vm1324_vm3, %v2798_v60, 0 }
 0xe48   : > { %3574 = vmatpush3.bf16.xpose.msra.mxu1 %v2809_v62 }
 0xe4b   : > { %3570 = vmatmul.mubr.msk.bf16.vlgmr.msra.gmra.mxu0 %vm1324_vm3, %v2712_v63 }
 0xe4f   : > { %3576 = vmatmul.mubr.msk.bf16.vlgmr.msra.gmra.mxu1 %vm1324_vm3, %v2797_v0 }
 0xf0b   : > { %v2760_v3 = vpop.f32.mrf.mxu0 }
 0xf0c   : > { %v2761_v4 = vadd.f32 %v2760_v3, %v2718_v2 }
 0xf0d   : > { %v3571_v5 = vpop.f32.mrf.mxu0 }
 0xf0e   : > { %2767 = vst.msk [vmem:[%s4928_s8] sm:$0x1f] %vm2766_vm0, %v2761_v4 }
 0xf0f   : > { %v2845_v57 = vpop.f32.mrf.mxu1  ;;  %v2763_v61 = vpop.f32.mrf.mxu0 }
 0xf10   : > { %v2846_v7 = vadd.f32 %v2845_v57, %v2803_v6 }
 0xf11   : > { %v3572_v8 = vpop.f32.mrf.mxu0  ;;  %v3577_v9 = vpop.f32.mrf.mxu1 }
 0xf12   : > { %3356 = vst.msk [vmem:[%s4928_s8 + $0x8] sm:$0x1f] %vm2766_vm0, %v2846_v7 }
 0xf13   : > { %v2848_v10 = vpop.f32.mrf.mxu1 }
 0xf15   : > { %v3578_v1 = vpop.f32.mrf.mxu1 }
 0xf16 PF: > { %s5436_s20 = sand.u32 1, %s4352_s28  }
 0xf17   : > { %s2859_s24 = scalar_lea.sflag [#allocation5], %s5436_s20 }
 0xf18   : > { %s5437_s15 = sld [smem:[#allocation35_spill]]  ;;  %s2889_s30 = sshll.u32 %s4930_s6, 4  ;;  %s2890_s30 = int_to_ptr.vmem [resolvable:$true] %s2889_s30 }
 0xf19   : > { %s5438_s27 = sld [smem:[#allocation36_spill]]  ;;  %s4428_s3 = smov 256  }
 0xf1a   : > { %s5439_s19 = sld [smem:[#allocation44_spill]]  ;;  %s4429_s18 = smov 512  }
 0xf1b   : > { %s5440_s7 = sld [smem:[#allocation66_spill]]  ;;  %s4430_s26 = smov 4  }
 0xf1c   : > { %s4431_s4 = smov 64   ;;  %s4432_s6 = smov 131072  }
 0xf1d   : > { %s4433_s10 = smov 0  }
 0xf1e   : > { %s3359_s21 = sshll.u32 %s5437_s15, 2 }
 0xf1f   : > { %s3368_s23 = sshll.u32 %s5438_s27, 4 }
 0xf20   : > { %s2876_s22 = sadd.s32 %s3368_s23, %s3359_s21  ;;  %p5441_p11 = scmp.ne.s32.totalorder %s5439_s19, 0 }
 0xf21   : > { %s3361_s8 = sshll.u32 %s2876_s22, 6 }
 0xf22   : > { %s2878_s1 = scalar_lea.hbm %s5440_s7, %s3361_s8  ;;  %3619 = sst [smem:[#allocation23]] (%p5441_p11), %s4428_s3 }
 0xf23   : > { %3620 = sst [smem:[#allocation23 + $0x1]] (%p5441_p11), %s4429_s18 }
 0xf24   : > { %3621 = sst [smem:[#allocation23 + $0x2]] (%p5441_p11), %s4430_s26 }
 0xf25   : > { %3622 = sst [smem:[#allocation23 + $0x3]] (%p5441_p11), %s4431_s4 }
 0xf26   : > { %3623 = sst [smem:[#allocation23 + $0x4]] (%p5441_p11), %s4431_s4 }
 0xf27   : > { %3624 = sst [smem:[#allocation23 + $0x5]] (%p5441_p11), %s4430_s26 }
 0xf28   : > { %3625 = dma.general (%p5441_p11), %s2890_s30, 512, %s2878_s1, %s2859_s24, %s4432_s6, [#allocation23], %s4433_s10, 0  }
 0xf29 PF: > { %s5442_s11 = sld [smem:[#allocation38_spill]] }
 0xf2a   : > { %s5443_s12 = sld [smem:[#allocation31_spill]] }
 0xf2b   : > { %s5444_s13 = sld [smem:[#allocation45_spill]] }
 0xf2f   : > { %p3688_p3 = scmp.ge.s32.totalorder %s5442_s11, 2 }
 0xf30   : > { %s2925_s29 = sand.u32 1, %s5443_s12  }
 0xf31   : > { %p5445_p8 = scmp.ne.s32.totalorder %s5444_s13, 0  ;;  %s2926_s0 = scalar_lea.sflag [#allocation5], %s2925_s29 }
 0xf33   : > { %p3672_p1 = pnand %p3688_p3, %p5445_p8 }
 0xf35   : > { %p3673_p2 = pneg %p3672_p1 }
 0xf37   : > { %4343 = dma.done.wait (%p3673_p2), %s2926_s0, 512  }
 0xf38   : > { %4345 = vsyncadd (%p3673_p2), %s2926_s0, 4294966784  ;;  %s39_s6 = sadd.s32 1, %s5442_s11   ;;  %s5446_s20 = sld [smem:[#allocation32_spill]] }
 0xf39   : > { %p36_p7 = scmp.ge.s32.totalorder %s39_s6, 6   ;;  %s5447_s29 = sld [smem:[#allocation43_spill]] }
 0xf3a   : > { %s5448_s30 = sld [smem:[#allocation33_spill]]  ;;  %s5454_s3 = smov %s4352_s28 }
 0xf3b   : > { %s5449_s4 = sld [smem:[#allocation34_spill]]  ;;  %s5456_s23 = smov %s4380_s5 }
 0xf3c   : > { %s5450_s0 = sld [smem:[#allocation42_spill]] }
 0xf3d   : > { %s5451_s1 = sld [smem:[#allocation37_spill]] }
 0xf3e   : > { %s5452_s24 = sld [smem:[#allocation40_spill]]  ;;  %s5455_s28 = smov %s5446_s20 }
 0xf3f   : > { %s5453_s15 = sld [smem:[#allocation41_spill]] }
 0xf41   :  { %38 = sbr.rel (!%p36_p7) target bundleno = 32 (0x20), region = 300 }
 0xf44   : > { %s5457_s5 = smov %s5452_s24 }
 0xf45   : > { %s5458_s24 = smov %s5453_s15 }
 0xf46   :  { %2931 = vsyncpa [#allocation4], 1 }
 0xf47   :  { %2933 = vsyncpa [#allocation4 + $0x1], 1 }
 0xf48   :  { %2934 = vsyncpa [#allocation7], 1 }
 0xf49   :  { %2935 = vsyncpa [#allocation10], 1 }
 0xf4a   :  { %2936 = vsyncpa [#allocation5], 1 }
 0xf4b   :  { %2938 = vsyncpa [#allocation5 + $0x1], 1 }

</bundles_post_ra>
